<compile_context>
chip_gen: v5e
topology: v5e:2x2
jax: 0.10.0
libtpu: 0.0.40
codegen_flags: <defaults>
</compile_context>

<pallas_src>
import functools
import math

import jax
import jax.numpy as jnp
from jax import lax
from jax.experimental import pallas as pl
from jax.experimental.pallas import tpu as pltpu


def _conv2d_cd_kernel(x_ref, w_ref, o_ref, *, height, width):
    """One batch element.

    x_ref: (1, Cin, H*W + 2*pad) bf16 -- flattened spatial, zero-padded lanes.
    w_ref: (9, Cout, Cin)        bf16 -- CD-folded taps, tap = ky*3 + kx.
    o_ref: (1, Cout, H*W)        f32.
    """
    hw = height * width
    pad = width + 1                      # max |dy*W + dx| for a 3x3 kernel
    c_out = o_ref.shape[1]

    # Column (w) index of every flattened spatial position, on the lane axis.
    col = lax.broadcasted_iota(jnp.int32, (1, hw), 1) % width

    acc = jnp.zeros((c_out, hw), jnp.float32)
    for ky in range(3):
        dy = ky - 1
        for kx in range(3):
            dx = kx - 1
            shift = dy * width + dx
            # Static, always in-bounds shifted window read from VMEM.
            xs = x_ref[0, :, pl.ds(pad + shift, hw)]          # [Cin, HW] bf16
            # Top/bottom borders are already zero (flat zero padding); only
            # the left/right image columns need masking for dx != 0.
            if dx == 1:
                xs = jnp.where(col < width - 1, xs, jnp.zeros_like(xs))
            elif dx == -1:
                xs = jnp.where(col >= 1, xs, jnp.zeros_like(xs))
            acc = acc + jnp.dot(w_ref[ky * 3 + kx], xs,
                                preferred_element_type=jnp.float32)

    o_ref[0] = acc


def conv2d_cd_forward(x_nchw, weight, theta=0.7):
    """Conv2d_cd forward. x: [N, Cin, H, W] f32, weight: [Cout, Cin, 3, 3] f32."""
    n, c_in, height, width = x_nchw.shape
    c_out = weight.shape[0]
    hw = height * width
    pad = width + 1

    # Fold the central-difference term into the center tap (exact in f32).
    # (theta ~ 0 reduces to the plain conv, matching the torch branch.)
    w_cd = weight.at[:, :, 1, 1].add(-theta * jnp.sum(weight, axis=(2, 3)))
    # Tap-major MXU layout: w_taps[t, co, ci] = w_cd[co, ci, ky, kx], t=ky*3+kx.
    w_taps = jnp.transpose(w_cd, (2, 3, 0, 1)).reshape(9, c_out, c_in)
    w_taps = w_taps.astype(jnp.bfloat16)

    # Keep NCHW; flatten spatial (free reshape) and zero-pad the lane axis so
    # every 3x3 tap is a static in-bounds window. bf16 halves the input DMA.
    x_flat = x_nchw.reshape(n, c_in, hw).astype(jnp.bfloat16)
    x_flat = jnp.pad(x_flat, ((0, 0), (0, 0), (pad, pad)))

    kernel = functools.partial(_conv2d_cd_kernel, height=height, width=width)

    out = pl.pallas_call(
        kernel,
        out_shape=jax.ShapeDtypeStruct((n, c_out, hw), jnp.float32),
        grid_spec=pltpu.PrefetchScalarGridSpec(
            num_scalar_prefetch=0,
            grid=(n,),
            in_specs=[
                pl.BlockSpec((1, c_in, hw + 2 * pad), lambda i: (i, 0, 0)),
                pl.BlockSpec((9, c_out, c_in), lambda i: (0, 0, 0)),
            ],
            out_specs=pl.BlockSpec((1, c_out, hw), lambda i: (i, 0, 0)),
        ),
        compiler_params=pltpu.CompilerParams(
            dimension_semantics=("parallel",)),
    )(x_flat, w_taps)

    return out.reshape(n, c_out, height, width)


def _reference_conv2d_cd(x, weight, theta):
    """Pure-JAX f32 reference following the torch forward literally."""
    out_normal = lax.conv_general_dilated(
        x, weight, window_strides=(1, 1), padding=((1, 1), (1, 1)),
        dimension_numbers=("NCHW", "OIHW", "NCHW"))
    kernel_diff = jnp.sum(weight, axis=(2, 3))[:, :, None, None]
    out_diff = lax.conv_general_dilated(
        x, kernel_diff, window_strides=(1, 1), padding=((0, 0), (0, 0)),
        dimension_numbers=("NCHW", "OIHW", "NCHW"))
    return out_normal - theta * out_diff


if __name__ == "__main__":
    key = jax.random.PRNGKey(0)
    k_x, k_w = jax.random.split(key)

    N, C_IN, C_OUT, H, W = 2, 128, 128, 16, 16
    THETA = 0.7

    x = jax.random.normal(k_x, (N, C_IN, H, W), jnp.float32)
    bound = 1.0 / math.sqrt(C_IN * 9)   # PyTorch Conv2d default init range
    w = jax.random.uniform(k_w, (C_OUT, C_IN, 3, 3), jnp.float32,
                           minval=-bound, maxval=bound)

    out = conv2d_cd_forward(x, w, theta=THETA)
    out = jax.block_until_ready(out)

    assert out.shape == (N, C_OUT, H, W)
    assert bool(jnp.all(jnp.isfinite(out)))

    ref = _reference_conv2d_cd(x, w, THETA)
    max_err = float(jnp.max(jnp.abs(out - ref)))
    # bf16 operands vs f32 reference -> small numerical difference only.
    assert max_err < 0.1, f"max abs error vs reference: {max_err}"

    print("KERNEL_OK")
</pallas_src>

<mosaic_0001>
module attributes {stable_mosaic.version = 11 : i64} {
  func.func @_conv2d_cd_kernel(%arg0: i32, %arg1: memref<1x128x290xbf16, #tpu.memory_space<vmem>>, %arg2: memref<9x128x128xbf16, #tpu.memory_space<vmem>>, %arg3: memref<1x128x256xf32, #tpu.memory_space<vmem>>) attributes {dimension_semantics = [#tpu.dimension_semantics<parallel>], iteration_bounds = array<i64: 2>, scalar_prefetch = 0 : i64, scratch_operands = 0 : i64, tpu.core_type = #tpu.core_type<tc>, window_params = [{transform_indices = @transform_0, window_bounds = array<i64: 1, 128, 290>}, {pipeline_mode = #tpu.pipeline_mode<synchronous>, transform_indices = @transform_1, window_bounds = array<i64: 9, 128, 128>}, {transform_indices = @transform_2, window_bounds = array<i64: 1, 128, 256>}]} {
    %0 = tpu.iota {dimensions = array<i32: 1>} : vector<1x256xi32>
    %c16_i32 = arith.constant 16 : i32
    %c0_i32 = arith.constant 0 : i32
    %1 = arith.cmpi eq, %c16_i32, %c0_i32 : i32
    %c1_i32 = arith.constant 1 : i32
    %2 = arith.select %1, %c1_i32, %c16_i32 : i32
    %3 = vector.broadcast %2 : i32 to vector<1x256xi32>
    %4 = arith.remsi %0, %3 : vector<1x256xi32>
    %c0_i32_0 = arith.constant 0 : i32
    %5 = vector.broadcast %c0_i32_0 : i32 to vector<1x256xi32>
    %6 = arith.cmpi ne, %4, %5 : vector<1x256xi32>
    %c0_i32_1 = arith.constant 0 : i32
    %7 = vector.broadcast %c0_i32_1 : i32 to vector<1x256xi32>
    %8 = arith.cmpi slt, %4, %7 : vector<1x256xi32>
    %c0_i32_2 = arith.constant 0 : i32
    %9 = arith.cmpi slt, %2, %c0_i32_2 : i32
    %10 = vector.broadcast %9 : i1 to vector<1x256xi1>
    %11 = vector.broadcast %10 : vector<1x256xi1> to vector<1x256xi1>
    %12 = arith.xori %8, %11 : vector<1x256xi1>
    %13 = arith.andi %12, %6 : vector<1x256xi1>
    %14 = vector.broadcast %2 : i32 to vector<1x256xi32>
    %15 = arith.addi %4, %14 : vector<1x256xi32>
    %16 = arith.select %13, %15, %4 : vector<1x256xi1>, vector<1x256xi32>
    %cst = arith.constant 0.000000e+00 : f32
    %17 = vector.broadcast %cst : f32 to vector<128x256xf32>
    %c0 = arith.constant 0 : index
    %c0_3 = arith.constant 0 : index
    %c0_4 = arith.constant 0 : index
    %18 = vector.load %arg1[%c0, %c0_3, %c0_4] : memref<1x128x290xbf16, #tpu.memory_space<vmem>>, vector<1x128x256xbf16>
    %19 = vector.shape_cast %18 : vector<1x128x256xbf16> to vector<128x256xbf16>
    %c1_i32_5 = arith.constant 1 : i32
    %20 = vector.broadcast %c1_i32_5 : i32 to vector<1x256xi32>
    %21 = arith.cmpi sge, %16, %20 : vector<1x256xi32>
    %cst_6 = arith.constant 0.000000e+00 : bf16
    %22 = vector.broadcast %cst_6 : bf16 to vector<128x256xbf16>
    %23 = vector.shape_cast %21 : vector<1x256xi1> to vector<1x256xi1>
    %24 = vector.broadcast %23 : vector<1x256xi1> to vector<128x256xi1>
    %25 = arith.select %24, %19, %22 : vector<128x256xi1>, vector<128x256xbf16>
    %c0_7 = arith.constant 0 : index
    %c0_8 = arith.constant 0 : index
    %c0_9 = arith.constant 0 : index
    %26 = vector.load %arg2[%c0_7, %c0_8, %c0_9] : memref<9x128x128xbf16, #tpu.memory_space<vmem>>, vector<1x128x128xbf16>
    %27 = vector.shape_cast %26 : vector<1x128x128xbf16> to vector<128x128xbf16>
    %cst_10 = arith.constant dense<0.000000e+00> : vector<128x256xf32>
    %28 = tpu.matmul %27, %25, %cst_10 {dimension_numbers = #tpu.dot_dimension_numbers<[1], [0], [0], [1], [0, 0, 1, 1], [], []>} : vector<128x128xbf16>, vector<128x256xbf16>, vector<128x256xf32> -> vector<128x256xf32>
    %29 = arith.addf %17, %28 : vector<128x256xf32>
    %c0_11 = arith.constant 0 : index
    %c0_12 = arith.constant 0 : index
    %c1 = arith.constant 1 : index
    %30 = vector.load %arg1[%c0_11, %c0_12, %c1] : memref<1x128x290xbf16, #tpu.memory_space<vmem>>, vector<1x128x256xbf16>
    %31 = vector.shape_cast %30 : vector<1x128x256xbf16> to vector<128x256xbf16>
    %c1_13 = arith.constant 1 : index
    %c0_14 = arith.constant 0 : index
    %c0_15 = arith.constant 0 : index
    %32 = vector.load %arg2[%c1_13, %c0_14, %c0_15] : memref<9x128x128xbf16, #tpu.memory_space<vmem>>, vector<1x128x128xbf16>
    %33 = vector.shape_cast %32 : vector<1x128x128xbf16> to vector<128x128xbf16>
    %cst_16 = arith.constant dense<0.000000e+00> : vector<128x256xf32>
    %34 = tpu.matmul %33, %31, %cst_16 {dimension_numbers = #tpu.dot_dimension_numbers<[1], [0], [0], [1], [0, 0, 1, 1], [], []>} : vector<128x128xbf16>, vector<128x256xbf16>, vector<128x256xf32> -> vector<128x256xf32>
    %35 = arith.addf %29, %34 : vector<128x256xf32>
    %c0_17 = arith.constant 0 : index
    %c0_18 = arith.constant 0 : index
    %c2 = arith.constant 2 : index
    %36 = vector.load %arg1[%c0_17, %c0_18, %c2] : memref<1x128x290xbf16, #tpu.memory_space<vmem>>, vector<1x128x256xbf16>
    %37 = vector.shape_cast %36 : vector<1x128x256xbf16> to vector<128x256xbf16>
    %c15_i32 = arith.constant 15 : i32
    %38 = vector.broadcast %c15_i32 : i32 to vector<1x256xi32>
    %39 = arith.cmpi slt, %16, %38 : vector<1x256xi32>
    %cst_19 = arith.constant 0.000000e+00 : bf16
    %40 = vector.broadcast %cst_19 : bf16 to vector<128x256xbf16>
    %41 = vector.shape_cast %39 : vector<1x256xi1> to vector<1x256xi1>
    %42 = vector.broadcast %41 : vector<1x256xi1> to vector<128x256xi1>
    %43 = arith.select %42, %37, %40 : vector<128x256xi1>, vector<128x256xbf16>
    %c2_20 = arith.constant 2 : index
    %c0_21 = arith.constant 0 : index
    %c0_22 = arith.constant 0 : index
    %44 = vector.load %arg2[%c2_20, %c0_21, %c0_22] : memref<9x128x128xbf16, #tpu.memory_space<vmem>>, vector<1x128x128xbf16>
    %45 = vector.shape_cast %44 : vector<1x128x128xbf16> to vector<128x128xbf16>
    %cst_23 = arith.constant dense<0.000000e+00> : vector<128x256xf32>
    %46 = tpu.matmul %45, %43, %cst_23 {dimension_numbers = #tpu.dot_dimension_numbers<[1], [0], [0], [1], [0, 0, 1, 1], [], []>} : vector<128x128xbf16>, vector<128x256xbf16>, vector<128x256xf32> -> vector<128x256xf32>
    %47 = arith.addf %35, %46 : vector<128x256xf32>
    %c0_24 = arith.constant 0 : index
    %c0_25 = arith.constant 0 : index
    %c16 = arith.constant 16 : index
    %48 = vector.load %arg1[%c0_24, %c0_25, %c16] : memref<1x128x290xbf16, #tpu.memory_space<vmem>>, vector<1x128x256xbf16>
    %49 = vector.shape_cast %48 : vector<1x128x256xbf16> to vector<128x256xbf16>
    %c1_i32_26 = arith.constant 1 : i32
    %50 = vector.broadcast %c1_i32_26 : i32 to vector<1x256xi32>
    %51 = arith.cmpi sge, %16, %50 : vector<1x256xi32>
    %cst_27 = arith.constant 0.000000e+00 : bf16
    %52 = vector.broadcast %cst_27 : bf16 to vector<128x256xbf16>
    %53 = vector.shape_cast %51 : vector<1x256xi1> to vector<1x256xi1>
    %54 = vector.broadcast %53 : vector<1x256xi1> to vector<128x256xi1>
    %55 = arith.select %54, %49, %52 : vector<128x256xi1>, vector<128x256xbf16>
    %c3 = arith.constant 3 : index
    %c0_28 = arith.constant 0 : index
    %c0_29 = arith.constant 0 : index
    %56 = vector.load %arg2[%c3, %c0_28, %c0_29] : memref<9x128x128xbf16, #tpu.memory_space<vmem>>, vector<1x128x128xbf16>
    %57 = vector.shape_cast %56 : vector<1x128x128xbf16> to vector<128x128xbf16>
    %cst_30 = arith.constant dense<0.000000e+00> : vector<128x256xf32>
    %58 = tpu.matmul %57, %55, %cst_30 {dimension_numbers = #tpu.dot_dimension_numbers<[1], [0], [0], [1], [0, 0, 1, 1], [], []>} : vector<128x128xbf16>, vector<128x256xbf16>, vector<128x256xf32> -> vector<128x256xf32>
    %59 = arith.addf %47, %58 : vector<128x256xf32>
    %c0_31 = arith.constant 0 : index
    %c0_32 = arith.constant 0 : index
    %c17 = arith.constant 17 : index
    %60 = vector.load %arg1[%c0_31, %c0_32, %c17] : memref<1x128x290xbf16, #tpu.memory_space<vmem>>, vector<1x128x256xbf16>
    %61 = vector.shape_cast %60 : vector<1x128x256xbf16> to vector<128x256xbf16>
    %c4 = arith.constant 4 : index
    %c0_33 = arith.constant 0 : index
    %c0_34 = arith.constant 0 : index
    %62 = vector.load %arg2[%c4, %c0_33, %c0_34] : memref<9x128x128xbf16, #tpu.memory_space<vmem>>, vector<1x128x128xbf16>
    %63 = vector.shape_cast %62 : vector<1x128x128xbf16> to vector<128x128xbf16>
    %cst_35 = arith.constant dense<0.000000e+00> : vector<128x256xf32>
    %64 = tpu.matmul %63, %61, %cst_35 {dimension_numbers = #tpu.dot_dimension_numbers<[1], [0], [0], [1], [0, 0, 1, 1], [], []>} : vector<128x128xbf16>, vector<128x256xbf16>, vector<128x256xf32> -> vector<128x256xf32>
    %65 = arith.addf %59, %64 : vector<128x256xf32>
    %c0_36 = arith.constant 0 : index
    %c0_37 = arith.constant 0 : index
    %c18 = arith.constant 18 : index
    %66 = vector.load %arg1[%c0_36, %c0_37, %c18] : memref<1x128x290xbf16, #tpu.memory_space<vmem>>, vector<1x128x256xbf16>
    %67 = vector.shape_cast %66 : vector<1x128x256xbf16> to vector<128x256xbf16>
    %c15_i32_38 = arith.constant 15 : i32
    %68 = vector.broadcast %c15_i32_38 : i32 to vector<1x256xi32>
    %69 = arith.cmpi slt, %16, %68 : vector<1x256xi32>
    %cst_39 = arith.constant 0.000000e+00 : bf16
    %70 = vector.broadcast %cst_39 : bf16 to vector<128x256xbf16>
    %71 = vector.shape_cast %69 : vector<1x256xi1> to vector<1x256xi1>
    %72 = vector.broadcast %71 : vector<1x256xi1> to vector<128x256xi1>
    %73 = arith.select %72, %67, %70 : vector<128x256xi1>, vector<128x256xbf16>
    %c5 = arith.constant 5 : index
    %c0_40 = arith.constant 0 : index
    %c0_41 = arith.constant 0 : index
    %74 = vector.load %arg2[%c5, %c0_40, %c0_41] : memref<9x128x128xbf16, #tpu.memory_space<vmem>>, vector<1x128x128xbf16>
    %75 = vector.shape_cast %74 : vector<1x128x128xbf16> to vector<128x128xbf16>
    %cst_42 = arith.constant dense<0.000000e+00> : vector<128x256xf32>
    %76 = tpu.matmul %75, %73, %cst_42 {dimension_numbers = #tpu.dot_dimension_numbers<[1], [0], [0], [1], [0, 0, 1, 1], [], []>} : vector<128x128xbf16>, vector<128x256xbf16>, vector<128x256xf32> -> vector<128x256xf32>
    %77 = arith.addf %65, %76 : vector<128x256xf32>
    %c0_43 = arith.constant 0 : index
    %c0_44 = arith.constant 0 : index
    %c32 = arith.constant 32 : index
    %78 = vector.load %arg1[%c0_43, %c0_44, %c32] : memref<1x128x290xbf16, #tpu.memory_space<vmem>>, vector<1x128x256xbf16>
    %79 = vector.shape_cast %78 : vector<1x128x256xbf16> to vector<128x256xbf16>
    %c1_i32_45 = arith.constant 1 : i32
    %80 = vector.broadcast %c1_i32_45 : i32 to vector<1x256xi32>
    %81 = arith.cmpi sge, %16, %80 : vector<1x256xi32>
    %cst_46 = arith.constant 0.000000e+00 : bf16
    %82 = vector.broadcast %cst_46 : bf16 to vector<128x256xbf16>
    %83 = vector.shape_cast %81 : vector<1x256xi1> to vector<1x256xi1>
    %84 = vector.broadcast %83 : vector<1x256xi1> to vector<128x256xi1>
    %85 = arith.select %84, %79, %82 : vector<128x256xi1>, vector<128x256xbf16>
    %c6 = arith.constant 6 : index
    %c0_47 = arith.constant 0 : index
    %c0_48 = arith.constant 0 : index
    %86 = vector.load %arg2[%c6, %c0_47, %c0_48] : memref<9x128x128xbf16, #tpu.memory_space<vmem>>, vector<1x128x128xbf16>
    %87 = vector.shape_cast %86 : vector<1x128x128xbf16> to vector<128x128xbf16>
    %cst_49 = arith.constant dense<0.000000e+00> : vector<128x256xf32>
    %88 = tpu.matmul %87, %85, %cst_49 {dimension_numbers = #tpu.dot_dimension_numbers<[1], [0], [0], [1], [0, 0, 1, 1], [], []>} : vector<128x128xbf16>, vector<128x256xbf16>, vector<128x256xf32> -> vector<128x256xf32>
    %89 = arith.addf %77, %88 : vector<128x256xf32>
    %c0_50 = arith.constant 0 : index
    %c0_51 = arith.constant 0 : index
    %c33 = arith.constant 33 : index
    %90 = vector.load %arg1[%c0_50, %c0_51, %c33] : memref<1x128x290xbf16, #tpu.memory_space<vmem>>, vector<1x128x256xbf16>
    %91 = vector.shape_cast %90 : vector<1x128x256xbf16> to vector<128x256xbf16>
    %c7 = arith.constant 7 : index
    %c0_52 = arith.constant 0 : index
    %c0_53 = arith.constant 0 : index
    %92 = vector.load %arg2[%c7, %c0_52, %c0_53] : memref<9x128x128xbf16, #tpu.memory_space<vmem>>, vector<1x128x128xbf16>
    %93 = vector.shape_cast %92 : vector<1x128x128xbf16> to vector<128x128xbf16>
    %cst_54 = arith.constant dense<0.000000e+00> : vector<128x256xf32>
    %94 = tpu.matmul %93, %91, %cst_54 {dimension_numbers = #tpu.dot_dimension_numbers<[1], [0], [0], [1], [0, 0, 1, 1], [], []>} : vector<128x128xbf16>, vector<128x256xbf16>, vector<128x256xf32> -> vector<128x256xf32>
    %95 = arith.addf %89, %94 : vector<128x256xf32>
    %c0_55 = arith.constant 0 : index
    %c0_56 = arith.constant 0 : index
    %c34 = arith.constant 34 : index
    %96 = vector.load %arg1[%c0_55, %c0_56, %c34] : memref<1x128x290xbf16, #tpu.memory_space<vmem>>, vector<1x128x256xbf16>
    %97 = vector.shape_cast %96 : vector<1x128x256xbf16> to vector<128x256xbf16>
    %c15_i32_57 = arith.constant 15 : i32
    %98 = vector.broadcast %c15_i32_57 : i32 to vector<1x256xi32>
    %99 = arith.cmpi slt, %16, %98 : vector<1x256xi32>
    %cst_58 = arith.constant 0.000000e+00 : bf16
    %100 = vector.broadcast %cst_58 : bf16 to vector<128x256xbf16>
    %101 = vector.shape_cast %99 : vector<1x256xi1> to vector<1x256xi1>
    %102 = vector.broadcast %101 : vector<1x256xi1> to vector<128x256xi1>
    %103 = arith.select %102, %97, %100 : vector<128x256xi1>, vector<128x256xbf16>
    %c8 = arith.constant 8 : index
    %c0_59 = arith.constant 0 : index
    %c0_60 = arith.constant 0 : index
    %104 = vector.load %arg2[%c8, %c0_59, %c0_60] : memref<9x128x128xbf16, #tpu.memory_space<vmem>>, vector<1x128x128xbf16>
    %105 = vector.shape_cast %104 : vector<1x128x128xbf16> to vector<128x128xbf16>
    %cst_61 = arith.constant dense<0.000000e+00> : vector<128x256xf32>
    %106 = tpu.matmul %105, %103, %cst_61 {dimension_numbers = #tpu.dot_dimension_numbers<[1], [0], [0], [1], [0, 0, 1, 1], [], []>} : vector<128x128xbf16>, vector<128x256xbf16>, vector<128x256xf32> -> vector<128x256xf32>
    %107 = arith.addf %95, %106 : vector<128x256xf32>
    %c0_62 = arith.constant 0 : index
    %c0_63 = arith.constant 0 : index
    %c0_64 = arith.constant 0 : index
    %108 = vector.load %arg3[%c0_62, %c0_63, %c0_64] : memref<1x128x256xf32, #tpu.memory_space<vmem>>, vector<1x128x256xf32>
    %109 = vector.shape_cast %108 : vector<1x128x256xf32> to vector<128x256xf32>
    %110 = vector.shape_cast %107 : vector<128x256xf32> to vector<1x128x256xf32>
    tpu.vector_store %arg3[%c0_62, %c0_63, %c0_64], %110 {strides = array<i32>} : memref<1x128x256xf32, #tpu.memory_space<vmem>>, vector<1x128x256xf32>,
    return
  }
  func.func @transform_0(%arg0: i32) -> (i32, i32, i32) {
    %c0_i32 = arith.constant 0 : i32
    %c0_i32_0 = arith.constant 0 : i32
    %c0_i32_1 = arith.constant 0 : i32
    return %arg0, %c0_i32, %c0_i32_0 : i32, i32, i32
  }
  func.func @transform_1(%arg0: i32) -> (i32, i32, i32) {
    %c0_i32 = arith.constant 0 : i32
    %c0_i32_0 = arith.constant 0 : i32
    %c0_i32_1 = arith.constant 0 : i32
    %c0_i32_2 = arith.constant 0 : i32
    return %c0_i32, %c0_i32_0, %c0_i32_1 : i32, i32, i32
  }
  func.func @transform_2(%arg0: i32) -> (i32, i32, i32) {
    %c0_i32 = arith.constant 0 : i32
    %c0_i32_0 = arith.constant 0 : i32
    %c0_i32_1 = arith.constant 0 : i32
    return %arg0, %c0_i32, %c0_i32_0 : i32, i32, i32
  }
}

</mosaic_0001>

<bundles_post_ra>
// kernel: tpu_custom_call.1
= control target key start
LH: loop header
LB: loop body
LE: loop exit
PB: predicated region body
PF: predicated region fallthrough
CT: control target
= control target key end

     0   :  { %7 = vsyncpa [#allocation3], 0  ;;  %s6922_s0 = inlined_call_operand.vmem [shape: bf16[2,128,290], index: 0, kind: input, shape index: {}]   ;;  %s6923_s1 = inlined_call_operand.vmem [shape: bf16[9,128,128], index: 1, kind: input, shape index: {}]   ;;  %s6924_s2 = inlined_call_operand.hbm [shape: f32[2,128,256], index: 2, kind: output, shape index: {}]  }
   0x1   :  { %9 = vsyncpa [#allocation3 + $0x1], 0  ;;  %s4492_s9 = smov 0   ;;  %s4494_s10 = smov 0  }
   0x2   :  { %s4496_s11 = smov 0   ;;  %s4498_s12 = smov 0  }
   0x3 LB: > { %s4513_s13 = sadd.s32 4294967295, %s4460_s12   ;;  %s3643_s14 = sadd.s32 4294967294, %s4460_s12   ;;  %s4460_s12 = sphi %s4498_s12, %s7192_s12   ;;  %s4456_s11 = sphi %s4496_s11, %s7191_s11   ;;  %s4452_s10 = sphi %s4494_s10, %s7190_s10   ;;  %s4448_s9 = sphi %s4492_s9, %s7189_s9  }
   0x4   : > { %s4517_s15 = sadd.s32 1, %s4460_s12   ;;  %s69_s16 = sadd.s32 1, %s4456_s11 }
   0x5   : > { %s66_s17 = ssub.s32 %s4460_s12, %s4517_s15  ;;  %p79_p0 = scmp.ne.s32.totalorder %s4456_s11, %s4452_s10 }
   0x6   : > { %p67_p1 = scmp.eq.s32.totalorder %s66_s17, 0  ;;  %p80_p2 = scmp.eq.s32.totalorder %s4513_s13, 1 }
   0x7   : > { %p85_p3 = scmp.ne.s32.totalorder %s4452_s10, %s4448_s9  ;;  %p86_p4 = scmp.eq.s32.totalorder %s3643_s14, 1 }
   0x8   : > { %s4528_s18 = scalar_select %p67_p1, %s4456_s11, %s69_s16  }
   0x9   : > { %p4530_p5 = por %p80_p2, %p79_p0  ;;  %p4534_p6 = por %p86_p4, %p85_p3 }
   0xa   : > { %p3646_p7 = scmp.ge.s32.totalorder %s4460_s12, 1  ;;  %p115_p8 = scmp.lt.s32.totalorder %s4460_s12, 3 }
   0xc   : > { %p116_p9 = pnand %p3646_p7, %p115_p8 }
   0xe   : > { %119 = sbr.rel (%p116_p9) target bundleno = 1224 (0x4c8), region = 28 }
  0x13   : > { %p137_p10 = scmp.lt.s32.totalorder %s4513_s13, 1  ;;  %s4462_s26 = smov 127   ;;  %v145_v27 = vlaneseq  ;;  %v4463_v55 = vmov 0   ;;  %vm460_vm6 = vcmask 1039360   ;;  %vm828_vm7 = vcmask 15360  }
  0x14   : > { %s4464_s27 = smov 2   ;;  %s4465_s28 = smov 16  }
  0x15   : > { %s138_s21 = scalar_select %p137_p10, %s4513_s13, 1  ;;  %v146_v33 = vand.u32 127, %v145_v27 }
  0x16   : > { %s4466_s29 = smov 126   ;;  %s4467_s30 = smov 112  }
  0x17   : > { %s4279_s22 = smul.u32 192, %s138_s21  ;;  %v147_v35 = vadd.s32 128, %v146_v33  ;;  %v152_v44 = vand.u32 15, %v146_v33  ;;  %s4468_s14 = smov 111  }
  0x18   : > { %s4470_s3 = smov 18   ;;  %s4471_s8 = smov 110  }
  0x19   : > { %s4545_s25 = scalar_lea.vmem %s6922_s0, %s4279_s22  ;;  %v159_v45 = vand.u32 15, %v147_v35  ;;  %vm817_vm0 = vcmp.lt.s32.totalorder %v152_v44, 15  ;;  %vm188_vm3 = vcmp.ge.s32.totalorder %v152_v44, 1  ;;  %s4472_s23 = smov 96  }
  0x1a   : > { %v3791_v0 = vld [vmem:[%s4545_s25 + $0xb0] sm:$0xf]  ;;  %v4197_v1 = vld [vmem:[%s4545_s25 + $0xb8] sm:$0xf0]  ;;  %v3783_v2 = vld [vmem:[%s4545_s25 + $0xa8] sm:$0xf] }
  0x1b   : > { %v4550_v3 = vor.u32 %v4197_v1, %v3791_v0  ;;  %v4181_v4 = vld [vmem:[%s4545_s25 + $0xb0] sm:$0xf0]  ;;  %v3771_v6 = vld [vmem:[%s4545_s25 + $0x90] sm:$0xf]  ;;  %v4179_v7 = vld [vmem:[%s4545_s25 + $0x98] sm:$0xf0] }
  0x1c   : > { %v4553_v5 = vor.u32 %v4181_v4, %v3783_v2  ;;  %v4180_v8 = vld [vmem:[%s4545_s25 + $0xac] sm:$0xf]  ;;  %v3785_v9 = vld [vmem:[%s4545_s25 + $0xb4] sm:$0xf0]  ;;  %v4178_v10 = vld [vmem:[%s4545_s25 + $0x94] sm:$0xf]  ;;  %v4564_v11 = vor.u32 %v4179_v7, %v3771_v6 }
  0x1d   : > { %458 = vrot.lane.b32.xlu1 %v4550_v3, %s4462_s26  ;;  %v3773_v12 = vld [vmem:[%s4545_s25 + $0x9c] sm:$0xf0]  ;;  %v4567_v13 = vor.u32 %v4180_v8, %v3785_v9  ;;  %v4176_v15 = vld [vmem:[%s4545_s25 + $0x7c] sm:$0xf]  ;;  %v3761_v16 = vld [vmem:[%s4545_s25 + $0x84] sm:$0xf0] }
  0x1e   : > { %454 = vrot.lane.b32.xlu0 %v4553_v5, %s4462_s26  ;;  %v4569_v14 = vor.u32 %v4178_v10, %v3773_v12  ;;  %v3759_v17 = vld [vmem:[%s4545_s25 + $0x78] sm:$0xf]  ;;  %v4177_v18 = vld [vmem:[%s4545_s25 + $0x80] sm:$0xf0]  ;;  %v4581_v19 = vor.u32 %v4176_v15, %v3761_v16  ;;  %v3749_v22 = vld [vmem:[%s4545_s25 + $0x6c] sm:$0xf0] }
  0x1f   : > { %v4583_v20 = vor.u32 %v4177_v18, %v3759_v17  ;;  %v4174_v21 = vld [vmem:[%s4545_s25 + $0x64] sm:$0xf]  ;;  %v3747_v23 = vld [vmem:[%s4545_s25 + $0x60] sm:$0xf]  ;;  %v4175_v24 = vld [vmem:[%s4545_s25 + $0x68] sm:$0xf0] }
  0x20   : > { %450 = vrot.lane.b32.xlu2 %v4569_v14, %s4462_s26  ;;  %v4593_v25 = vor.u32 %v4174_v21, %v3749_v22  ;;  %v4595_v26 = vor.u32 %v4175_v24, %v3747_v23  ;;  %v4172_v28 = vld [vmem:[%s4545_s25 + $0x4c] sm:$0xf]  ;;  %v3737_v29 = vld [vmem:[%s4545_s25 + $0x54] sm:$0xf0]  ;;  %v3735_v30 = vld [vmem:[%s4545_s25 + $0x48] sm:$0xf] }
  0x21   : > { %6971 = vst [vmem:[#allocation5_spill] sm:$0xff] %v4583_v20  ;;  %v4173_v31 = vld [vmem:[%s4545_s25 + $0x50] sm:$0xf0]  ;;  %v4605_v32 = vor.u32 %v4172_v28, %v3737_v29  ;;  %v3779_v36 = vld [vmem:[%s4545_s25 + $0x98] sm:$0xf]  ;;  %vm818_vm1 = vcmp.lt.s32.totalorder %v159_v45, 15 }
  0x22   : > { %6972 = vst [vmem:[#allocation6_spill] sm:$0xff] %v4593_v25  ;;  %v4607_v34 = vor.u32 %v4173_v31, %v3735_v30  ;;  %v4196_v37 = vld [vmem:[%s4545_s25 + $0xa0] sm:$0xf0]  ;;  %v4170_v38 = vld [vmem:[%s4545_s25 + $0x34] sm:$0xf]  ;;  %vm823_vm2 = vmpackc.low %vm818_vm1, %vm817_vm0  ;;  %vm189_vm4 = vcmp.ge.s32.totalorder %v159_v45, 1 }
  0x23   : > { %6973 = vst [vmem:[#allocation7_spill] sm:$0xff] %v4595_v26  ;;  %v3725_v39 = vld [vmem:[%s4545_s25 + $0x3c] sm:$0xf0]  ;;  %v4617_v40 = vor.u32 %v4196_v37, %v3779_v36  ;;  %v3723_v41 = vld [vmem:[%s4545_s25 + $0x30] sm:$0xf]  ;;  %v4644_v56 = vsel %vm823_vm2, 65537, %v4463_v55  ;;  %vm4663_vm5 = vmpackc.low %vm189_vm4, %vm188_vm3 }
  0x24   : > { %6974 = vst [vmem:[#allocation8_spill] sm:$0xff] %v4605_v32  ;;  %v4171_v42 = vld [vmem:[%s4545_s25 + $0x38] sm:$0xf0]  ;;  %v4623_v43 = vor.u32 %v4170_v38, %v3725_v39  ;;  %v3767_v46 = vld [vmem:[%s4545_s25 + $0x80] sm:$0xf]  ;;  %v4674_v4 = vsel %vm4663_vm5, 65537, %v4463_v55 }
  0x25   : > { %448 = vrot.lane.b32.xlu1 %v4564_v11, %s4462_s26  ;;  %6975 = vst [vmem:[#allocation9_spill] sm:$0xff] %v4607_v34  ;;  %v4195_v47 = vld [vmem:[%s4545_s25 + $0x88] sm:$0xf0]  ;;  %v4627_v48 = vor.u32 %v4171_v42, %v3723_v41  ;;  %v3711_v50 = vld [vmem:[%s4545_s25 + $0x18] sm:$0xf]  ;;  %vm1260_vm1 = vcmask 130048  }
  0x26   : > { %456 = vrot.lane.b32.xlu0 %v4567_v13, %s4462_s26  ;;  %6976 = vst [vmem:[#allocation10_spill] sm:$0xff] %v4623_v43  ;;  %v4629_v49 = vor.u32 %v4195_v47, %v3767_v46  ;;  %v4169_v51 = vld [vmem:[%s4545_s25 + $0x20] sm:$0xf0]  ;;  %v3755_v53 = vld [vmem:[%s4545_s25 + $0x68] sm:$0xf]  ;;  %s4473_s4 = smov 95  }
  0x27   : > { %6977 = vst [vmem:[#allocation11_spill] sm:$0xff] %v4627_v48  ;;  %v4639_v52 = vor.u32 %v4169_v51, %v3711_v50  ;;  %v4194_v54 = vld [vmem:[%s4545_s25 + $0x70] sm:$0xf0]  ;;  %v3699_v58 = vld [vmem:[%s4545_s25] sm:$0xf]  ;;  %s134_s5 = sand.u32 1, %s4452_s10  }
  0x28   : > { %452 = vrot.lane.b32.xlu2 %v4617_v40, %s4462_s26  ;;  %6978 = vst [vmem:[#allocation12_spill] sm:$0xff] %v4629_v49  ;;  %v4646_v57 = vor.u32 %v4194_v54, %v3755_v53  ;;  %v4167_v59 = vld [vmem:[%s4545_s25 + $0x8] sm:$0xf0]  ;;  %v3743_v61 = vld [vmem:[%s4545_s25 + $0x50] sm:$0xf]  ;;  %s3647_s6 = sshll.u32 %s134_s5, 8 }
  0x29   : > { %6979 = vst [vmem:[#allocation13_spill] sm:$0xff] %v4639_v52  ;;  %v4655_v60 = vor.u32 %v4167_v59, %v3699_v58  ;;  %v4193_v62 = vld [vmem:[%s4545_s25 + $0x58] sm:$0xf0]  ;;  %v3731_v1 = vld [vmem:[%s4545_s25 + $0x38] sm:$0xf]  ;;  %s4262_s7 = sshll.u32 %s4513_s13, 8 }
  0x2a   : > { %6980 = vst [vmem:[#allocation14_spill] sm:$0xff] %v4644_v56  ;;  %v4659_v63 = vor.u32 %v4193_v62, %v3743_v61  ;;  %v4192_v2 = vld [vmem:[%s4545_s25 + $0x40] sm:$0xf0]  ;;  %v4168_v7 = vld [vmem:[%s4545_s25 + $0x1c] sm:$0xf]  ;;  %s3566_s17 = scalar_lea.sflag [#allocation3], %s134_s5 }
  0x2b   : > { %6981 = vst [vmem:[#allocation15_spill] sm:$0xff] %v4646_v57  ;;  %v4676_v6 = vor.u32 %v4192_v2, %v3731_v1  ;;  %v3713_v8 = vld [vmem:[%s4545_s25 + $0x24] sm:$0xf0]  ;;  %v4166_v10 = vld [vmem:[%s4545_s25 + $0x4] sm:$0xf] }
  0x2c   : > { %6982 = vst [vmem:[#allocation16_spill] sm:$0xff] %v4655_v60  ;;  %v4684_v9 = vor.u32 %v4168_v7, %v3713_v8  ;;  %v3701_v12 = vld [vmem:[%s4545_s25 + $0xc] sm:$0xf0]  ;;  %v3719_v16 = vld [vmem:[%s4545_s25 + $0x20] sm:$0xf] }
  0x2d   : > { %444 = vrot.lane.b32.xlu1 %v4581_v19, %s4462_s26  ;;  %6983 = vst [vmem:[#allocation17_spill] sm:$0xff] %v4659_v63  ;;  %v4690_v15 = vor.u32 %v4166_v10, %v3701_v12  ;;  %v4191_v17 = vld [vmem:[%s4545_s25 + $0x28] sm:$0xf0]  ;;  %v3707_v21 = vld [vmem:[%s4545_s25 + $0x8] sm:$0xf]  ;;  %v4723_v10 = vunpack.c.l.b16 %v4463_v55  ;;  %v4726_v12 = vunpack.c.h.b16 %v4463_v55 }
  0x2e   : > { %442 = vrot.lane.b32.xlu0 %v4583_v20, %s4462_s26  ;;  %6986 = vst [vmem:[#allocation18_spill] sm:$0xff] %v4674_v4  ;;  %v4696_v18 = vor.u32 %v4191_v17, %v3719_v16  ;;  %v4190_v22 = vld [vmem:[%s4545_s25 + $0x10] sm:$0xf0]  ;;  %v4737_v55 = vld [vmem:[%s4545_s25 + $0xa8] sm:$0xff] }
  0x2f   : > { %6987 = vst [vmem:[#allocation19_spill] sm:$0xff] %v4676_v6  ;;  %v4702_v23 = vor.u32 %v4190_v22, %v3707_v21 }
  0x30   : > { %446 = vrot.lane.b32.xlu2 %v4629_v49, %s4462_s26  ;;  %6988 = vst [vmem:[#allocation20_spill] sm:$0xff] %v4684_v9 }
  0x31   : > { %6989 = vst [vmem:[#allocation21_spill] sm:$0xff] %v4690_v15 }
  0x32   : > { %6990 = vst [vmem:[#allocation22_spill] sm:$0xff] %v4696_v18 }
  0x33   : > { %6991 = vst [vmem:[#allocation23_spill] sm:$0xff] %v4702_v23 }
  0x34   : > { %6992 = vst [vmem:[#allocation24_spill] sm:$0xff] %v4723_v10 }
  0x35   : > { %438 = vrot.lane.b32.xlu1 %v4593_v25, %s4462_s26  ;;  %6993 = vst [vmem:[#allocation25_spill] sm:$0xff] %v4726_v12  ;;  %v5013_v25 = vld [vmem:[%s4545_s25 + $0x14] sm:$0xf] }
  0x36   : > { %436 = vrot.lane.b32.xlu0 %v4595_v26, %s4462_s26  ;;  %v4982_v26 = vld [vmem:[%s4545_s25 + $0x24] sm:$0xff] }
  0x38   : > { %440 = vrot.lane.b32.xlu2 %v4646_v57, %s4462_s26  ;;  %v4979_v57 = vld [vmem:[%s4545_s25 + $0x18] sm:$0xff] }
  0x3d   : > { %432 = vrot.lane.b32.xlu1 %v4605_v32, %s4462_s26 }
  0x3e   : > { %430 = vrot.lane.b32.xlu0 %v4607_v34, %s4462_s26  ;;  %v4976_v34 = vld [vmem:[%s4545_s25 + $0x2c] sm:$0xf] }
  0x3f   : > { %7001 = vst [vmem:[#allocation27_spill] sm:$0xff] %v4976_v34 }
  0x40   : > { %434 = vrot.lane.b32.xlu2 %v4659_v63, %s4462_s26  ;;  %v4947_v63 = vld [vmem:[%s4545_s25 + $0x3c] sm:$0xff] }
  0x45   : > { %426 = vrot.lane.b32.xlu1 %v4623_v43, %s4462_s26  ;;  %v4944_v43 = vld [vmem:[%s4545_s25 + $0x30] sm:$0xff] }
  0x46   : > { %424 = vrot.lane.b32.xlu0 %v4627_v48, %s4462_s26 }
  0x48   : > { %428 = vrot.lane.b32.xlu2 %v4676_v6, %s4462_s26 }
  0x4d   : > { %418 = vrot.lane.b32.xlu1 %v4639_v52, %s4462_s26  ;;  %v4909_v52 = vld [vmem:[%s4545_s25 + $0x48] sm:$0xff] }
  0x4e   : > { %825 = vrot.lane.b32.xlu0 %v4644_v56, %s4464_s27 }
  0x50   : > { %420 = vrot.lane.b32.xlu2 %v4684_v9, %s4462_s26  ;;  %v4941_v9 = vld [vmem:[%s4545_s25 + $0x44] sm:$0xf] }
  0x55   : > { %412 = vrot.lane.b32.xlu1 %v4655_v60, %s4462_s26 }
  0x56   : > { %422 = vrot.lane.b32.xlu0 %v4696_v18, %s4462_s26  ;;  %v4863_v18 = vld [vmem:[%s4545_s25 + $0x74] sm:$0xf] }
  0x58   : > { %414 = vrot.lane.b32.xlu2 %v4690_v15, %s4462_s26  ;;  %v4906_v15 = vld [vmem:[%s4545_s25 + $0x5c] sm:$0xf] }
  0x5d   : > { %1257 = vrot.lane.b32.xlu1 %v4674_v4, %s4465_s28  ;;  %v4860_v4 = vld [vmem:[%s4545_s25 + $0x68] sm:$0xf] }
  0x5e   : > { %416 = vrot.lane.b32.xlu0 %v4702_v23, %s4462_s26  ;;  %s4418_s26 = scalar_lea.hbm %s6924_s2, 512 }
  0x7a   : > { %v451_v30 = vpop.permute.xlu2 %450 }
  0x82   : > { %v453_v41 = vpop.permute.xlu2 %452 }
  0x83   : > { %v474_v45 = vsel %vm460_vm6, %v451_v30, %v453_v41 }
  0x8a   : > { %v447_v47 = vpop.permute.xlu2 %446 }
  0x8f   : > { %v459_v24 = vpop.permute.xlu1 %458 }
  0x90   : > { %v455_v27 = vpop.permute.xlu0 %454 }
  0x92   : > { %v441_v58 = vpop.permute.xlu2 %440 }
  0x97   : > { %v449_v28 = vpop.permute.xlu1 %448 }
  0x98   : > { %v457_v29 = vpop.permute.xlu0 %456  ;;  %v473_v35 = vsel %vm460_vm6, %v449_v28, %v451_v30  ;;  %v4729_v28 = vld [vmem:[%s4545_s25 + $0xb0] sm:$0xf]  ;;  %v4740_v30 = vld [vmem:[%s4545_s25 + $0xb4] sm:$0xff] }
  0x99   : > { %v475_v31 = vsel %vm460_vm6, %v455_v27, %v457_v29  ;;  %v476_v33 = vsel %vm460_vm6, %v457_v29, %v459_v24  ;;  %v4732_v29 = vld [vmem:[%s4545_s25 + $0xbc] sm:$0xf] }
  0x9a   : > { %493 = vmatpush.bf16.msra.mxu0 %v475_v31  ;;  %4263 = vmatpush.bf16.msra.mxu2 %v475_v31  ;;  %v435_v2 = vpop.permute.xlu2 %434  ;;  %v4202_v31 = vld [vmem:[%s6923_s1 + $0x60] sm:$0xff] }
  0x9b   : > { %542 = vmatpush.bf16.msra.mxu1 %v476_v33  ;;  %4271 = vmatpush.bf16.msra.mxu3 %v476_v33 }
  0x9e   : > { %494 = vmatpush.bf16.msra.mxu0 %v473_v35  ;;  %4264 = vmatpush.bf16.msra.mxu2 %v473_v35 }
  0x9f   : > { %v445_v36 = vpop.permute.xlu1 %444  ;;  %543 = vmatpush.bf16.msra.mxu1 %v474_v45  ;;  %4272 = vmatpush.bf16.msra.mxu3 %v474_v45  ;;  %v4771_v45 = vld [vmem:[%s4545_s25 + $0x98] sm:$0xf] }
  0xa0   : > { %v443_v37 = vpop.permute.xlu0 %442  ;;  %v472_v53 = vsel %vm460_vm6, %v445_v36, %v447_v47 }
  0xa1   : > { %v471_v38 = vsel %vm460_vm6, %v443_v37, %v445_v36 }
  0xa2   : > { %495 = vmatpush.bf16.msra.mxu0 %v471_v38  ;;  %4265 = vmatpush.bf16.msra.mxu2 %v471_v38  ;;  %v429_v38 = vpop.permute.xlu2 %428 }
  0xa3   : > { %544 = vmatpush.bf16.msra.mxu1 %v472_v53  ;;  %4273 = vmatpush.bf16.msra.mxu3 %v472_v53  ;;  %v4782_v53 = vld [vmem:[%s4545_s25 + $0x9c] sm:$0xff] }
  0xa7   : > { %v439_v39 = vpop.permute.xlu1 %438 }
  0xa8   : > { %v437_v42 = vpop.permute.xlu0 %436  ;;  %v470_v61 = vsel %vm460_vm6, %v439_v39, %v441_v58 }
  0xa9   : > { %v469_v44 = vsel %vm460_vm6, %v437_v42, %v439_v39  ;;  %545 = vmatpush.bf16.msra.mxu1 %v470_v61  ;;  %4274 = vmatpush.bf16.msra.mxu3 %v470_v61 }
  0xaa   : > { %496 = vmatpush.bf16.msra.mxu0 %v469_v44  ;;  %4266 = vmatpush.bf16.msra.mxu2 %v469_v44 }
  0xaf   : > { %v433_v46 = vpop.permute.xlu1 %432 }
  0xb0   : > { %v431_v50 = vpop.permute.xlu0 %430  ;;  %v468_v8 = vsel %vm460_vm6, %v433_v46, %v435_v2 }
  0xb1   : > { %v467_v51 = vsel %vm460_vm6, %v431_v50, %v433_v46  ;;  %546 = vmatpush.bf16.msra.mxu1 %v468_v8  ;;  %4275 = vmatpush.bf16.msra.mxu3 %v468_v8  ;;  %v4774_v46 = vld [vmem:[%s4545_s25 + $0xa4] sm:$0xf] }
  0xb2   : > { %497 = vmatpush.bf16.msra.mxu0 %v467_v51  ;;  %4267 = vmatpush.bf16.msra.mxu2 %v467_v51  ;;  %v4779_v51 = vld [vmem:[%s4545_s25 + $0x90] sm:$0xff] }
  0xb7   : > { %v4714_v54 = vpop.permute.xlu1 %426 }
  0xb8   : > { %v425_v59 = vpop.permute.xlu0 %424 }
  0xb9   : > { %v465_v62 = vsel %vm460_vm6, %v425_v59, %v4714_v54 }
  0xba   : > { %498 = vmatpush.bf16.msra.mxu0 %v465_v62  ;;  %4268 = vmatpush.bf16.msra.mxu2 %v465_v62 }
  0xbf   : > { %v4719_v1 = vpop.permute.xlu1 %418 }
  0xc0   : > { %v826_v7 = vpop.permute.xlu0 %825 }
  0xc1   : > { %v827_v16 = vrot.slane %v826_v7, 4 }
  0xc3   : > { %v829_v17 = vsel %vm828_vm7, %v827_v16, %v826_v7  ;;  %v837_v21 = vunpack.c.l.b16 %v827_v16  ;;  %v838_v22 = vunpack.c.h.b16 %v827_v16  ;;  %vm1801_vm7 = vcmask 908288  }
  0xc4   : > { %v830_v24 = vunpack.c.l.b16 %v829_v17  ;;  %v831_v27 = vunpack.c.h.b16 %v829_v17 }
  0xc5   : > { %vm841_vm8 = vcmp.ne.s32.totalorder %v837_v21, %v4723_v10  ;;  %vm842_vm9 = vcmp.ne.s32.totalorder %v838_v22, %v4726_v12 }
  0xc6   : > { %vm834_vm10 = vcmp.ne.s32.totalorder %v830_v24, %v4723_v10  ;;  %vm835_vm11 = vcmp.ne.s32.totalorder %v831_v27, %v4726_v12  ;;  %vm4744_vm12 = vmpackc.low %vm842_vm9, %vm841_vm8  ;;  %v4806_v24 = vpop.permute.xlu2 %420  ;;  %vm1967_vm8 = vcmask 146432  }
  0xc7   : > { %vm4748_vm13 = vmpackc.low %vm835_vm11, %vm834_vm10  ;;  %v4752_v35 = vpop.permute.xlu1 %412  ;;  %v873_v36 = vsel %vm4744_vm12, %v4729_v28, 0  ;;  %v875_v37 = vsel %vm4744_vm12, %v4732_v29, 0  ;;  %v869_v61 = vsel %vm4744_vm12, %v4771_v45, 0  ;;  %v871_v62 = vsel %vm4744_vm12, %v4774_v46, 0 }
  0xc8   : > { %v1017_v39 = vunpack.c.l.b16 %v873_v36  ;;  %v1020_v41 = vunpack.c.l.b16 %v875_v37  ;;  %v4763_v42 = vsel %vm4748_vm13, %v4737_v55, 0  ;;  %v4768_v44 = vsel %vm4748_vm13, %v4740_v30, 0  ;;  %v4812_v36 = vld [vmem:[%s4545_s25 + $0x80] sm:$0xf]  ;;  %v4815_v37 = vld [vmem:[%s4545_s25 + $0x8c] sm:$0xf] }
  0xc9   : > { %v1016_v47 = vunpack.c.h.b16 %v4763_v42  ;;  %v1019_v50 = vunpack.c.h.b16 %v4768_v44  ;;  %v4794_v2 = vsel %vm4748_vm13, %v4779_v51, 0  ;;  %v4799_v7 = vsel %vm4748_vm13, %v4782_v53, 0 }
  0xca   : > { %v1044_v58 = vpack.c.b16 %v1020_v41, %v1017_v39  ;;  %v1011_v8 = vunpack.c.l.b16 %v869_v61  ;;  %v1014_v16 = vunpack.c.l.b16 %v871_v62  ;;  %v1010_v21 = vunpack.c.h.b16 %v4794_v2  ;;  %v4818_v39 = vld [vmem:[%s4545_s25 + $0x78] sm:$0xff]  ;;  %v4821_v41 = vld [vmem:[%s4545_s25 + $0x84] sm:$0xff] }
  0xcb   : > { %v1043_v59 = vpack.c.b16 %v1019_v50, %v1016_v47  ;;  %v1013_v22 = vunpack.c.h.b16 %v4799_v7  ;;  %v466_v47 = vsel %vm460_vm6, %v4714_v54, %v429_v38  ;;  %v865_v62 = vsel %vm4744_vm12, %v4812_v36, 0 }
  0xcc   : > { %1091 = vrot.lane.b32.xlu0 %v1044_v58, %s4466_s29  ;;  %547 = vmatpush.bf16.msra.mxu1 %v466_v47  ;;  %v867_v23 = vsel %vm4744_vm12, %v4815_v37, 0  ;;  %v4839_v54 = vsel %vm4748_vm13, %v4818_v39, 0  ;;  %v4844_v38 = vsel %vm4748_vm13, %v4821_v41, 0  ;;  %v861_v60 = vsel %vm4744_vm12, %v4860_v4, 0 }
  0xcd   : > { %1089 = vrot.lane.b32.xlu2 %v1043_v59, %s4466_s29  ;;  %v1041_v59 = vpack.c.b16 %v1014_v16, %v1011_v8  ;;  %4276 = vmatpush.bf16.msra.mxu3 %v466_v47  ;;  %v1040_v61 = vpack.c.b16 %v1013_v22, %v1010_v21  ;;  %v1005_v16 = vunpack.c.l.b16 %v865_v62  ;;  %v1008_v21 = vunpack.c.l.b16 %v867_v23  ;;  %v4872_v62 = vld [vmem:[%s4545_s25 + $0x6c] sm:$0xff] }
  0xce   : > { %v1007_v56 = vunpack.c.h.b16 %v4844_v38  ;;  %v463_v23 = vsel %vm460_vm6, %v4719_v1, %v4806_v24  ;;  %v863_v1 = vsel %vm4744_vm12, %v4863_v18, 0 }
  0xcf   : > { %v4802_v17 = vpop.permute.xlu1 %1257  ;;  %499 = vmatpush.bf16.msra.mxu0 %v463_v23  ;;  %4269 = vmatpush.bf16.msra.mxu2 %v463_v23 }
  0xd0   : > { %v4809_v27 = vrot.slane %v4802_v17, 4 }
  0xd2   : > { %v1269_v50 = vunpack.c.l.b16 %v4809_v27  ;;  %v1270_v58 = vunpack.c.h.b16 %v4809_v27 }
  0xd4   : > { %vm1273_vm14 = vcmp.ne.s32.totalorder %v1269_v50, %v4723_v10  ;;  %vm1274_vm15 = vcmp.ne.s32.totalorder %v1270_v58, %v4726_v12  ;;  %1085 = vrot.lane.b32.xlu0 %v1041_v59, %s4466_s29  ;;  %v1004_v59 = vunpack.c.h.b16 %v4839_v54 }
  0xd5   : > { %vm4846_vm0 = vmpackc.low %vm1274_vm15, %vm1273_vm14  ;;  %1083 = vrot.lane.b32.xlu2 %v1040_v61, %s4466_s29  ;;  %vm2398_vm15 = vcmask 261120  }
  0xd6   : > { %v1305_v22 = vsel %vm4846_vm0, %v4729_v28, 0  ;;  %v1307_v47 = vsel %vm4846_vm0, %v4732_v29, 0  ;;  %v4869_v28 = vld [vmem:[%s4545_s25 + $0x60] sm:$0xff]  ;;  %v4874_v29 = vpop.permute.xlu2 %414 }
  0xd7   : > { %v1449_v50 = vunpack.c.l.b16 %v1305_v22  ;;  %v1452_v58 = vunpack.c.l.b16 %v1307_v47  ;;  %v1038_v22 = vpack.c.b16 %v1008_v21, %v1005_v16  ;;  %v1037_v47 = vpack.c.b16 %v1007_v56, %v1004_v59 }
  0xd8   : > { %v4890_v56 = vsel %vm4748_vm13, %v4869_v28, 0  ;;  %v4895_v16 = vsel %vm4748_vm13, %v4872_v62, 0  ;;  %v1015_v21 = vunpack.c.l.b16 %v4763_v42  ;;  %v1002_v59 = vunpack.c.l.b16 %v863_v1 }
  0xd9   : > { %v1476_v61 = vpack.c.b16 %v1452_v58, %v1449_v50  ;;  %v461_v50 = vsel %vm460_vm6, %v4752_v35, %v4874_v29  ;;  %v1018_v35 = vunpack.c.l.b16 %v4768_v44  ;;  %v999_v58 = vunpack.c.l.b16 %v861_v60 }
  0xda   : > { %500 = vmatpush.bf16.msra.mxu0 %v461_v50  ;;  %4270 = vmatpush.bf16.msra.mxu2 %v461_v50  ;;  %v998_v23 = vunpack.c.h.b16 %v4890_v56  ;;  %v859_v1 = vsel %vm4744_vm12, %v4906_v15, 0  ;;  %v4925_v50 = vsel %vm4748_vm13, %v4909_v52, 0 }
  0xdb   : > { %1523 = vrot.lane.b32.xlu1 %v1476_v61, %s4467_s30  ;;  %v1001_v61 = vunpack.c.h.b16 %v4895_v16  ;;  %v1042_v6 = vpack.c.b16 %v1018_v35, %v1015_v21  ;;  %v1035_v42 = vpack.c.b16 %v1002_v59, %v999_v58  ;;  %v1009_v21 = vunpack.c.l.b16 %v4794_v2 }
  0xdc   : > { %1079 = vrot.lane.b32.xlu0 %v1038_v22, %s4466_s29  ;;  %v4903_v22 = vld [vmem:[%s4545_s25 + $0x50] sm:$0xf]  ;;  %v1012_v35 = vunpack.c.l.b16 %v4799_v7  ;;  %v996_v59 = vunpack.c.l.b16 %v859_v1  ;;  %v4960_v1 = vsel %vm4748_vm13, %v4944_v43, 0 }
  0xdd   : > { %1077 = vrot.lane.b32.xlu2 %v1037_v47, %s4466_s29  ;;  %v4912_v47 = vld [vmem:[%s4545_s25 + $0x54] sm:$0xff]  ;;  %v1034_v60 = vpack.c.b16 %v1001_v61, %v998_v23  ;;  %v857_v44 = vsel %vm4744_vm12, %v4903_v22, 0  ;;  %v992_v23 = vunpack.c.h.b16 %v4925_v50  ;;  %521 = vmatmul.bf16.vlgmr.msra.gmra.mxu2 %v4202_v31 }
  0xde   : > { %v993_v58 = vunpack.c.l.b16 %v857_v44  ;;  %v1039_v48 = vpack.c.b16 %v1012_v35, %v1009_v21  ;;  %v855_v44 = vsel %vm4744_vm12, %v4941_v9, 0  ;;  %v1003_v21 = vunpack.c.l.b16 %v4839_v54 }
  0xdf   : > { %v1006_v35 = vunpack.c.l.b16 %v4844_v38  ;;  %v1261_v54 = vsel %vm1260_vm1, %v4809_v27, %v4802_v17  ;;  %v997_v17 = vunpack.c.l.b16 %v4890_v56  ;;  %v1000_v27 = vunpack.c.l.b16 %v4895_v16  ;;  %v5018_v56 = vld [vmem:[%s4545_s25] sm:$0xff]  ;;  %v5021_v16 = vld [vmem:[%s4545_s25 + $0xc] sm:$0xff] }
  0xe1   : > { %v1036_v32 = vpack.c.b16 %v1006_v35, %v1003_v21  ;;  %v4997_v21 = vsel %vm4748_vm13, %v4979_v57, 0  ;;  %v1262_v35 = vunpack.c.l.b16 %v1261_v54  ;;  %v1033_v49 = vpack.c.b16 %v1000_v27, %v997_v17 }
  0xe2   : > { %v991_v17 = vunpack.c.l.b16 %v4925_v50 }
  0xe3   : > { %1087 = vrot.lane.b32.xlu1 %v1042_v6, %s4466_s29  ;;  %v4930_v6 = vsel %vm4748_vm13, %v4912_v47, 0  ;;  %vm1266_vm2 = vcmp.ne.s32.totalorder %v1262_v35, %v4723_v10 }
  0xe4   : > { %1073 = vrot.lane.b32.xlu0 %v1035_v42, %s4466_s29  ;;  %v995_v61 = vunpack.c.h.b16 %v4930_v6  ;;  %v4938_v42 = vld [vmem:[%s4545_s25 + $0x38] sm:$0xf]  ;;  %v994_v27 = vunpack.c.l.b16 %v4930_v6 }
  0xe5   : > { %1071 = vrot.lane.b32.xlu2 %v1034_v60, %s4466_s29  ;;  %v1032_v60 = vpack.c.b16 %v996_v59, %v993_v58  ;;  %v853_v7 = vsel %vm4744_vm12, %v4938_v42, 0  ;;  %v990_v59 = vunpack.c.l.b16 %v855_v44  ;;  %v851_v44 = vsel %vm4744_vm12, %v4976_v34, 0  ;;  %v423_v34 = vpop.permute.xlu0 %422 }
  0xe6   : > { %v1031_v2 = vpack.c.b16 %v995_v61, %v992_v23  ;;  %v987_v58 = vunpack.c.l.b16 %v853_v7  ;;  %v986_v23 = vunpack.c.h.b16 %v4960_v1 }
  0xeb   : > { %1081 = vrot.lane.b32.xlu1 %v1039_v48, %s4466_s29  ;;  %v4965_v48 = vsel %vm4748_vm13, %v4947_v63, 0 }
  0xec   : > { %1067 = vrot.lane.b32.xlu0 %v1032_v60, %s4466_s29  ;;  %v989_v61 = vunpack.c.h.b16 %v4965_v48  ;;  %v4973_v60 = vld [vmem:[%s4545_s25 + $0x20] sm:$0xf] }
  0xed   : > { %1065 = vrot.lane.b32.xlu2 %v1031_v2, %s4466_s29  ;;  %7000 = vst [vmem:[#allocation26_spill] sm:$0xff] %v4973_v60  ;;  %v1029_v2 = vpack.c.b16 %v990_v59, %v987_v58  ;;  %v849_v7 = vsel %vm4744_vm12, %v4973_v60, 0  ;;  %v984_v59 = vunpack.c.l.b16 %v851_v44  ;;  %v5010_v60 = vld [vmem:[%s4545_s25 + $0x8] sm:$0xf] }
  0xee   : > { %v1028_v38 = vpack.c.b16 %v989_v61, %v986_v23  ;;  %v981_v58 = vunpack.c.l.b16 %v849_v7  ;;  %v1263_v23 = vunpack.c.h.b16 %v1261_v54  ;;  %v980_v61 = vunpack.c.h.b16 %v4997_v21 }
  0xef   : > { %v845_v44 = vsel %vm4744_vm12, %v5010_v60, 0 }
  0xf0   : > { %v1026_v54 = vpack.c.b16 %v984_v59, %v981_v58  ;;  %vm1267_vm3 = vcmp.ne.s32.totalorder %v1263_v23, %v4726_v12  ;;  %v975_v58 = vunpack.c.l.b16 %v845_v44 }
  0xf1   : > { %vm5047_vm4 = vmpackc.low %vm1267_vm3, %vm1266_vm2 }
  0xf2   : > { %v1304_v6 = vsel %vm5047_vm4, %v4737_v55, 0 }
  0xf3   : > { %1075 = vrot.lane.b32.xlu1 %v1036_v32, %s4466_s29  ;;  %v5002_v32 = vsel %vm4748_vm13, %v4982_v26, 0  ;;  %v1448_v44 = vunpack.c.h.b16 %v1304_v6 }
  0xf4   : > { %1061 = vrot.lane.b32.xlu0 %v1029_v2, %s4466_s29  ;;  %v983_v2 = vunpack.c.h.b16 %v5002_v32 }
  0xf5   : > { %1059 = vrot.lane.b32.xlu2 %v1028_v38, %s4466_s29  ;;  %v464_v38 = vsel %vm460_vm6, %v4806_v24, %v423_v34  ;;  %v847_v34 = vsel %vm4744_vm12, %v5013_v25, 0  ;;  %v5036_v24 = vsel %vm4748_vm13, %v5018_v56, 0 }
  0xf6   : > { %548 = vmatpush.bf16.msra.mxu1 %v464_v38  ;;  %4277 = vmatpush.bf16.msra.mxu3 %v464_v38  ;;  %v1025_v7 = vpack.c.b16 %v983_v2, %v980_v61  ;;  %v978_v59 = vunpack.c.l.b16 %v847_v34  ;;  %v974_v23 = vunpack.c.h.b16 %v5036_v24  ;;  %v417_v61 = vpop.permute.xlu0 %416  ;;  %v1030_v2 = vpack.c.b16 %v994_v27, %v991_v17 }
  0xf7   : > { %v462_v50 = vsel %vm460_vm6, %v4874_v29, %v417_v61  ;;  %v1306_v38 = vsel %vm5047_vm4, %v4740_v30, 0  ;;  %v985_v29 = vunpack.c.l.b16 %v4960_v1  ;;  %v988_v17 = vunpack.c.l.b16 %v4965_v48 }
  0xf8   : > { %v1451_v34 = vunpack.c.h.b16 %v1306_v38  ;;  %v1447_v27 = vunpack.c.l.b16 %v1304_v6  ;;  %v1450_v61 = vunpack.c.l.b16 %v1306_v38  ;;  %v979_v1 = vunpack.c.l.b16 %v4997_v21 }
  0xf9   : > { %v1027_v10 = vpack.c.b16 %v988_v17, %v985_v29  ;;  %v982_v48 = vunpack.c.l.b16 %v5002_v32  ;;  %v1296_v21 = vsel %vm5047_vm4, %v4818_v39, 0  ;;  %v1298_v32 = vsel %vm5047_vm4, %v4821_v41, 0 }
  0xfa   : > { %549 = vmatpush.bf16.msra.mxu1 %v462_v50  ;;  %4278 = vmatpush.bf16.msra.mxu3 %v462_v50  ;;  %v1475_v12 = vpack.c.b16 %v1451_v34, %v1448_v44  ;;  %v1436_v44 = vunpack.c.h.b16 %v1296_v21  ;;  %v1439_v34 = vunpack.c.h.b16 %v1298_v32  ;;  %v1435_v29 = vunpack.c.l.b16 %v1296_v21 }
  0xfb   : > { %1069 = vrot.lane.b32.xlu1 %v1033_v49, %s4466_s29  ;;  %v846_v49 = vsel %vm4748_vm13, %v5021_v16, 0  ;;  %v1024_v6 = vpack.c.b16 %v982_v48, %v979_v1  ;;  %v1438_v17 = vunpack.c.l.b16 %v1298_v32  ;;  %v4204_v1 = vld [vmem:[%s6923_s1 + $0x70] sm:$0xff]  ;;  %vm1093_vm6 = vcmask 1031168  }
  0xfc   : > { %1055 = vrot.lane.b32.xlu0 %v1026_v54, %s4466_s29  ;;  %v977_v33 = vunpack.c.h.b16 %v846_v49  ;;  %v1023_v54 = vpack.c.b16 %v978_v59, %v975_v58  ;;  %v1474_v58 = vpack.c.b16 %v1450_v61, %v1447_v27  ;;  %v1300_v59 = vsel %vm5047_vm4, %v4779_v51, 0 }
  0xfd   : > { %1053 = vrot.lane.b32.xlu2 %v1025_v7, %s4466_s29  ;;  %570 = vmatmul.bf16.vlgmr.msra.gmra.mxu3 %v4202_v31  ;;  %v1302_v31 = vsel %vm5047_vm4, %v4782_v53, 0  ;;  %v1469_v61 = vpack.c.b16 %v1439_v34, %v1436_v44 }
  0xfe   : > { %v1022_v7 = vpack.c.b16 %v977_v33, %v974_v23  ;;  %v1442_v23 = vunpack.c.h.b16 %v1300_v59  ;;  %v1445_v33 = vunpack.c.h.b16 %v1302_v31  ;;  %v1444_v50 = vunpack.c.l.b16 %v1302_v31 }
  0xff   : > { %v1468_v31 = vpack.c.b16 %v1438_v17, %v1435_v29  ;;  %v4198_v29 = vld [vmem:[%s6923_s1 + $0x40] sm:$0xff] }
 0x100   : > { %v1472_v38 = vpack.c.b16 %v1445_v33, %v1442_v23  ;;  %v1292_v23 = vsel %vm5047_vm4, %v4869_v28, 0  ;;  %v1294_v33 = vsel %vm5047_vm4, %v4872_v62, 0  ;;  %550 = vmatmul.bf16.vlgmr.msra.gmra.mxu1 %v4198_v29  ;;  %501 = vmatmul.bf16.vlgmr.msra.gmra.mxu0 %v4198_v29 }
 0x101   : > { %v1429_v21 = vunpack.c.l.b16 %v1292_v23  ;;  %v1432_v32 = vunpack.c.l.b16 %v1294_v33 }
 0x103   : > { %1063 = vrot.lane.b32.xlu1 %v1030_v2, %s4466_s29  ;;  %v4203_v2 = vld [vmem:[%s6923_s1 + $0x68] sm:$0xff] }
 0x104   : > { %1049 = vrot.lane.b32.xlu0 %v1023_v54, %s4466_s29  ;;  %526 = vmatmul.bf16.gmra.mxu2 %v4203_v2  ;;  %v973_v54 = vunpack.c.l.b16 %v5036_v24 }
 0x105   : > { %1047 = vrot.lane.b32.xlu2 %v1022_v7, %s4466_s29  ;;  %v976_v7 = vunpack.c.l.b16 %v846_v49 }
 0x107   : > { %v1021_v27 = vpack.c.b16 %v976_v7, %v973_v54  ;;  %v5140_v7 = vsel %vm4663_vm5, %v4782_v53, 0  ;;  %v5152_v53 = vsel %vm4663_vm5, %v4818_v39, 0  ;;  %v5167_v39 = vsel %vm4663_vm5, %v4869_v28, 0 }
 0x108   : > { %v681_v34 = vunpack.c.l.b16 %v5140_v7  ;;  %v1293_v28 = vsel %vm4846_vm0, %v4860_v4, 0  ;;  %v5198_v4 = vsel %vm4663_vm5, %v4909_v52, 0 }
 0x10b   : > { %1057 = vrot.lane.b32.xlu1 %v1027_v10, %s4466_s29  ;;  %v1441_v10 = vunpack.c.l.b16 %v1300_v59  ;;  %v1303_v59 = vsel %vm4846_vm0, %v4774_v46, 0  ;;  %v1299_v46 = vsel %vm4846_vm0, %v4815_v37, 0  ;;  %v5124_v37 = vsel %vm4663_vm5, %v4740_v30, 0 }
 0x10c   : > { %1521 = vrot.lane.b32.xlu0 %v1475_v12, %s4467_s30  ;;  %v1446_v49 = vunpack.c.l.b16 %v1303_v59  ;;  %v5135_v30 = vsel %vm4663_vm5, %v4779_v51, 0  ;;  %v1465_v51 = vpack.c.b16 %v1432_v32, %v1429_v21  ;;  %v675_v59 = vunpack.c.l.b16 %v5152_v53 }
 0x10d   : > { %1519 = vrot.lane.b32.xlu2 %v1474_v58, %s4467_s30  ;;  %v1471_v12 = vpack.c.b16 %v1444_v50, %v1441_v10  ;;  %575 = vmatmul.bf16.gmra.mxu3 %v4203_v2  ;;  %v1301_v58 = vsel %vm4846_vm0, %v4771_v45, 0  ;;  %v1297_v45 = vsel %vm4846_vm0, %v4812_v36, 0  ;;  %v5119_v36 = vsel %vm4663_vm5, %v4737_v55, 0 }
 0x10e   : > { %v1443_v24 = vunpack.c.l.b16 %v1301_v58  ;;  %v1437_v10 = vunpack.c.l.b16 %v1297_v45  ;;  %v1440_v50 = vunpack.c.l.b16 %v1299_v46  ;;  %v683_v2 = vunpack.c.l.b16 %v5119_v36  ;;  %v4205_v46 = vld [vmem:[%s6923_s1 + $0x78] sm:$0xff] }
 0x10f   : > { %v679_v44 = vunpack.c.l.b16 %v5135_v30  ;;  %v5157_v58 = vsel %vm4663_vm5, %v4821_v41, 0  ;;  %v5172_v41 = vsel %vm4663_vm5, %v4872_v62, 0  ;;  %v1295_v62 = vsel %vm4846_vm0, %v4863_v18, 0 }
 0x110   : > { %v1473_v48 = vpack.c.b16 %v1446_v49, %v1443_v24  ;;  %v1470_v17 = vpack.c.b16 %v1440_v50, %v1437_v10  ;;  %v673_v45 = vunpack.c.l.b16 %v5172_v41  ;;  %v5203_v18 = vsel %vm4663_vm5, %v4912_v47, 0 }
 0x111   : > { %v684_v50 = vunpack.c.h.b16 %v5119_v36  ;;  %v680_v29 = vunpack.c.h.b16 %v5135_v30 }
 0x113   : > { %1051 = vrot.lane.b32.xlu1 %v1024_v6, %s4466_s29  ;;  %v685_v6 = vunpack.c.l.b16 %v5124_v37 }
 0x114   : > { %1515 = vrot.lane.b32.xlu0 %v1472_v38, %s4467_s30  ;;  %531 = vmatmul.bf16.gmra.mxu2 %v4204_v1  ;;  %v1430_v38 = vunpack.c.h.b16 %v1292_v23 }
 0x115   : > { %1513 = vrot.lane.b32.xlu2 %v1471_v12, %s4467_s30  ;;  %v1433_v12 = vunpack.c.h.b16 %v1294_v33  ;;  %v701_v54 = vpack.c.b16 %v685_v6, %v683_v2  ;;  %v1290_v33 = vsel %vm5047_vm4, %v4912_v47, 0  ;;  %v686_v2 = vunpack.c.h.b16 %v5124_v37 }
 0x116   : > { %v1431_v6 = vunpack.c.l.b16 %v1293_v28  ;;  %v1427_v21 = vunpack.c.h.b16 %v1290_v33  ;;  %v5216_v37 = vsel %vm4663_vm5, %v4944_v43, 0 }
 0x117   : > { %719 = vmatpush.bf16.msrb.mxu2 %v701_v54  ;;  %v1426_v54 = vunpack.c.l.b16 %v1290_v33  ;;  %v702_v47 = vpack.c.b16 %v686_v2, %v684_v50 }
 0x119   : > { %768 = vmatpush.bf16.msrb.mxu3 %v702_v47  ;;  %v670_v47 = vunpack.c.h.b16 %v5203_v18 }
 0x11b   : > { %1045 = vrot.lane.b32.xlu1 %v1021_v27, %s4466_s29  ;;  %v1466_v27 = vpack.c.b16 %v1433_v12, %v1430_v38  ;;  %v1434_v38 = vunpack.c.l.b16 %v1295_v62  ;;  %v667_v12 = vunpack.c.l.b16 %v5198_v4  ;;  %s4469_s29 = smov 32  }
 0x11c   : > { %1509 = vrot.lane.b32.xlu0 %v1469_v61, %s4467_s30  ;;  %v699_v61 = vpack.c.b16 %v681_v34, %v679_v44  ;;  %v5221_v34 = vsel %vm4663_vm5, %v4947_v63, 0 }
 0x11d   : > { %1507 = vrot.lane.b32.xlu2 %v1468_v31, %s4467_s30  ;;  %580 = vmatmul.bf16.gmra.mxu3 %v4204_v1  ;;  %v677_v31 = vunpack.c.l.b16 %v5157_v58  ;;  %v1288_v1 = vsel %vm5047_vm4, %v4909_v52, 0  ;;  %v669_v52 = vunpack.c.l.b16 %v5203_v18  ;;  %v666_v18 = vunpack.c.h.b16 %v5221_v34 }
 0x11e   : > { %720 = vmatpush.bf16.msrb.mxu2 %v699_v61  ;;  %v1424_v10 = vunpack.c.h.b16 %v1288_v1  ;;  %v1423_v32 = vunpack.c.l.b16 %v1288_v1  ;;  %v682_v61 = vunpack.c.h.b16 %v5140_v7  ;;  %v5235_v7 = vsel %vm4663_vm5, %v4979_v57, 0 }
 0x11f   : > { %v697_v49 = vpack.c.b16 %v677_v31, %v675_v59  ;;  %v693_v36 = vpack.c.b16 %v669_v52, %v667_v12  ;;  %v1467_v59 = vpack.c.b16 %v1434_v38, %v1431_v6  ;;  %v659_v28 = vunpack.c.l.b16 %v5235_v7 }
 0x120   : > { %v1463_v31 = vpack.c.b16 %v1427_v21, %v1424_v10  ;;  %v700_v1 = vpack.c.b16 %v682_v61, %v680_v29  ;;  %v1462_v30 = vpack.c.b16 %v1426_v54, %v1423_v32  ;;  %v672_v12 = vunpack.c.h.b16 %v5167_v39 }
 0x121   : > { %v674_v52 = vunpack.c.h.b16 %v5172_v41  ;;  %v1289_v21 = vsel %vm4846_vm0, %v4903_v22, 0  ;;  %v1291_v32 = vsel %vm4846_vm0, %v4906_v15, 0  ;;  %v1286_v41 = vsel %vm5047_vm4, %v4947_v63, 0  ;;  %v5278_v15 = vld [vmem:[%s6923_s1] sm:$0xff] }
 0x122   : > { %721 = vmatpush.bf16.msrb.mxu2 %v697_v49  ;;  %769 = vmatpush.bf16.msrb.mxu3 %v700_v1  ;;  %v668_v22 = vunpack.c.h.b16 %v5198_v4  ;;  %v664_v4 = vunpack.c.h.b16 %v5216_v37 }
 0x123   : > { %1517 = vrot.lane.b32.xlu1 %v1473_v48, %s4467_s30  ;;  %v671_v48 = vunpack.c.l.b16 %v5167_v39  ;;  %v696_v0 = vpack.c.b16 %v674_v52, %v672_v12  ;;  %v1284_v39 = vsel %vm5047_vm4, %v4944_v43, 0  ;;  %v1425_v43 = vunpack.c.l.b16 %v1289_v21  ;;  %v7004_v12 = vld [vmem:[#allocation12_spill] sm:$0xff] }
 0x124   : > { %1797 = vrot.lane.b32.xlu0 %v4567_v13, %s4468_s14  ;;  %536 = vmatmul.bf16.gmra.mxu2 %v4205_v46  ;;  %v1418_v29 = vunpack.c.h.b16 %v1284_v39  ;;  %v694_v61 = vpack.c.b16 %v670_v47, %v668_v22  ;;  %v1280_v52 = vsel %vm5047_vm4, %v4979_v57, 0 }
 0x125   : > { %1795 = vrot.lane.b32.xlu2 %v4553_v5, %s4468_s14  ;;  %v695_v23 = vpack.c.b16 %v673_v45, %v671_v48  ;;  %v5240_v48 = vsel %vm4663_vm5, %v4982_v26, 0  ;;  %v676_v45 = vunpack.c.h.b16 %v5152_v53  ;;  %v195_v53 = vsel %vm4663_vm5, %v5018_v56, 0 }
 0x126   : > { %v661_v62 = vunpack.c.l.b16 %v5240_v48  ;;  %v655_v6 = vunpack.c.l.b16 %v195_v53  ;;  %v1411_v47 = vunpack.c.l.b16 %v1280_v52 }
 0x127   : > { %v5130_v55 = vpop.permute.xlu2 %1089  ;;  %722 = vmatpush.bf16.msrb.mxu2 %v695_v23 }
 0x128   : > { %v689_v2 = vpack.c.b16 %v661_v62, %v659_v28 }
 0x12b   : > { %1511 = vrot.lane.b32.xlu1 %v1470_v17, %s4467_s30  ;;  %v663_v17 = vunpack.c.l.b16 %v5216_v37  ;;  %723 = vmatpush.bf16.msrb.mxu2 %v693_v36  ;;  %v1428_v36 = vunpack.c.l.b16 %v1291_v32 }
 0x12c   : > { %1503 = vrot.lane.b32.xlu0 %v1466_v27, %s4467_s30  ;;  %v665_v27 = vunpack.c.l.b16 %v5221_v34 }
 0x12d   : > { %1501 = vrot.lane.b32.xlu2 %v1465_v51, %s4467_s30  ;;  %585 = vmatmul.bf16.gmra.mxu3 %v4205_v46  ;;  %v4199_v51 = vld [vmem:[%s6923_s1 + $0x48] sm:$0xff]  ;;  %v678_v46 = vunpack.c.h.b16 %v5157_v58  ;;  %v196_v58 = vsel %vm4663_vm5, %v5021_v16, 0  ;;  %v1464_v1 = vpack.c.b16 %v1428_v36, %v1425_v43  ;;  %v4201_v36 = vld [vmem:[%s6923_s1 + $0x58] sm:$0xff]  ;;  %vm1525_vm5 = vcmask 916480  }
 0x12e   : > { %v691_v49 = vpack.c.b16 %v665_v27, %v663_v17  ;;  %555 = vmatmul.bf16.gmra.mxu1 %v4199_v51  ;;  %506 = vmatmul.bf16.gmra.mxu0 %v4199_v51  ;;  %v657_v38 = vunpack.c.l.b16 %v196_v58  ;;  %v1421_v17 = vunpack.c.h.b16 %v1286_v41  ;;  %v1417_v27 = vunpack.c.l.b16 %v1284_v39 }
 0x12f   : > { %v5162_v24 = vpop.permute.xlu2 %1083  ;;  %v698_v33 = vpack.c.b16 %v678_v46, %v676_v45  ;;  %v660_v45 = vunpack.c.h.b16 %v5235_v7  ;;  %v662_v46 = vunpack.c.h.b16 %v5240_v48  ;;  %v656_v48 = vunpack.c.h.b16 %v195_v53 }
 0x130   : > { %724 = vmatpush.bf16.msrb.mxu2 %v691_v49  ;;  %v687_v54 = vpack.c.b16 %v657_v38, %v655_v6  ;;  %v4200_v49 = vld [vmem:[%s6923_s1 + $0x50] sm:$0xff]  ;;  %v1460_v28 = vpack.c.b16 %v1421_v17, %v1418_v29  ;;  %v1285_v6 = vsel %vm4846_vm0, %v4938_v42, 0  ;;  %v1287_v38 = vsel %vm4846_vm0, %v4941_v9, 0  ;;  %v4183_v42 = vld [vmem:[%s6923_s1 + $0x8] sm:$0xff] }
 0x131   : > { %770 = vmatpush.bf16.msrb.mxu3 %v698_v33  ;;  %v690_v62 = vpack.c.b16 %v662_v46, %v660_v45  ;;  %v1282_v53 = vsel %vm5047_vm4, %v4982_v26, 0  ;;  %v7006_v9 = vld [vmem:[#allocation7_spill] sm:$0xff]  ;;  %v1419_v32 = vunpack.c.l.b16 %v1285_v6  ;;  %v1412_v39 = vunpack.c.h.b16 %v1280_v52  ;;  %v7010_v45 = vld [vmem:[#allocation8_spill] sm:$0xff] }
 0x132   : > { %v1415_v26 = vunpack.c.h.b16 %v1282_v53  ;;  %v1414_v43 = vunpack.c.l.b16 %v1282_v53  ;;  %v4184_v46 = vld [vmem:[%s6923_s1 + $0x10] sm:$0xff] }
 0x133   : > { %1799 = vrot.lane.b32.xlu1 %v4550_v3, %s4468_s14 }
 0x134   : > { %1791 = vrot.lane.b32.xlu0 %v4569_v14, %s4468_s14  ;;  %725 = vmatpush.bf16.msrb.mxu2 %v689_v2  ;;  %v1456_v29 = vpack.c.b16 %v1414_v43, %v1411_v47 }
 0x135   : > { %1789 = vrot.lane.b32.xlu2 %v4564_v11, %s4468_s14  ;;  %771 = vmatpush.bf16.msrb.mxu3 %v696_v0 }
 0x137   : > { %v5211_v44 = vpop.permute.xlu2 %1077 }
 0x138   : > { %726 = vmatpush.bf16.msrb.mxu2 %v687_v54  ;;  %v1422_v54 = vunpack.c.l.b16 %v1287_v38 }
 0x139   : > { %772 = vmatpush.bf16.msrb.mxu3 %v694_v61 }
 0x13b   : > { %1505 = vrot.lane.b32.xlu1 %v1467_v59, %s4467_s30  ;;  %727 = vmatmul.bf16.vlgmr.msrb.gmra.mxu2 %v5278_v15 }
 0x13c   : > { %1497 = vrot.lane.b32.xlu0 %v1463_v31, %s4467_s30  ;;  %v1420_v31 = vunpack.c.l.b16 %v1286_v41 }
 0x13d   : > { %1495 = vrot.lane.b32.xlu2 %v1462_v30, %s4467_s30  ;;  %v692_v30 = vpack.c.b16 %v666_v18, %v664_v4  ;;  %v7008_v18 = vld [vmem:[#allocation27_spill] sm:$0xff] }
 0x13e   : > { %v1092_v23 = vpop.permute.xlu0 %1091  ;;  %560 = vmatmul.bf16.gmra.mxu1 %v4200_v49  ;;  %511 = vmatmul.bf16.gmra.mxu0 %v4200_v49  ;;  %v1459_v37 = vpack.c.b16 %v1420_v31, %v1417_v27  ;;  %v7007_v31 = vld [vmem:[#allocation26_spill] sm:$0xff]  ;;  %v1283_v49 = vsel %vm4846_vm0, %v7008_v18, 0 }
 0x13f   : > { %v5247_v10 = vpop.permute.xlu2 %1071  ;;  %v1109_v50 = vsel %vm1093_vm6, %v5130_v55, %v1092_v23  ;;  %773 = vmatpush.bf16.msrb.mxu3 %v692_v30  ;;  %v1281_v4 = vsel %vm4846_vm0, %v7007_v31, 0  ;;  %v1278_v30 = vsel %vm5047_vm4, %v5021_v16, 0 }
 0x140   : > { %1175 = vmatpush.bf16.msrb.mxu1 %v1109_v50  ;;  %v658_v50 = vunpack.c.h.b16 %v196_v58  ;;  %v7005_v58 = vld [vmem:[#allocation6_spill] sm:$0xff]  ;;  %v1409_v35 = vunpack.c.h.b16 %v1278_v30  ;;  %v1408_v6 = vunpack.c.l.b16 %v1278_v30  ;;  %v7019_v30 = vld [vmem:[#allocation16_spill] sm:$0xff] }
 0x142   : > { %v688_v2 = vpack.c.b16 %v658_v50, %v656_v48 }
 0x143   : > { %1793 = vrot.lane.b32.xlu1 %v4617_v40, %s4468_s14  ;;  %774 = vmatpush.bf16.msrb.mxu3 %v690_v62  ;;  %v1413_v62 = vunpack.c.l.b16 %v1281_v4 }
 0x144   : > { %1785 = vrot.lane.b32.xlu0 %v4581_v19, %s4468_s14 }
 0x145   : > { %1783 = vrot.lane.b32.xlu2 %v4583_v20, %s4468_s14 }
 0x146   : > { %v1086_v63 = vpop.permute.xlu0 %1085 }
 0x147   : > { %v5284_v51 = vpop.permute.xlu2 %1065  ;;  %v1107_v59 = vsel %vm1093_vm6, %v5162_v24, %v1086_v63  ;;  %775 = vmatpush.bf16.msrb.mxu3 %v688_v2  ;;  %v1461_v63 = vpack.c.b16 %v1422_v54, %v1419_v32 }
 0x148   : > { %1176 = vmatpush.bf16.msrb.mxu1 %v1107_v59 }
 0x14a   : > { %776 = vmatmul.bf16.vlgmr.msrb.gmra.mxu3 %v5278_v15 }
 0x14b   : > { %1499 = vrot.lane.b32.xlu1 %v1464_v1, %s4467_s30  ;;  %732 = vmatmul.bf16.gmra.mxu2 %v4183_v42  ;;  %v7009_v1 = vld [vmem:[#allocation15_spill] sm:$0xff] }
 0x14c   : > { %1491 = vrot.lane.b32.xlu0 %v1460_v28, %s4467_s30  ;;  %v7011_v28 = vld [vmem:[#allocation9_spill] sm:$0xff] }
 0x14d   : > { %1489 = vrot.lane.b32.xlu2 %v1459_v37, %s4467_s30  ;;  %v5299_v34 = vpop.permute.xlu1 %1523 }
 0x14e   : > { %v1080_v23 = vpop.permute.xlu0 %1079  ;;  %565 = vmatmul.bf16.gmra.mxu1 %v4201_v36  ;;  %516 = vmatmul.bf16.gmra.mxu0 %v4201_v36 }
 0x14f   : > { %v5301_v33 = vpop.permute.xlu2 %1059  ;;  %v1105_v7 = vsel %vm1093_vm6, %v5211_v44, %v1080_v23  ;;  %v1416_v23 = vunpack.c.l.b16 %v1283_v49  ;;  %v7017_v49 = vld [vmem:[#allocation19_spill] sm:$0xff] }
 0x150   : > { %1177 = vmatpush.bf16.msrb.mxu1 %v1105_v7 }
 0x151   : > { %v1458_v38 = vpack.c.b16 %v1416_v23, %v1413_v62 }
 0x153   : > { %1787 = vrot.lane.b32.xlu1 %v7004_v12, %s4468_s14 }
 0x154   : > { %1779 = vrot.lane.b32.xlu0 %v7005_v58, %s4468_s14 }
 0x155   : > { %1777 = vrot.lane.b32.xlu2 %v7006_v9, %s4468_s14  ;;  %v1088_v21 = vpop.permute.xlu1 %1087 }
 0x156   : > { %v1074_v0 = vpop.permute.xlu0 %1073  ;;  %v1108_v57 = vsel %vm1093_vm6, %v1088_v21, %v5130_v55  ;;  %v1457_v55 = vpack.c.b16 %v1415_v26, %v1412_v39  ;;  %v7012_v39 = vld [vmem:[#allocation17_spill] sm:$0xff]  ;;  %v7013_v26 = vld [vmem:[#allocation10_spill] sm:$0xff] }
 0x157   : > { %v5328_v41 = vpop.permute.xlu2 %1053  ;;  %1126 = vmatpush.bf16.msrb.mxu0 %v1108_v57  ;;  %v1103_v22 = vsel %vm1093_vm6, %v5247_v10, %v1074_v0  ;;  %v1279_v57 = vsel %vm4846_vm0, %v5013_v25, 0 }
 0x158   : > { %1178 = vmatpush.bf16.msrb.mxu1 %v1103_v22  ;;  %v7014_v22 = vld [vmem:[#allocation11_spill] sm:$0xff] }
 0x15a   : > { %781 = vmatmul.bf16.gmra.mxu3 %v4183_v42  ;;  %v1277_v42 = vsel %vm4846_vm0, %v5010_v60, 0  ;;  %v1410_v60 = vunpack.c.l.b16 %v1279_v57  ;;  %v4208_v57 = vld [vmem:[%s6923_s1 + $0x90] sm:$0xff] }
 0x15b   : > { %1493 = vrot.lane.b32.xlu1 %v1461_v63, %s4467_s30  ;;  %737 = vmatmul.bf16.gmra.mxu2 %v4184_v46  ;;  %v1407_v43 = vunpack.c.l.b16 %v1277_v42 }
 0x15c   : > { %1485 = vrot.lane.b32.xlu0 %v1457_v55, %s4467_s30  ;;  %v4206_v55 = vld [vmem:[%s6923_s1 + $0x80] sm:$0xff] }
 0x15d   : > { %1483 = vrot.lane.b32.xlu2 %v1456_v29, %s4467_s30  ;;  %v1082_v17 = vpop.permute.xlu1 %1081  ;;  %v1455_v29 = vpack.c.b16 %v1410_v60, %v1407_v43 }
 0x15e   : > { %v1068_v27 = vpop.permute.xlu0 %1067  ;;  %v1106_v61 = vsel %vm1093_vm6, %v1082_v17, %v5162_v24  ;;  %v1276_v24 = vsel %vm5047_vm4, %v5018_v56, 0  ;;  %v7015_v17 = vld [vmem:[#allocation20_spill] sm:$0xff] }
 0x15f   : > { %v5341_v59 = vpop.permute.xlu2 %1047  ;;  %1127 = vmatpush.bf16.msrb.mxu0 %v1106_v61  ;;  %v1101_v15 = vsel %vm1093_vm6, %v5284_v51, %v1068_v27  ;;  %v1406_v48 = vunpack.c.h.b16 %v1276_v24  ;;  %v1405_v2 = vunpack.c.l.b16 %v1276_v24  ;;  %v7018_v24 = vld [vmem:[#allocation21_spill] sm:$0xff] }
 0x160   : > { %1179 = vmatpush.bf16.msrb.mxu1 %v1101_v15  ;;  %v5420_v62 = vpop.f32.mrf.mxu2 }
 0x161   : > { %v1454_v52 = vpack.c.b16 %v1409_v35, %v1406_v48  ;;  %v1453_v53 = vpack.c.b16 %v1408_v6, %v1405_v2  ;;  %v7020_v48 = vld [vmem:[#allocation22_spill] sm:$0xff] }
 0x162   : > { %v7021_v35 = vld [vmem:[#allocation18_spill] sm:$0xff] }
 0x163   : > { %1781 = vrot.lane.b32.xlu1 %v7009_v1, %s4468_s14 }
 0x164   : > { %1773 = vrot.lane.b32.xlu0 %v7010_v45, %s4468_s14  ;;  %v5661_v45 = vld [vmem:[%s4545_s25 + $0x80] sm:$0xf] }
 0x165   : > { %1771 = vrot.lane.b32.xlu2 %v7011_v28, %s4468_s14  ;;  %v1076_v37 = vpop.permute.xlu1 %1075 }
 0x166   : > { %v1062_v7 = vpop.permute.xlu0 %1061  ;;  %v1104_v56 = vsel %vm1093_vm6, %v1076_v37, %v5211_v44 }
 0x167   : > { %v1520_v16 = vpop.permute.xlu2 %1519  ;;  %1128 = vmatpush.bf16.msrb.mxu0 %v1104_v56  ;;  %v1099_v50 = vsel %vm1093_vm6, %v5301_v33, %v1062_v7  ;;  %v4207_v56 = vld [vmem:[%s6923_s1 + $0x88] sm:$0xff] }
 0x168   : > { %1180 = vmatpush.bf16.msrb.mxu1 %v1099_v50  ;;  %v5432_v6 = vpop.f32.mrf.mxu2 }
 0x169   : > { %7023 = vst [vmem:[#allocation26_spill] sm:$0xff] %v5432_v6  ;;  %v5598_v6 = vld [vmem:[%s4545_s25 + $0xa8] sm:$0xff] }
 0x16a   : > { %786 = vmatmul.bf16.gmra.mxu3 %v4184_v46 }
 0x16b   : > { %1487 = vrot.lane.b32.xlu1 %v1458_v38, %s4467_s30 }
 0x16c   : > { %1479 = vrot.lane.b32.xlu0 %v1454_v52, %s4467_s30 }
 0x16d   : > { %1477 = vrot.lane.b32.xlu2 %v1453_v53, %s4467_s30  ;;  %v1070_v44 = vpop.permute.xlu1 %1069  ;;  %v7024_v53 = vld [vmem:[#allocation23_spill] sm:$0xff] }
 0x16e   : > { %v1056_v21 = vpop.permute.xlu0 %1055  ;;  %v1102_v32 = vsel %vm1093_vm6, %v1070_v44, %v5247_v10  ;;  %v4185_v10 = vld [vmem:[%s6923_s1 + $0x18] sm:$0xff] }
 0x16f   : > { %v1514_v54 = vpop.permute.xlu2 %1513  ;;  %1129 = vmatpush.bf16.msrb.mxu0 %v1102_v32  ;;  %v1097_v0 = vsel %vm1093_vm6, %v5328_v41, %v1056_v21  ;;  %742 = vmatmul.bf16.gmra.mxu2 %v4185_v10  ;;  %v4187_v21 = vld [vmem:[%s6923_s1 + $0x28] sm:$0xff] }
 0x170   : > { %1181 = vmatpush.bf16.msrb.mxu1 %v1097_v0 }
 0x173   : > { %1775 = vrot.lane.b32.xlu1 %v7012_v39, %s4468_s14 }
 0x174   : > { %1767 = vrot.lane.b32.xlu0 %v7013_v26, %s4468_s14 }
 0x175   : > { %1765 = vrot.lane.b32.xlu2 %v7014_v22, %s4468_s14  ;;  %v1064_v47 = vpop.permute.xlu1 %1063 }
 0x176   : > { %v1050_v36 = vpop.permute.xlu0 %1049  ;;  %v1100_v25 = vsel %vm1093_vm6, %v1064_v47, %v5284_v51  ;;  %v7016_v51 = vld [vmem:[#allocation13_spill] sm:$0xff] }
 0x177   : > { %v1508_v8 = vpop.permute.xlu2 %1507  ;;  %1130 = vmatpush.bf16.msrb.mxu0 %v1100_v25  ;;  %v1095_v63 = vsel %vm1093_vm6, %v5341_v59, %v1050_v36 }
 0x178   : > { %1182 = vmatpush.bf16.msrb.mxu1 %v1095_v63 }
 0x17a   : > { %791 = vmatmul.bf16.gmra.mxu3 %v4185_v10 }
 0x17b   : > { %1481 = vrot.lane.b32.xlu1 %v1455_v29, %s4467_s30  ;;  %1183 = vmatmul.bf16.vlgmr.msrb.gmra.mxu1 %v4206_v55  ;;  %v4188_v29 = vld [vmem:[%s6923_s1 + $0x30] sm:$0xff] }
 0x17c   : > { %1761 = vrot.lane.b32.xlu0 %v7015_v17, %s4468_s14  ;;  %v5613_v17 = vld [vmem:[%s4545_s25 + $0x98] sm:$0xf] }
 0x17d   : > { %1759 = vrot.lane.b32.xlu2 %v7016_v51, %s4468_s14  ;;  %v1058_v27 = vpop.permute.xlu1 %1057 }
 0x17e   : > { %v1522_v61 = vpop.permute.xlu0 %1521  ;;  %v1098_v15 = vsel %vm1093_vm6, %v1058_v27, %v5301_v33  ;;  %v4186_v33 = vld [vmem:[%s6923_s1 + $0x20] sm:$0xff] }
 0x17f   : > { %v1540_v31 = vsel %vm1525_vm5, %v1520_v16, %v1522_v61  ;;  %v1541_v4 = vsel %vm1525_vm5, %v1522_v61, %v5299_v34  ;;  %v1796_v18 = vpop.permute.xlu2 %1795  ;;  %1131 = vmatpush.bf16.msrb.mxu0 %v1098_v15  ;;  %747 = vmatmul.bf16.gmra.mxu2 %v4186_v33 }
 0x180   : > { %1558 = vmatpush.bf16.msra.mxu2 %v1540_v31  ;;  %1607 = vmatpush.bf16.msra.mxu3 %v1541_v4  ;;  %v5447_v10 = vpop.f32.mrf.mxu3 }
 0x183   : > { %1769 = vrot.lane.b32.xlu1 %v7017_v49, %s4468_s14 }
 0x184   : > { %1755 = vrot.lane.b32.xlu0 %v7018_v24, %s4468_s14 }
 0x185   : > { %1753 = vrot.lane.b32.xlu2 %v7019_v30, %s4468_s14  ;;  %v1052_v46 = vpop.permute.xlu1 %1051 }
 0x186   : > { %v1516_v37 = vpop.permute.xlu0 %1515  ;;  %v1096_v34 = vsel %vm1093_vm6, %v1052_v46, %v5328_v41  ;;  %v7022_v41 = vld [vmem:[#allocation14_spill] sm:$0xff] }
 0x187   : > { %v1502_v23 = vpop.permute.xlu2 %1501  ;;  %1132 = vmatpush.bf16.msrb.mxu0 %v1096_v34  ;;  %v1538_v7 = vsel %vm1525_vm5, %v1514_v54, %v1516_v37  ;;  %v5441_v54 = vpop.f32.mrf.mxu2 }
 0x188   : > { %1559 = vmatpush.bf16.msra.mxu2 %v1538_v7  ;;  %v5453_v63 = vpop.f32.mrf.mxu3 }
 0x189   : > { %7026 = vst [vmem:[#allocation18_spill] sm:$0xff] %v5453_v63 }
 0x18a   : > { %796 = vmatmul.bf16.gmra.mxu3 %v4186_v33  ;;  %v5467_v33 = vpop.f32.mrf.mxu1 }
 0x18b   : > { %1763 = vrot.lane.b32.xlu1 %v7020_v48, %s4468_s14  ;;  %1188 = vmatmul.bf16.gmra.mxu1 %v4207_v56  ;;  %v5619_v48 = vld [vmem:[%s4545_s25 + $0xa4] sm:$0xf] }
 0x18c   : > { %2395 = vrot.lane.b32.xlu0 %v7021_v35, %s4469_s29  ;;  %s4475_s29 = smov 94  }
 0x18d   : > { %1964 = vrot.lane.b32.xlu2 %v7022_v41, %s4470_s3  ;;  %v1046_v16 = vpop.permute.xlu1 %1045 }
 0x18e   : > { %v1510_v50 = vpop.permute.xlu0 %1509  ;;  %v1094_v2 = vsel %vm1093_vm6, %v1046_v16, %v5341_v59 }
 0x18f   : > { %v1790_v38 = vpop.permute.xlu2 %1789  ;;  %1133 = vmatpush.bf16.msrb.mxu0 %v1094_v2  ;;  %v1536_v52 = vsel %vm1525_vm5, %v1508_v8, %v1510_v50  ;;  %752 = vmatmul.bf16.gmra.mxu2 %v4187_v21  ;;  %v5450_v36 = vpop.f32.mrf.mxu2 }
 0x190   : > { %1560 = vmatpush.bf16.msra.mxu2 %v1536_v52  ;;  %7025 = vst [vmem:[#allocation27_spill] sm:$0xff] %v5450_v36  ;;  %v5465_v46 = vpop.f32.mrf.mxu3 }
 0x192   : > { %1134 = vmatmul.bf16.vlgmr.msrb.gmra.mxu0 %v4206_v55 }
 0x193   : > { %1757 = vrot.lane.b32.xlu1 %v7024_v53, %s4468_s14  ;;  %s3577_s14 = scalar_lea.hbm %s6924_s2, %s4262_s7 }
 0x194   : > { %s3580_s16 = sshll.u32 %s3577_s14, 4  ;;  %s3581_s16 = int_to_ptr.hbm [resolvable:$true] %s3580_s16 }
 0x195   : > { %v1518_v44 = vpop.permute.xlu1 %1517  ;;  %s4412_s21 = sshra.s32 %s3581_s16, 4  ;;  %s4413_s21 = int_to_ptr.hbm [resolvable:$true] %s4412_s21 }
 0x196   : > { %v1798_v32 = vpop.permute.xlu0 %1797  ;;  %v1539_v59 = vsel %vm1525_vm5, %v1516_v37, %v1518_v44  ;;  %s4414_s22 = scalar_lea.hbm %s4413_s21, 256  ;;  %p4419_p0 = scmp.lt.s32.totalorder %s4413_s21, %s6924_s2 }
 0x197   : > { %v1816_v0 = vsel %vm1801_vm7, %v1796_v18, %v1798_v32  ;;  %v1496_v42 = vpop.permute.xlu2 %1495  ;;  %1608 = vmatpush.bf16.msra.mxu3 %v1539_v59  ;;  %v5459_v15 = vpop.f32.mrf.mxu2  ;;  %v4209_v18 = vld [vmem:[%s6923_s1 + $0x98] sm:$0xff]  ;;  %p4415_p11 = scmp.ne.s32.totalorder %s4413_s21, %s4414_s22  ;;  %p4420_p1 = scmp.lt.s32.totalorder %s4418_s26, %s4414_s22 }
 0x198   : > { %1834 = vmatpush.bf16.msra.mxu0 %v1816_v0  ;;  %v5473_v16 = vpop.f32.mrf.mxu3  ;;  %v4210_v0 = vld [vmem:[%s6923_s1 + $0xa0] sm:$0xff] }
 0x199   : > { %7028 = vst [vmem:[#allocation28_spill] sm:$0xff] %v5473_v16  ;;  %p4416_p12 = pnand %p4415_p11, %p4530_p5  ;;  %p4421_p2 = por %p4420_p1, %p4419_p0 }
 0x19a   : > { %801 = vmatmul.bf16.gmra.mxu3 %v4187_v21 }
 0x19b   : > { %1193 = vmatmul.bf16.gmra.mxu1 %v4208_v57  ;;  %p4417_p13 = pneg %p4416_p12 }
 0x19d   : > { %v1512_v47 = vpop.permute.xlu1 %1511  ;;  %p4422_p3 = pnand %p4421_p2, %p4417_p13 }
 0x19e   : > { %v1504_v43 = vpop.permute.xlu0 %1503  ;;  %v1537_v60 = vsel %vm1525_vm5, %v1510_v50, %v1512_v47  ;;  %v5475_v50 = vpop.f32.mrf.mxu1 }
 0x19f   : > { %v1784_v25 = vpop.permute.xlu2 %1783  ;;  %v1534_v8 = vsel %vm1525_vm5, %v1502_v23, %v1504_v43  ;;  %1609 = vmatpush.bf16.msra.mxu3 %v1537_v60  ;;  %757 = vmatmul.bf16.gmra.mxu2 %v4188_v29  ;;  %v5470_v7 = vpop.f32.mrf.mxu2  ;;  %7029 = vst [vmem:[#allocation29_spill] sm:$0xff] %v5475_v50 }
 0x1a0   : > { %1561 = vmatpush.bf16.msra.mxu2 %v1534_v8  ;;  %7027 = vst [vmem:[#allocation14_spill] sm:$0xff] %v5470_v7  ;;  %v502_v8 = vpop.f32.mrf.mxu0 }
 0x1a2   : > { %1139 = vmatmul.bf16.gmra.mxu0 %v4207_v56 }
 0x1a5   : > { %v1800_v55 = vpop.permute.xlu1 %1799 }
 0x1a6   : > { %v1792_v27 = vpop.permute.xlu0 %1791  ;;  %v1817_v61 = vsel %vm1801_vm7, %v1798_v32, %v1800_v55 }
 0x1a7   : > { %v1490_v31 = vpop.permute.xlu2 %1489  ;;  %v1814_v4 = vsel %vm1801_vm7, %v1790_v38, %v1792_v27  ;;  %1883 = vmatpush.bf16.msra.mxu1 %v1817_v61  ;;  %v4189_v38 = vld [vmem:[%s6923_s1 + $0x38] sm:$0xff]  ;;  %v5481_v21 = vpop.f32.mrf.mxu2 }
 0x1a8   : > { %1835 = vmatpush.bf16.msra.mxu0 %v1814_v4 }
 0x1aa   : > { %806 = vmatmul.bf16.gmra.mxu3 %v4188_v29 }
 0x1ab   : > { %1198 = vmatmul.bf16.gmra.mxu1 %v4209_v18 }
 0x1ad   : > { %v1506_v37 = vpop.permute.xlu1 %1505 }
 0x1ae   : > { %v1498_v34 = vpop.permute.xlu0 %1497  ;;  %v1535_v23 = vsel %vm1525_vm5, %v1504_v43, %v1506_v37 }
 0x1af   : > { %v1778_v56 = vpop.permute.xlu2 %1777  ;;  %v1532_v35 = vsel %vm1525_vm5, %v1496_v42, %v1498_v34  ;;  %1610 = vmatpush.bf16.msra.mxu3 %v1535_v23  ;;  %v5487_v42 = vpop.f32.mrf.mxu3  ;;  %762 = vmatmul.bf16.gmra.mxu2 %v4189_v38 }
 0x1b0   : > { %1562 = vmatpush.bf16.msra.mxu2 %v1532_v35  ;;  %v5495_v61 = vpop.f32.mrf.mxu2 }
 0x1b1   : > { %7031 = vst [vmem:[#allocation31_spill] sm:$0xff] %v5495_v61 }
 0x1b2   : > { %1144 = vmatmul.bf16.gmra.mxu0 %v4208_v57  ;;  %v5489_v57 = vpop.f32.mrf.mxu1 }
 0x1b5   : > { %v1794_v2 = vpop.permute.xlu1 %1793 }
 0x1b6   : > { %v1786_v52 = vpop.permute.xlu0 %1785  ;;  %v1815_v44 = vsel %vm1801_vm7, %v1792_v27, %v1794_v2 }
 0x1b7   : > { %v1484_v32 = vpop.permute.xlu2 %1483  ;;  %v1812_v59 = vsel %vm1801_vm7, %v1784_v25, %v1786_v52  ;;  %1884 = vmatpush.bf16.msra.mxu1 %v1815_v44  ;;  %v5493_v27 = vpop.f32.mrf.mxu3 }
 0x1b8   : > { %1836 = vmatpush.bf16.msra.mxu0 %v1812_v59  ;;  %7030 = vst [vmem:[#allocation30_spill] sm:$0xff] %v5493_v27  ;;  %v5506_v44 = vpop.f32.mrf.mxu0 }
 0x1b9   : > { %7033 = vst [vmem:[#allocation33_spill] sm:$0xff] %v5506_v44 }
 0x1ba   : > { %v5497_v29 = vpop.f32.mrf.mxu1  ;;  %811 = vmatmul.bf16.gmra.mxu3 %v4189_v38 }
 0x1bb   : > { %1203 = vmatmul.bf16.gmra.mxu1 %v4210_v0  ;;  %7032 = vst [vmem:[#allocation32_spill] sm:$0xff] %v5497_v29 }
 0x1bd   : > { %v1500_v47 = vpop.permute.xlu1 %1499 }
 0x1be   : > { %v1492_v43 = vpop.permute.xlu0 %1491  ;;  %v1533_v60 = vsel %vm1525_vm5, %v1498_v34, %v1500_v47 }
 0x1bf   : > { %v1772_v55 = vpop.permute.xlu2 %1771  ;;  %v1530_v25 = vsel %vm1525_vm5, %v1490_v31, %v1492_v43  ;;  %1611 = vmatpush.bf16.msra.mxu3 %v1533_v60  ;;  %v4211_v31 = vld [vmem:[%s6923_s1 + $0xa8] sm:$0xff]  ;;  %v5504_v2 = vpop.f32.mrf.mxu3 }
 0x1c0   : > { %1563 = vmatpush.bf16.msra.mxu2 %v1530_v25 }
 0x1c2   : > { %1149 = vmatmul.bf16.gmra.mxu0 %v4209_v18  ;;  %v728_v18 = vpop.f32.mrf.mxu2 }
 0x1c3   : > { %v5508_v59 = vadd.f32 %v728_v18, %v502_v8 }
 0x1c5   : > { %v1788_v4 = vpop.permute.xlu1 %1787 }
 0x1c6   : > { %v1780_v37 = vpop.permute.xlu0 %1779  ;;  %v1813_v23 = vsel %vm1801_vm7, %v1786_v52, %v1788_v4  ;;  %v5512_v4 = vpop.f32.mrf.mxu1 }
 0x1c7   : > { %v1478_v35 = vpop.permute.xlu2 %1477  ;;  %v1810_v34 = vsel %vm1801_vm7, %v1778_v56, %v1780_v37  ;;  %1885 = vmatpush.bf16.msra.mxu1 %v1813_v23  ;;  %v5514_v23 = vpop.f32.mrf.mxu3 }
 0x1c8   : > { %1837 = vmatpush.bf16.msra.mxu0 %v1810_v34  ;;  %7034 = vst [vmem:[#allocation34_spill] sm:$0xff] %v5514_v23  ;;  %v507_v34 = vpop.f32.mrf.mxu0 }
 0x1ca   : > { %v5516_v38 = vpop.f32.mrf.mxu2 }
 0x1cb   : > { %1208 = vmatmul.bf16.gmra.mxu1 %v4211_v31  ;;  %7035 = vst [vmem:[#allocation35_spill] sm:$0xff] %v5516_v38 }
 0x1cd   : > { %v1494_v47 = vpop.permute.xlu1 %1493 }
 0x1ce   : > { %v1486_v52 = vpop.permute.xlu0 %1485  ;;  %v1531_v60 = vsel %vm1525_vm5, %v1492_v43, %v1494_v47 }
 0x1cf   : > { %v1766_v56 = vpop.permute.xlu2 %1765  ;;  %v1528_v25 = vsel %vm1525_vm5, %v1484_v32, %v1486_v52  ;;  %1612 = vmatpush.bf16.msra.mxu3 %v1531_v60  ;;  %v5523_v32 = vld [vmem:[%s6923_s1 + $0xb0] sm:$0xff] }
 0x1d0   : > { %1564 = vmatpush.bf16.msra.mxu2 %v1528_v25  ;;  %v777_v25 = vpop.f32.mrf.mxu3 }
 0x1d2   : > { %1154 = vmatmul.bf16.gmra.mxu0 %v4210_v0  ;;  %v5525_v0 = vpop.f32.mrf.mxu1  ;;  %v733_v47 = vpop.f32.mrf.mxu2 }
 0x1d3   : > { %7036 = vst [vmem:[#allocation36_spill] sm:$0xff] %v5525_v0  ;;  %v5528_v60 = vadd.f32 %v733_v47, %v507_v34  ;;  %v4214_v34 = vld [vmem:[%s6923_s1 + $0xc0] sm:$0xff] }
 0x1d5   : > { %v1782_v61 = vpop.permute.xlu1 %1781 }
 0x1d6   : > { %v1774_v8 = vpop.permute.xlu0 %1773  ;;  %v1811_v18 = vsel %vm1801_vm7, %v1780_v37, %v1782_v61  ;;  %v5530_v61 = vpop.f32.mrf.mxu0 }
 0x1d7   : > { %v1760_v29 = vpop.permute.xlu2 %1759  ;;  %v1808_v43 = vsel %vm1801_vm7, %v1772_v55, %v1774_v8  ;;  %1886 = vmatpush.bf16.msra.mxu1 %v1811_v18  ;;  %7037 = vst [vmem:[#allocation37_spill] sm:$0xff] %v5530_v61  ;;  %v5533_v55 = vadd.f32 %v777_v25, %v5467_v33 }
 0x1d8   : > { %1838 = vmatpush.bf16.msra.mxu0 %v1808_v43 }
 0x1da   : > { %v5542_v47 = vpop.f32.mrf.mxu1  ;;  %v5544_v33 = vpop.f32.mrf.mxu2 }
 0x1db   : > { %1213 = vmatmul.bf16.gmra.mxu1 %v5523_v32  ;;  %7038 = vst [vmem:[#allocation38_spill] sm:$0xff] %v5544_v33 }
 0x1dd   : > { %v1488_v23 = vpop.permute.xlu1 %1487 }
 0x1de   : > { %v1480_v37 = vpop.permute.xlu0 %1479  ;;  %v1529_v18 = vsel %vm1525_vm5, %v1486_v52, %v1488_v23  ;;  %v5549_v23 = vpop.f32.mrf.mxu3 }
 0x1df   : > { %v5536_v50 = vpop.permute.xlu2 %1753  ;;  %v1526_v43 = vsel %vm1525_vm5, %v1478_v35, %v1480_v37  ;;  %1613 = vmatpush.bf16.msra.mxu3 %v1529_v18  ;;  %7039 = vst [vmem:[#allocation39_spill] sm:$0xff] %v5549_v23 }
 0x1e0   : > { %1565 = vmatpush.bf16.msra.mxu2 %v1526_v43  ;;  %v5553_v43 = vpop.f32.mrf.mxu0 }
 0x1e2   : > { %1159 = vmatmul.bf16.gmra.mxu0 %v4211_v31  ;;  %v5558_v31 = vld [vmem:[%s6923_s1 + $0xb8] sm:$0xff]  ;;  %v5563_v44 = vpop.f32.mrf.mxu1 }
 0x1e3   : > { %1566 = vmatmul.bf16.vlgmr.msra.gmra.mxu2 %v4214_v34  ;;  %7042 = vst [vmem:[#allocation40_spill] sm:$0xff] %v5563_v44  ;;  %v5579_v44 = vld [vmem:[%s4545_s25 + $0xb0] sm:$0xf] }
 0x1e5   : > { %v1776_v0 = vpop.permute.xlu1 %1775 }
 0x1e6   : > { %v5546_v25 = vpop.permute.xlu0 %1767  ;;  %v1809_v52 = vsel %vm1801_vm7, %v1774_v8, %v1776_v0  ;;  %v782_v27 = vpop.f32.mrf.mxu3 }
 0x1e7   : > { %v1965_v35 = vpop.permute.xlu2 %1964  ;;  %v1806_v18 = vsel %vm1801_vm7, %v1766_v56, %v5546_v25  ;;  %1887 = vmatpush.bf16.msra.mxu1 %v1809_v52  ;;  %v7040_v56 = vld [vmem:[#allocation24_spill] sm:$0xff]  ;;  %v7041_v52 = vld [vmem:[#allocation25_spill] sm:$0xff] }
 0x1e8   : > { %v1966_v33 = vrot.slane %v1965_v35, 4  ;;  %1839 = vmatpush.bf16.msra.mxu0 %v1806_v18  ;;  %v738_v18 = vpop.f32.mrf.mxu2  ;;  %v5609_v51 = vpop.f32.mrf.mxu0 }
 0x1e9   : > { %7047 = vst [vmem:[#allocation41_spill] sm:$0xff] %v5609_v51 }
 0x1ea   : > { %v1968_v61 = vsel %vm1967_vm8, %v1966_v33, %v1965_v35  ;;  %v1976_v38 = vunpack.c.l.b16 %v1966_v33  ;;  %v1977_v8 = vunpack.c.h.b16 %v1966_v33  ;;  %vm3105_vm8 = vcmask 277504  }
 0x1eb   : > { %v1969_v0 = vunpack.c.l.b16 %v1968_v61  ;;  %v1970_v23 = vunpack.c.h.b16 %v1968_v61  ;;  %1218 = vmatmul.bf16.gmra.mxu1 %v5558_v31 }
 0x1ec   : > { %vm1980_vm9 = vcmp.ne.s32.totalorder %v1976_v38, %v7040_v56  ;;  %vm1981_vm10 = vcmp.ne.s32.totalorder %v1977_v8, %v7041_v52 }
 0x1ed   : > { %vm1973_vm11 = vcmp.ne.s32.totalorder %v1969_v0, %v7040_v56  ;;  %vm1974_vm12 = vcmp.ne.s32.totalorder %v1970_v23, %v7041_v52  ;;  %vm5567_vm13 = vmpackc.low %vm1981_vm10, %vm1980_vm9  ;;  %v1482_v33 = vpop.permute.xlu1 %1481  ;;  %v5585_v0 = vld [vmem:[%s4545_s25 + $0xbc] sm:$0xf] }
 0x1ee   : > { %vm5571_vm14 = vmpackc.low %vm1974_vm12, %vm1973_vm11  ;;  %v5575_v38 = vpop.permute.xlu0 %1761  ;;  %v1527_v8 = vsel %vm1525_vm5, %v1480_v37, %v1482_v33  ;;  %v2012_v23 = vsel %vm5567_vm13, %v5579_v44, 0  ;;  %v2014_v7 = vsel %vm5567_vm13, %v5585_v0, 0  ;;  %v5595_v33 = vld [vmem:[%s6923_s1 + $0xc8] sm:$0xff]  ;;  %v5646_v49 = vpop.f32.mrf.mxu3  ;;  %vm2232_vm5 = vcmask 900096  }
 0x1ef   : > { %1614 = vmatpush.bf16.msra.mxu3 %v1527_v8  ;;  %v1804_v36 = vsel %vm1801_vm7, %v1760_v29, %v5575_v38  ;;  %v2156_v16 = vunpack.c.l.b16 %v2012_v23  ;;  %v2159_v37 = vunpack.c.l.b16 %v2014_v7  ;;  %v2011_v63 = vsel %vm5571_vm14, %v5598_v6, 0  ;;  %v5604_v8 = vld [vmem:[%s4545_s25 + $0xb4] sm:$0xff]  ;;  %7049 = vst [vmem:[#allocation43_spill] sm:$0xff] %v5646_v49 }
 0x1f0   : > { %1840 = vmatpush.bf16.msra.mxu0 %v1804_v36  ;;  %v2013_v29 = vsel %vm5571_vm14, %v5604_v8, 0  ;;  %v2155_v7 = vunpack.c.h.b16 %v2011_v63  ;;  %v2154_v23 = vunpack.c.l.b16 %v2011_v63  ;;  %v2008_v36 = vsel %vm5567_vm13, %v5613_v17, 0 }
 0x1f1   : > { %v2183_v30 = vpack.c.b16 %v2159_v37, %v2156_v16  ;;  %v2158_v24 = vunpack.c.h.b16 %v2013_v29  ;;  %v2157_v53 = vunpack.c.l.b16 %v2013_v29  ;;  %v2010_v63 = vsel %vm5567_vm13, %v5619_v48, 0  ;;  %v5633_v29 = vld [vmem:[%s4545_s25 + $0x9c] sm:$0xff] }
 0x1f2   : > { %1164 = vmatmul.bf16.gmra.mxu0 %v5523_v32  ;;  %1615 = vmatmul.bf16.vlgmr.msra.gmra.mxu3 %v4214_v34  ;;  %v5627_v34 = vld [vmem:[%s4545_s25 + $0x90] sm:$0xff]  ;;  %v2009_v51 = vsel %vm5571_vm14, %v5633_v29, 0  ;;  %v2150_v22 = vunpack.c.l.b16 %v2008_v36 }
 0x1f3   : > { %2230 = vrot.lane.b32.xlu0 %v2183_v30, %s4471_s8  ;;  %1571 = vmatmul.bf16.gmra.mxu2 %v5595_v33  ;;  %v2182_v16 = vpack.c.b16 %v2158_v24, %v2155_v7  ;;  %v2181_v32 = vpack.c.b16 %v2157_v53, %v2154_v23  ;;  %v2007_v37 = vsel %vm5571_vm14, %v5627_v34, 0  ;;  %v2153_v24 = vunpack.c.l.b16 %v2010_v63  ;;  %v5640_v53 = vpop.f32.mrf.mxu2 }
 0x1f4   : > { %7048 = vst [vmem:[#allocation42_spill] sm:$0xff] %v5640_v53  ;;  %v2149_v26 = vunpack.c.h.b16 %v2007_v37  ;;  %v2148_v36 = vunpack.c.l.b16 %v2007_v37  ;;  %v2151_v63 = vunpack.c.l.b16 %v2009_v51  ;;  %v5652_v53 = vadd.f32 %v738_v18, %v5553_v43  ;;  %v5674_v18 = vld [vmem:[%s4545_s25 + $0x78] sm:$0xff]  ;;  %v5680_v37 = vld [vmem:[%s4545_s25 + $0x84] sm:$0xff] }
 0x1f5   : > { %2228 = vrot.lane.b32.xlu2 %v2182_v16, %s4471_s8  ;;  %2226 = vrot.lane.b32.xlu1 %v2181_v32, %s4471_s8  ;;  %v1770_v30 = vpop.permute.xlu1 %1769  ;;  %v2152_v32 = vunpack.c.h.b16 %v2009_v51  ;;  %v2180_v28 = vpack.c.b16 %v2153_v24, %v2150_v22  ;;  %v5667_v51 = vld [vmem:[%s4545_s25 + $0x8c] sm:$0xf]  ;;  %v517_v22 = vpop.f32.mrf.mxu0  ;;  %v2005_v24 = vsel %vm5571_vm14, %v5680_v37, 0 }
 0x1f6   : > { %v5642_v7 = vpop.permute.xlu0 %1755  ;;  %v1807_v23 = vsel %vm1801_vm7, %v5546_v25, %v1770_v30  ;;  %v5655_v25 = vadd.f32 %v782_v27, %v5489_v57  ;;  %v2006_v43 = vsel %vm5567_vm13, %v5667_v51, 0  ;;  %v2178_v27 = vpack.c.b16 %v2151_v63, %v2148_v36  ;;  %v787_v9 = vpop.f32.mrf.mxu3 }
 0x1f7   : > { %v1802_v16 = vsel %vm1801_vm7, %v5536_v50, %v5642_v7  ;;  %1888 = vmatpush.bf16.msra.mxu1 %v1807_v23  ;;  %v2004_v50 = vsel %vm5567_vm13, %v5661_v45, 0  ;;  %v2179_v57 = vpack.c.b16 %v2152_v32, %v2149_v26  ;;  %v2147_v23 = vunpack.c.l.b16 %v2006_v43 }
 0x1f8   : > { %1841 = vmatpush.bf16.msra.mxu0 %v1802_v16  ;;  %v1184_v30 = vpop.f32.mrf.mxu1  ;;  %v2144_v26 = vunpack.c.l.b16 %v2004_v50  ;;  %v2145_v50 = vunpack.c.l.b16 %v2005_v24  ;;  %v5697_v43 = vadd.f32 %v787_v9, %v5512_v4 }
 0x1f9   : > { %v5658_v49 = vadd.f32 %v1184_v30, %v5533_v55  ;;  %v2003_v55 = vsel %vm5571_vm14, %v5674_v18, 0  ;;  %v2146_v30 = vunpack.c.h.b16 %v2005_v24 }
 0x1fa   : > { %v2143_v63 = vunpack.c.h.b16 %v2003_v55 }
 0x1fb   : > { %2224 = vrot.lane.b32.xlu0 %v2180_v28, %s4471_s8  ;;  %v743_v16 = vpop.f32.mrf.mxu2 }
 0x1fc   : > { %v5689_v39 = vadd.f32 %v743_v16, %v517_v22  ;;  %v2177_v16 = vpack.c.b16 %v2147_v23, %v2144_v26  ;;  %v4222_v23 = vld [vmem:[%s6923_s1 + $0x100] sm:$0xff] }
 0x1fd   : > { %2222 = vrot.lane.b32.xlu2 %v2179_v57, %s4471_s8  ;;  %2220 = vrot.lane.b32.xlu1 %v2178_v27, %s4471_s8  ;;  %v1764_v28 = vpop.permute.xlu1 %1763  ;;  %v5694_v57 = vld [vmem:[%s6923_s1 + $0xd0] sm:$0xff]  ;;  %v2142_v27 = vunpack.c.l.b16 %v2003_v55 }
 0x1fe   : > { %v2396_v32 = vpop.permute.xlu0 %2395  ;;  %v1805_v36 = vsel %vm1801_vm7, %v5575_v38, %v1764_v28 }
 0x1ff   : > { %v2397_v58 = vrot.slane %v2396_v32, 4  ;;  %1889 = vmatpush.bf16.msra.mxu1 %v1805_v36  ;;  %v2176_v36 = vpack.c.b16 %v2146_v30, %v2143_v63  ;;  %v2175_v9 = vpack.c.b16 %v2145_v50, %v2142_v27 }
 0x200   : > { %v5699_v1 = vpop.f32.mrf.mxu1 }
 0x201   : > { %7050 = vst [vmem:[#allocation44_spill] sm:$0xff] %v5699_v1  ;;  %v2399_v38 = vsel %vm2398_vm15, %v2397_v58, %v2396_v32  ;;  %v2407_v28 = vunpack.c.l.b16 %v2397_v58  ;;  %v2408_v22 = vunpack.c.h.b16 %v2397_v58  ;;  %vm2939_vm15 = vcmask 777216  }
 0x202   : > { %v2400_v12 = vunpack.c.l.b16 %v2399_v38  ;;  %v2401_v20 = vunpack.c.h.b16 %v2399_v38  ;;  %1169 = vmatmul.bf16.gmra.mxu0 %v5558_v31  ;;  %1620 = vmatmul.bf16.gmra.mxu3 %v5595_v33  ;;  %v5720_v33 = vpop.f32.mrf.mxu0 }
 0x203   : > { %vm2411_vm0 = vcmp.ne.s32.totalorder %v2407_v28, %v7040_v56  ;;  %vm2412_vm1 = vcmp.ne.s32.totalorder %v2408_v22, %v7041_v52  ;;  %2218 = vrot.lane.b32.xlu0 %v2177_v16, %s4471_s8  ;;  %1576 = vmatmul.bf16.gmra.mxu2 %v5694_v57  ;;  %v5745_v16 = vld [vmem:[%s4545_s25 + $0x68] sm:$0xf] }
 0x204   : > { %vm2404_vm2 = vcmp.ne.s32.totalorder %v2400_v12, %v7040_v56  ;;  %vm2405_vm3 = vcmp.ne.s32.totalorder %v2401_v20, %v7041_v52  ;;  %vm5710_vm4 = vmpackc.low %vm2412_vm1, %vm2411_vm0  ;;  %vm3370_vm0 = vcmask 769024  }
 0x205   : > { %vm5714_vm6 = vmpackc.low %vm2405_vm3, %vm2404_vm2  ;;  %2216 = vrot.lane.b32.xlu2 %v2176_v36, %s4471_s8  ;;  %2214 = vrot.lane.b32.xlu1 %v2175_v9, %s4471_s8  ;;  %v1758_v31 = vpop.permute.xlu1 %1757  ;;  %v2443_v12 = vsel %vm5710_vm4, %v5579_v44, 0  ;;  %v2445_v20 = vsel %vm5710_vm4, %v5585_v0, 0  ;;  %v5736_v44 = vpop.f32.mrf.mxu3  ;;  %v5751_v36 = vld [vmem:[%s4545_s25 + $0x74] sm:$0xf] }
 0x206   : > { %v1803_v55 = vsel %vm1801_vm7, %v5642_v7, %v1758_v31  ;;  %v2587_v24 = vunpack.c.l.b16 %v2443_v12  ;;  %v2590_v26 = vunpack.c.l.b16 %v2445_v20  ;;  %v2442_v32 = vsel %vm5714_vm6, %v5598_v6, 0  ;;  %7055 = vst [vmem:[#allocation45_spill] sm:$0xff] %v5736_v44  ;;  %v5764_v12 = vld [vmem:[%s4545_s25 + $0x6c] sm:$0xff] }
 0x207   : > { %1890 = vmatpush.bf16.msra.mxu1 %v1803_v55  ;;  %v2444_v0 = vsel %vm5714_vm6, %v5604_v8, 0  ;;  %v2586_v7 = vunpack.c.h.b16 %v2442_v32  ;;  %v2585_v63 = vunpack.c.l.b16 %v2442_v32  ;;  %v2000_v8 = vsel %vm5567_vm13, %v5745_v16, 0  ;;  %v5769_v55 = vpop.f32.mrf.mxu2 }
 0x208   : > { %v2614_v30 = vpack.c.b16 %v2590_v26, %v2587_v24  ;;  %v2589_v27 = vunpack.c.h.b16 %v2444_v0  ;;  %v2588_v50 = vunpack.c.l.b16 %v2444_v0  ;;  %v1189_v38 = vpop.f32.mrf.mxu1  ;;  %v2002_v9 = vsel %vm5567_vm13, %v5751_v36, 0 }
 0x209   : > { %v5742_v28 = vadd.f32 %v1189_v38, %v5655_v25  ;;  %v5758_v25 = vld [vmem:[%s4545_s25 + $0x60] sm:$0xff]  ;;  %v2001_v20 = vsel %vm5571_vm14, %v5764_v12, 0  ;;  %v2138_v24 = vunpack.c.l.b16 %v2000_v8  ;;  %v2141_v26 = vunpack.c.l.b16 %v2002_v9 }
 0x20a   : > { %1891 = vmatmul.bf16.vlgmr.msra.gmra.mxu1 %v4222_v23  ;;  %v2613_v6 = vpack.c.b16 %v2589_v27, %v2586_v7  ;;  %v2612_v22 = vpack.c.b16 %v2588_v50, %v2585_v63  ;;  %v1999_v31 = vsel %vm5571_vm14, %v5758_v25, 0  ;;  %v4217_v63 = vld [vmem:[%s6923_s1 + $0xd8] sm:$0xff]  ;;  %v2139_v50 = vunpack.c.l.b16 %v2001_v20 }
 0x20b   : > { %2661 = vrot.lane.b32.xlu0 %v2614_v30, %s4472_s23  ;;  %v2137_v32 = vunpack.c.h.b16 %v1999_v31  ;;  %v2140_v30 = vunpack.c.h.b16 %v2001_v20  ;;  %v2136_v27 = vunpack.c.l.b16 %v1999_v31  ;;  %v2439_v8 = vsel %vm5710_vm4, %v5613_v17, 0 }
 0x20c   : > { %v2441_v9 = vsel %vm5710_vm4, %v5619_v48, 0  ;;  %v2438_v31 = vsel %vm5714_vm6, %v5627_v34, 0  ;;  %v2581_v17 = vunpack.c.l.b16 %v2439_v8  ;;  %vm2663_vm7 = vcmask 785408  }
 0x20d   : > { %2659 = vrot.lane.b32.xlu2 %v2613_v6, %s4472_s23  ;;  %2657 = vrot.lane.b32.xlu1 %v2612_v22, %s4472_s23  ;;  %v792_v0 = vpop.f32.mrf.mxu3  ;;  %v2174_v22 = vpack.c.b16 %v2141_v26, %v2138_v24  ;;  %v2584_v48 = vunpack.c.l.b16 %v2441_v9  ;;  %v2580_v34 = vunpack.c.h.b16 %v2438_v31 }
 0x20e   : > { %v5777_v38 = vadd.f32 %v792_v0, %v5542_v47  ;;  %v2173_v47 = vpack.c.b16 %v2140_v30, %v2137_v32 }
 0x20f   : > { %v1135_v7 = vpop.f32.mrf.mxu0  ;;  %v5803_v20 = vpop.f32.mrf.mxu2 }
 0x210   : > { %v5780_v44 = vadd.f32 %v1135_v7, %v5508_v59  ;;  %v5782_v6 = vpop.f32.mrf.mxu1  ;;  %v2172_v59 = vpack.c.b16 %v2139_v50, %v2136_v27  ;;  %v2611_v7 = vpack.c.b16 %v2584_v48, %v2581_v17  ;;  %v5811_v27 = vld [vmem:[%s4545_s25 + $0x50] sm:$0xf] }
 0x211   : > { %7056 = vst [vmem:[#allocation46_spill] sm:$0xff] %v5782_v6  ;;  %v1996_v50 = vsel %vm5567_vm13, %v5811_v27, 0 }
 0x212   : > { %1625 = vmatmul.bf16.gmra.mxu3 %v5694_v57  ;;  %1842 = vmatmul.bf16.vlgmr.msra.gmra.mxu0 %v4222_v23  ;;  %v2440_v57 = vsel %vm5714_vm6, %v5633_v29, 0  ;;  %v4223_v23 = vld [vmem:[%s6923_s1 + $0x108] sm:$0xff]  ;;  %v2579_v29 = vunpack.c.l.b16 %v2438_v31  ;;  %v2132_v48 = vunpack.c.l.b16 %v1996_v50  ;;  %v2435_v50 = vsel %vm5710_vm4, %v5661_v45, 0 }
 0x213   : > { %2212 = vrot.lane.b32.xlu0 %v2174_v22, %s4471_s8  ;;  %1581 = vmatmul.bf16.gmra.mxu2 %v4217_v63  ;;  %v2583_v26 = vunpack.c.h.b16 %v2440_v57  ;;  %v2582_v32 = vunpack.c.l.b16 %v2440_v57  ;;  %v5817_v22 = vld [vmem:[%s4545_s25 + $0x5c] sm:$0xf]  ;;  %v5832_v57 = vld [vmem:[%s4545_s25 + $0x54] sm:$0xff]  ;;  %v2575_v45 = vunpack.c.l.b16 %v2435_v50  ;;  %v5879_v50 = vld [vmem:[%s4545_s25 + $0x44] sm:$0xf] }
 0x214   : > { %v1998_v8 = vsel %vm5567_vm13, %v5817_v22, 0  ;;  %v1997_v17 = vsel %vm5571_vm14, %v5832_v57, 0 }
 0x215   : > { %2210 = vrot.lane.b32.xlu2 %v2173_v47, %s4471_s8  ;;  %2208 = vrot.lane.b32.xlu1 %v2172_v59, %s4471_s8  ;;  %v5822_v9 = vpop.f32.mrf.mxu3  ;;  %v2610_v47 = vpack.c.b16 %v2583_v26, %v2580_v34  ;;  %v5826_v59 = vld [vmem:[%s4545_s25 + $0x48] sm:$0xff]  ;;  %v4218_v26 = vld [vmem:[%s6923_s1 + $0xe0] sm:$0xff] }
 0x216   : > { %7058 = vst [vmem:[#allocation48_spill] sm:$0xff] %v5822_v9  ;;  %v1995_v31 = vsel %vm5571_vm14, %v5826_v59, 0  ;;  %v2133_v9 = vunpack.c.l.b16 %v1997_v17 }
 0x217   : > { %v5805_v24 = vpop.f32.mrf.mxu0 }
 0x218   : > { %7057 = vst [vmem:[#allocation47_spill] sm:$0xff] %v5805_v24  ;;  %v1194_v0 = vpop.f32.mrf.mxu1  ;;  %v5845_v24 = vpop.f32.mrf.mxu2 }
 0x219   : > { %v5808_v30 = vadd.f32 %v1194_v0, %v5697_v43  ;;  %v2609_v43 = vpack.c.b16 %v2582_v32, %v2579_v29  ;;  %v2135_v0 = vunpack.c.l.b16 %v1998_v8  ;;  %v2131_v29 = vunpack.c.h.b16 %v1995_v31  ;;  %7059 = vst [vmem:[#allocation49_spill] sm:$0xff] %v5845_v24 }
 0x21a   : > { %1896 = vmatmul.bf16.gmra.mxu1 %v4223_v23  ;;  %v2134_v32 = vunpack.c.h.b16 %v1997_v17  ;;  %v2437_v8 = vsel %vm5710_vm4, %v5667_v51, 0 }
 0x21b   : > { %2655 = vrot.lane.b32.xlu0 %v2611_v7, %s4472_s23  ;;  %v2130_v7 = vunpack.c.l.b16 %v1995_v31  ;;  %v2434_v31 = vsel %vm5714_vm6, %v5674_v18, 0  ;;  %v2578_v51 = vunpack.c.l.b16 %v2437_v8  ;;  %v1994_v8 = vsel %vm5567_vm13, %v5879_v50, 0 }
 0x21c   : > { %v2574_v18 = vunpack.c.h.b16 %v2434_v31 }
 0x21d   : > { %2653 = vrot.lane.b32.xlu2 %v2610_v47, %s4472_s23  ;;  %2651 = vrot.lane.b32.xlu1 %v2609_v43, %s4472_s23  ;;  %v2171_v47 = vpack.c.b16 %v2135_v0, %v2132_v48  ;;  %v2169_v43 = vpack.c.b16 %v2133_v9, %v2130_v7  ;;  %v4224_v9 = vld [vmem:[%s6923_s1 + $0x110] sm:$0xff]  ;;  %v2573_v0 = vunpack.c.l.b16 %v2434_v31  ;;  %v5873_v7 = vld [vmem:[%s4545_s25 + $0x38] sm:$0xf] }
 0x21e   : > { %v5888_v31 = vld [vmem:[%s4545_s25 + $0x30] sm:$0xff] }
 0x21f   : > { %v1140_v34 = vpop.f32.mrf.mxu0 }
 0x220   : > { %v5843_v6 = vadd.f32 %v1140_v34, %v5528_v60  ;;  %v5847_v1 = vpop.f32.mrf.mxu1  ;;  %v2170_v60 = vpack.c.b16 %v2134_v32, %v2131_v29  ;;  %v2608_v29 = vpack.c.b16 %v2578_v51, %v2575_v45  ;;  %v5894_v45 = vld [vmem:[%s4545_s25 + $0x3c] sm:$0xff] }
 0x221   : > { %7060 = vst [vmem:[#allocation50_spill] sm:$0xff] %v5847_v1  ;;  %v1993_v51 = vsel %vm5571_vm14, %v5894_v45, 0 }
 0x222   : > { %1630 = vmatmul.bf16.gmra.mxu3 %v4217_v63  ;;  %1847 = vmatmul.bf16.gmra.mxu0 %v4223_v23  ;;  %v2436_v63 = vsel %vm5714_vm6, %v5680_v37, 0  ;;  %v797_v23 = vpop.f32.mrf.mxu3  ;;  %v2128_v1 = vunpack.c.h.b16 %v1993_v51  ;;  %v2127_v24 = vunpack.c.l.b16 %v1993_v51 }
 0x223   : > { %2206 = vrot.lane.b32.xlu0 %v2171_v47, %s4471_s8  ;;  %1586 = vmatmul.bf16.gmra.mxu2 %v4218_v26  ;;  %v2577_v48 = vunpack.c.h.b16 %v2436_v63  ;;  %v2576_v37 = vunpack.c.l.b16 %v2436_v63  ;;  %v1992_v47 = vsel %vm5567_vm13, %v5873_v7, 0  ;;  %v1991_v63 = vsel %vm5571_vm14, %v5888_v31, 0 }
 0x225   : > { %2204 = vrot.lane.b32.xlu2 %v2170_v60, %s4471_s8  ;;  %2202 = vrot.lane.b32.xlu1 %v2169_v43, %s4471_s8  ;;  %v5884_v60 = vpop.f32.mrf.mxu2  ;;  %v2607_v43 = vpack.c.b16 %v2577_v48, %v2574_v18 }
 0x227   : > { %v5867_v17 = vpop.f32.mrf.mxu0 }
 0x228   : > { %7061 = vst [vmem:[#allocation51_spill] sm:$0xff] %v5867_v17  ;;  %v1199_v34 = vpop.f32.mrf.mxu1  ;;  %v2124_v17 = vunpack.c.l.b16 %v1991_v63 }
 0x229   : > { %v5870_v32 = vadd.f32 %v1199_v34, %v5777_v38  ;;  %v2606_v38 = vpack.c.b16 %v2576_v37, %v2573_v0  ;;  %v2126_v34 = vunpack.c.l.b16 %v1992_v47  ;;  %v4219_v0 = vld [vmem:[%s6923_s1 + $0xe8] sm:$0xff]  ;;  %v2125_v37 = vunpack.c.h.b16 %v1991_v63 }
 0x22a   : > { %1901 = vmatmul.bf16.gmra.mxu1 %v4224_v9  ;;  %v5901_v18 = vpop.f32.mrf.mxu3  ;;  %v2431_v47 = vsel %vm5710_vm4, %v5745_v16, 0  ;;  %v2166_v63 = vpack.c.b16 %v2127_v24, %v2124_v17  ;;  %v798_v16 = vadd.f32 %v797_v23, %v5447_v10  ;;  %v5937_v10 = vld [vmem:[%s4545_s25 + $0x20] sm:$0xf] }
 0x22b   : > { %2649 = vrot.lane.b32.xlu0 %v2608_v29, %s4472_s23  ;;  %v2129_v29 = vunpack.c.l.b16 %v1994_v8  ;;  %7062 = vst [vmem:[#allocation52_spill] sm:$0xff] %v5901_v18  ;;  %v2433_v8 = vsel %vm5710_vm4, %v5751_v36, 0  ;;  %v1988_v23 = vsel %vm5567_vm13, %v5937_v10, 0 }
 0x22c   : > { %v2572_v36 = vunpack.c.l.b16 %v2433_v8 }
 0x22d   : > { %2647 = vrot.lane.b32.xlu2 %v2607_v43, %s4472_s23  ;;  %2645 = vrot.lane.b32.xlu1 %v2606_v38, %s4472_s23  ;;  %v2168_v43 = vpack.c.b16 %v2129_v29, %v2126_v34  ;;  %v2167_v38 = vpack.c.b16 %v2128_v1, %v2125_v37  ;;  %v2569_v1 = vunpack.c.l.b16 %v2431_v47  ;;  %v5943_v47 = vld [vmem:[%s4545_s25 + $0x2c] sm:$0xf] }
 0x22e   : > { %v1990_v8 = vsel %vm5567_vm13, %v5943_v47, 0 }
 0x22f   : > { %v1145_v48 = vpop.f32.mrf.mxu0  ;;  %v2605_v37 = vpack.c.b16 %v2572_v36, %v2569_v1  ;;  %v2120_v36 = vunpack.c.l.b16 %v1988_v23  ;;  %v2427_v23 = vsel %vm5710_vm4, %v5811_v27, 0  ;;  %v2428_v27 = vsel %vm5714_vm6, %v5832_v57, 0 }
 0x230   : > { %v5907_v52 = vadd.f32 %v1145_v48, %v5652_v53  ;;  %v5909_v56 = vpop.f32.mrf.mxu1  ;;  %v2430_v53 = vsel %vm5714_vm6, %v5758_v25, 0  ;;  %v4225_v25 = vld [vmem:[%s6923_s1 + $0x118] sm:$0xff]  ;;  %v2564_v57 = vunpack.c.l.b16 %v2428_v27 }
 0x231   : > { %7063 = vst [vmem:[#allocation53_spill] sm:$0xff] %v5909_v56  ;;  %v2568_v17 = vunpack.c.h.b16 %v2430_v53  ;;  %v2567_v51 = vunpack.c.l.b16 %v2430_v53  ;;  %v5950_v53 = vld [vmem:[%s4545_s25 + $0x18] sm:$0xff] }
 0x232   : > { %1635 = vmatmul.bf16.gmra.mxu3 %v4218_v26  ;;  %1852 = vmatmul.bf16.gmra.mxu0 %v4224_v9  ;;  %v2432_v26 = vsel %vm5714_vm6, %v5764_v12, 0  ;;  %v5924_v9 = vpop.f32.mrf.mxu2  ;;  %v802_v29 = vpop.f32.mrf.mxu3 }
 0x233   : > { %2200 = vrot.lane.b32.xlu0 %v2168_v43, %s4471_s8  ;;  %1591 = vmatmul.bf16.gmra.mxu2 %v4219_v0  ;;  %7064 = vst [vmem:[#allocation54_spill] sm:$0xff] %v5924_v9  ;;  %v2571_v12 = vunpack.c.h.b16 %v2432_v26  ;;  %v2570_v34 = vunpack.c.l.b16 %v2432_v26  ;;  %v1987_v26 = vsel %vm5571_vm14, %v5950_v53, 0 }
 0x234   : > { %v2118_v56 = vunpack.c.l.b16 %v1987_v26 }
 0x235   : > { %2198 = vrot.lane.b32.xlu2 %v2167_v38, %s4471_s8  ;;  %2196 = vrot.lane.b32.xlu1 %v2166_v63, %s4471_s8  ;;  %v2604_v38 = vpack.c.b16 %v2571_v12, %v2568_v17  ;;  %v2603_v63 = vpack.c.b16 %v2570_v34, %v2567_v51  ;;  %v5968_v51 = vld [vmem:[%s6923_s1 + $0xf0] sm:$0xff]  ;;  %v2119_v34 = vunpack.c.h.b16 %v1987_v26 }
 0x237   : > { %v5932_v24 = vpop.f32.mrf.mxu0 }
 0x238   : > { %7065 = vst [vmem:[#allocation55_spill] sm:$0xff] %v5932_v24  ;;  %v1204_v48 = vpop.f32.mrf.mxu1 }
 0x239   : > { %v5934_v43 = vadd.f32 %v1204_v48, %v798_v16  ;;  %v5956_v16 = vld [vmem:[%s4545_s25 + $0x24] sm:$0xff]  ;;  %v2123_v48 = vunpack.c.l.b16 %v1990_v8  ;;  %v2429_v8 = vsel %vm5710_vm4, %v5817_v22, 0  ;;  %v803_v22 = vadd.f32 %v802_v29, %v5465_v46 }
 0x23a   : > { %1906 = vmatmul.bf16.gmra.mxu1 %v4225_v25  ;;  %v1989_v1 = vsel %vm5571_vm14, %v5956_v16, 0  ;;  %v5963_v17 = vpop.f32.mrf.mxu2  ;;  %v5981_v18 = vpop.f32.mrf.mxu3 }
 0x23b   : > { %2643 = vrot.lane.b32.xlu0 %v2605_v37, %s4472_s23  ;;  %v2122_v37 = vunpack.c.h.b16 %v1989_v1  ;;  %v2121_v24 = vunpack.c.l.b16 %v1989_v1  ;;  %v2563_v1 = vunpack.c.l.b16 %v2427_v23  ;;  %v6012_v23 = vld [vmem:[%s4545_s25 + $0x14] sm:$0xf] }
 0x23d   : > { %2641 = vrot.lane.b32.xlu2 %v2604_v38, %s4472_s23  ;;  %2639 = vrot.lane.b32.xlu1 %v2603_v63, %s4472_s23  ;;  %v2165_v63 = vpack.c.b16 %v2123_v48, %v2120_v36  ;;  %v2163_v26 = vpack.c.b16 %v2121_v24, %v2118_v56  ;;  %v2566_v56 = vunpack.c.l.b16 %v2429_v8  ;;  %v2565_v24 = vunpack.c.h.b16 %v2428_v27 }
 0x23e   : > { %v1986_v8 = vsel %vm5567_vm13, %v6012_v23, 0 }
 0x23f   : > { %v1150_v12 = vpop.f32.mrf.mxu0  ;;  %v2602_v46 = vpack.c.b16 %v2566_v56, %v2563_v1 }
 0x240   : > { %v5971_v9 = vadd.f32 %v1150_v12, %v5689_v39  ;;  %v5973_v38 = vpop.f32.mrf.mxu1  ;;  %v2164_v39 = vpack.c.b16 %v2122_v37, %v2119_v34  ;;  %v6006_v37 = vld [vmem:[%s4545_s25 + $0x8] sm:$0xf] }
 0x242   : > { %1640 = vmatmul.bf16.gmra.mxu3 %v4219_v0  ;;  %1857 = vmatmul.bf16.gmra.mxu0 %v4225_v25  ;;  %v746_v0 = vadd.f32 %v5769_v55, %v5720_v33  ;;  %v2426_v25 = vsel %vm5714_vm6, %v5826_v59, 0  ;;  %v4226_v33 = vld [vmem:[%s6923_s1 + $0x120] sm:$0xff]  ;;  %v6001_v12 = vpop.f32.mrf.mxu2  ;;  %v807_v1 = vpop.f32.mrf.mxu3 }
 0x243   : > { %2194 = vrot.lane.b32.xlu0 %v2165_v63, %s4471_s8  ;;  %1596 = vmatmul.bf16.gmra.mxu2 %v5968_v51  ;;  %v2562_v59 = vunpack.c.h.b16 %v2426_v25  ;;  %v2561_v36 = vunpack.c.l.b16 %v2426_v25  ;;  %v1984_v63 = vsel %vm5567_vm13, %v6006_v37, 0  ;;  %v6021_v25 = vld [vmem:[%s4545_s25] sm:$0xff] }
 0x244   : > { %v1983_v27 = vsel %vm5571_vm14, %v6021_v25, 0  ;;  %v2114_v56 = vunpack.c.l.b16 %v1984_v63 }
 0x245   : > { %2192 = vrot.lane.b32.xlu2 %v2164_v39, %s4471_s8  ;;  %2190 = vrot.lane.b32.xlu1 %v2163_v26, %s4471_s8  ;;  %v2601_v39 = vpack.c.b16 %v2565_v24, %v2562_v59  ;;  %v2600_v26 = vpack.c.b16 %v2564_v57, %v2561_v36  ;;  %v4221_v59 = vld [vmem:[%s6923_s1 + $0xf8] sm:$0xff]  ;;  %v2113_v24 = vunpack.c.h.b16 %v1983_v27  ;;  %v2112_v57 = vunpack.c.l.b16 %v1983_v27 }
 0x247   : > { %v1152_v55 = vpop.f32.mrf.mxu0 }
 0x248   : > { %v5999_v48 = vadd.f32 %v1152_v55, %v746_v0  ;;  %v1209_v34 = vpop.f32.mrf.mxu1  ;;  %v749_v0 = vadd.f32 %v5803_v20, %v5420_v62  ;;  %v2117_v55 = vunpack.c.l.b16 %v1986_v8  ;;  %v2423_v8 = vsel %vm5710_vm4, %v5873_v7, 0 }
 0x249   : > { %v6003_v29 = vadd.f32 %v1209_v34, %v803_v22  ;;  %v6027_v22 = vld [vmem:[%s4545_s25 + $0xc] sm:$0xff]  ;;  %v808_v7 = vadd.f32 %v807_v1, %v5487_v42  ;;  %v2419_v42 = vsel %vm5710_vm4, %v5937_v10, 0  ;;  %v2421_v1 = vsel %vm5710_vm4, %v5943_v47, 0 }
 0x24a   : > { %7066 = vst [vmem:[#allocation56_spill] sm:$0xff] %v5999_v48  ;;  %1911 = vmatmul.bf16.gmra.mxu1 %v4226_v33  ;;  %v1985_v35 = vsel %vm5571_vm14, %v6027_v22, 0  ;;  %v6044_v63 = vpop.f32.mrf.mxu2  ;;  %v2420_v10 = vsel %vm5714_vm6, %v5956_v16, 0  ;;  %v2551_v47 = vunpack.c.l.b16 %v2419_v42  ;;  %v2415_v16 = vsel %vm5710_vm4, %v6006_v37, 0 }
 0x24b   : > { %2637 = vrot.lane.b32.xlu0 %v2602_v46, %s4472_s23  ;;  %v2116_v36 = vunpack.c.h.b16 %v1985_v35  ;;  %v2115_v34 = vunpack.c.l.b16 %v1985_v35 }
 0x24d   : > { %2635 = vrot.lane.b32.xlu2 %v2601_v39, %s4472_s23  ;;  %2633 = vrot.lane.b32.xlu1 %v2600_v26, %s4472_s23  ;;  %v2162_v39 = vpack.c.b16 %v2117_v55, %v2114_v56  ;;  %v2425_v26 = vsel %vm5710_vm4, %v5879_v50, 0  ;;  %v2160_v27 = vpack.c.b16 %v2115_v34, %v2112_v57  ;;  %v2557_v50 = vunpack.c.l.b16 %v2423_v8  ;;  %v4227_v56 = vld [vmem:[%s6923_s1 + $0x128] sm:$0xff]  ;;  %v6065_v55 = vpop.f32.mrf.mxu3 }
 0x24e   : > { %v2560_v35 = vunpack.c.l.b16 %v2425_v26 }
 0x24f   : > { %v6034_v62 = vpop.permute.xlu2 %2228  ;;  %v1155_v20 = vpop.f32.mrf.mxu0 }
 0x250   : > { %v6039_v61 = vadd.f32 %v1155_v20, %v749_v0  ;;  %v6041_v46 = vpop.f32.mrf.mxu1  ;;  %v2161_v0 = vpack.c.b16 %v2116_v36, %v2113_v24 }
 0x252   : > { %1645 = vmatmul.bf16.gmra.mxu3 %v5968_v51  ;;  %1862 = vmatmul.bf16.gmra.mxu0 %v4226_v33  ;;  %v2422_v51 = vsel %vm5714_vm6, %v5888_v31, 0  ;;  %v2424_v33 = vsel %vm5714_vm6, %v5894_v45, 0 }
 0x253   : > { %2188 = vrot.lane.b32.xlu0 %v2162_v39, %s4471_s8  ;;  %1601 = vmatmul.bf16.gmra.mxu2 %v4221_v59  ;;  %v2556_v24 = vunpack.c.h.b16 %v2422_v51  ;;  %v2559_v45 = vunpack.c.h.b16 %v2424_v33  ;;  %v2555_v36 = vunpack.c.l.b16 %v2422_v51  ;;  %v2558_v57 = vunpack.c.l.b16 %v2424_v33  ;;  %v6082_v51 = vpop.f32.mrf.mxu2 }
 0x254   : > { %v2599_v39 = vpack.c.b16 %v2560_v35, %v2557_v50  ;;  %7067 = vst [vmem:[#allocation57_spill] sm:$0xff] %v6082_v51  ;;  %v2418_v33 = vsel %vm5714_vm6, %v5950_v53, 0 }
 0x255   : > { %2186 = vrot.lane.b32.xlu2 %v2161_v0, %s4471_s8  ;;  %2184 = vrot.lane.b32.xlu1 %v2160_v27, %s4471_s8  ;;  %v2598_v8 = vpack.c.b16 %v2559_v45, %v2556_v24  ;;  %v2597_v26 = vpack.c.b16 %v2558_v57, %v2555_v36  ;;  %v754_v27 = vadd.f32 %v5884_v60, %v5441_v54  ;;  %v2550_v54 = vunpack.c.h.b16 %v2418_v33 }
 0x256   : > { %v2553_v60 = vunpack.c.h.b16 %v2420_v10  ;;  %v2549_v24 = vunpack.c.l.b16 %v2418_v33  ;;  %v2552_v45 = vunpack.c.l.b16 %v2420_v10 }
 0x257   : > { %v6067_v20 = vpop.permute.xlu2 %2222  ;;  %v6069_v31 = vpop.f32.mrf.mxu0 }
 0x258   : > { %v1214_v34 = vpop.f32.mrf.mxu1  ;;  %v2595_v42 = vpack.c.b16 %v2553_v60, %v2550_v54 }
 0x259   : > { %v6071_v0 = vadd.f32 %v1214_v34, %v808_v7  ;;  %v2554_v7 = vunpack.c.l.b16 %v2421_v1  ;;  %v812_v34 = vpop.f32.mrf.mxu3  ;;  %v2594_v1 = vpack.c.b16 %v2552_v45, %v2549_v24 }
 0x25a   : > { %1916 = vmatmul.bf16.gmra.mxu1 %v4227_v56  ;;  %v813_v58 = vadd.f32 %v812_v34, %v5504_v2 }
 0x25b   : > { %2631 = vrot.lane.b32.xlu0 %v2599_v39, %s4472_s23  ;;  %v2596_v57 = vpack.c.b16 %v2554_v7, %v2551_v47  ;;  %v2417_v39 = vsel %vm5710_vm4, %v6012_v23, 0  ;;  %v2545_v23 = vunpack.c.l.b16 %v2415_v16  ;;  %v759_v16 = vadd.f32 %v5963_v17, %v5459_v15 }
 0x25d   : > { %2629 = vrot.lane.b32.xlu2 %v2598_v8, %s4472_s23  ;;  %2627 = vrot.lane.b32.xlu1 %v2597_v26, %s4472_s23  ;;  %v2414_v8 = vsel %vm5714_vm6, %v6021_v25, 0  ;;  %v4228_v25 = vld [vmem:[%s6923_s1 + $0x130] sm:$0xff] }
 0x25e   : > { %v2544_v33 = vunpack.c.h.b16 %v2414_v8  ;;  %v2543_v2 = vunpack.c.l.b16 %v2414_v8 }
 0x25f   : > { %v6092_v50 = vpop.permute.xlu2 %2216  ;;  %v1160_v35 = vpop.f32.mrf.mxu0 }
 0x260   : > { %v6094_v36 = vadd.f32 %v1160_v35, %v754_v27  ;;  %v6096_v53 = vpop.f32.mrf.mxu1 }
 0x261   : > { %v6131_v34 = vpop.f32.mrf.mxu3 }
 0x262   : > { %1650 = vmatmul.bf16.gmra.mxu3 %v4221_v59  ;;  %1867 = vmatmul.bf16.gmra.mxu0 %v4227_v56  ;;  %v2416_v59 = vsel %vm5714_vm6, %v6027_v22, 0  ;;  %v2548_v56 = vunpack.c.l.b16 %v2417_v39  ;;  %7068 = vst [vmem:[#allocation58_spill] sm:$0xff] %v6131_v34 }
 0x263   : > { %2625 = vrot.lane.b32.xlu0 %v2596_v57, %s4472_s23  ;;  %v2547_v47 = vunpack.c.h.b16 %v2416_v59  ;;  %v2546_v7 = vunpack.c.l.b16 %v2416_v59 }
 0x264   : > { %v2593_v24 = vpack.c.b16 %v2548_v56, %v2545_v23 }
 0x265   : > { %2623 = vrot.lane.b32.xlu2 %v2595_v42, %s4472_s23  ;;  %2621 = vrot.lane.b32.xlu1 %v2594_v1, %s4472_s23  ;;  %v2231_v37 = vpop.permute.xlu0 %2230  ;;  %v2592_v57 = vpack.c.b16 %v2547_v47, %v2544_v33 }
 0x266   : > { %v2248_v26 = vsel %vm2232_vm5, %v6034_v62, %v2231_v37  ;;  %v1567_v27 = vpop.f32.mrf.mxu2 }
 0x267   : > { %v6119_v4 = vpop.permute.xlu2 %2659  ;;  %v2227_v22 = vpop.permute.xlu1 %2226  ;;  %v6122_v10 = vadd.f32 %v1567_v27, %v5780_v44  ;;  %2314 = vmatpush.bf16.msrb.mxu3 %v2248_v26  ;;  %v2591_v44 = vpack.c.b16 %v2546_v7, %v2543_v2  ;;  %v4229_v26 = vld [vmem:[%s6923_s1 + $0x138] sm:$0xff] }
 0x268   : > { %v2247_v35 = vsel %vm2232_vm5, %v2227_v22, %v6034_v62  ;;  %v6126_v54 = vpop.f32.mrf.mxu0  ;;  %v1219_v60 = vpop.f32.mrf.mxu1 }
 0x269   : > { %2265 = vmatpush.bf16.msrb.mxu2 %v2247_v35  ;;  %v6128_v45 = vadd.f32 %v1219_v60, %v813_v58  ;;  %v7070_v35 = vld [vmem:[#allocation5_spill] sm:$0xff] }
 0x26a   : > { %1921 = vmatmul.bf16.gmra.mxu1 %v4228_v25 }
 0x26b   : > { %2619 = vrot.lane.b32.xlu0 %v2593_v24, %s4472_s23 }
 0x26d   : > { %2617 = vrot.lane.b32.xlu2 %v2592_v57, %s4472_s23  ;;  %2615 = vrot.lane.b32.xlu1 %v2591_v44, %s4472_s23  ;;  %v2225_v62 = vpop.permute.xlu0 %2224  ;;  %s4474_s23 = smov 34  }
 0x26e   : > { %v6137_v39 = vpop.f32.mrf.mxu2  ;;  %v2246_v42 = vsel %vm2232_vm5, %v6067_v20, %v2225_v62 }
 0x26f   : > { %v2211_v1 = vpop.permute.xlu2 %2210  ;;  %v2221_v8 = vpop.permute.xlu1 %2220  ;;  %2315 = vmatpush.bf16.msrb.mxu3 %v2246_v42 }
 0x270   : > { %v1165_v59 = vpop.f32.mrf.mxu0  ;;  %v2245_v37 = vsel %vm2232_vm5, %v2221_v8, %v6067_v20  ;;  %v6177_v47 = vpop.f32.mrf.mxu1 }
 0x271   : > { %v6143_v58 = vadd.f32 %v1165_v59, %v759_v16  ;;  %2266 = vmatpush.bf16.msrb.mxu2 %v2245_v37  ;;  %7069 = vst [vmem:[#allocation59_spill] sm:$0xff] %v6177_v47 }
 0x272   : > { %1872 = vmatmul.bf16.gmra.mxu0 %v4228_v25 }
 0x273   : > { %2935 = vrot.lane.b32.xlu0 %v4567_v13, %s4473_s4 }
 0x275   : > { %3102 = vrot.lane.b32.xlu1 %v7022_v41, %s4474_s23  ;;  %v2219_v15 = vpop.permute.xlu0 %2218  ;;  %v1616_v17 = vpop.f32.mrf.mxu3  ;;  %2933 = vrot.lane.b32.xlu2 %v4553_v5, %s4473_s4 }
 0x276   : > { %v1572_v23 = vpop.f32.mrf.mxu2  ;;  %v1657_v56 = vadd.f32 %v1616_v17, %v5658_v49  ;;  %v2244_v20 = vsel %vm2232_vm5, %v6092_v50, %v2219_v15  ;;  %v764_v49 = vadd.f32 %v6044_v63, %v5481_v21 }
 0x277   : > { %v2654_v27 = vpop.permute.xlu2 %2653  ;;  %v2215_v13 = vpop.permute.xlu1 %2214  ;;  %v6157_v25 = vadd.f32 %v1572_v23, %v5843_v6  ;;  %2316 = vmatpush.bf16.msrb.mxu3 %v2244_v20 }
 0x278   : > { %v6159_v41 = vpop.f32.mrf.mxu0  ;;  %v2243_v5 = vsel %vm2232_vm5, %v2215_v13, %v6092_v50 }
 0x279   : > { %2267 = vmatpush.bf16.msrb.mxu2 %v2243_v5 }
 0x27a   : > { %1926 = vmatmul.bf16.gmra.mxu1 %v4229_v26 }
 0x27b   : > { %2929 = vrot.lane.b32.xlu0 %v4569_v14, %s4473_s4 }
 0x27d   : > { %v2662_v33 = vpop.permute.xlu0 %2661  ;;  %v6167_v22 = vpop.f32.mrf.mxu3  ;;  %2937 = vrot.lane.b32.xlu1 %v4550_v3, %s4473_s4  ;;  %2927 = vrot.lane.b32.xlu2 %v4564_v11, %s4473_s4 }
 0x27e   : > { %v2679_v6 = vsel %vm2663_vm7, %v6119_v4, %v2662_v33  ;;  %v6175_v50 = vpop.f32.mrf.mxu2 }
 0x27f   : > { %v2205_v14 = vpop.permute.xlu2 %2204  ;;  %v2658_v2 = vpop.permute.xlu1 %2657  ;;  %2745 = vmatpush.bf16.msrb.mxu1 %v2679_v6 }
 0x280   : > { %v2678_v21 = vsel %vm2663_vm7, %v2658_v2, %v6119_v4  ;;  %v1170_v63 = vpop.f32.mrf.mxu0 }
 0x281   : > { %v6181_v7 = vadd.f32 %v1170_v63, %v764_v49  ;;  %2696 = vmatpush.bf16.msrb.mxu0 %v2678_v21 }
 0x282   : > { %1877 = vmatmul.bf16.gmra.mxu0 %v4229_v26 }
 0x283   : > { %2923 = vrot.lane.b32.xlu0 %v4581_v19, %s4473_s4 }
 0x285   : > { %v2213_v3 = vpop.permute.xlu0 %2212  ;;  %v1621_v11 = vpop.f32.mrf.mxu3  ;;  %2931 = vrot.lane.b32.xlu1 %v4617_v40, %s4473_s4  ;;  %2921 = vrot.lane.b32.xlu2 %v7070_v35, %s4473_s4 }
 0x286   : > { %v1577_v60 = vpop.f32.mrf.mxu2  ;;  %v1661_v24 = vadd.f32 %v1621_v11, %v5742_v28  ;;  %v2242_v4 = vsel %vm2232_vm5, %v2211_v1, %v2213_v3  ;;  %v7073_v28 = vld [vmem:[#allocation12_spill] sm:$0xff] }
 0x287   : > { %v2648_v57 = vpop.permute.xlu2 %2647  ;;  %v2209_v44 = vpop.permute.xlu1 %2208  ;;  %v6192_v16 = vadd.f32 %v1577_v60, %v5907_v52  ;;  %2317 = vmatpush.bf16.msrb.mxu3 %v2242_v4 }
 0x288   : > { %v6194_v19 = vpop.f32.mrf.mxu0  ;;  %v1892_v62 = vpop.f32.mrf.mxu1  ;;  %v2241_v42 = vsel %vm2232_vm5, %v2209_v44, %v2211_v1 }
 0x289   : > { %7071 = vst [vmem:[#allocation5_spill] sm:$0xff] %v6194_v19  ;;  %v6197_v40 = vadd.f32 %v1892_v62, %v1657_v56  ;;  %2268 = vmatpush.bf16.msrb.mxu2 %v2241_v42 }
 0x28d   : > { %v2656_v8 = vpop.permute.xlu0 %2655  ;;  %v6199_v59 = vpop.f32.mrf.mxu3  ;;  %2925 = vrot.lane.b32.xlu1 %v7073_v28, %s4473_s4 }
 0x28e   : > { %7072 = vst [vmem:[#allocation60_spill] sm:$0xff] %v6199_v59  ;;  %v6203_v37 = vpop.f32.mrf.mxu2  ;;  %v2677_v52 = vsel %vm2663_vm7, %v2654_v27, %v2656_v8 }
 0x28f   : > { %7074 = vst [vmem:[#allocation12_spill] sm:$0xff] %v6203_v37  ;;  %v2652_v15 = vpop.permute.xlu1 %2651  ;;  %2746 = vmatpush.bf16.msrb.mxu1 %v2677_v52  ;;  %v2199_v20 = vpop.permute.xlu2 %2198 }
 0x290   : > { %v1843_v17 = vpop.f32.mrf.mxu0  ;;  %v6206_v23 = vpop.f32.mrf.mxu1  ;;  %v2676_v1 = vsel %vm2663_vm7, %v2652_v15, %v2654_v27 }
 0x291   : > { %v6210_v56 = vadd.f32 %v1843_v17, %v6122_v10  ;;  %2697 = vmatpush.bf16.msrb.mxu0 %v2676_v1 }
 0x295   : > { %v2207_v26 = vpop.permute.xlu0 %2206  ;;  %v1626_v13 = vpop.f32.mrf.mxu3 }
 0x296   : > { %v1582_v5 = vpop.f32.mrf.mxu2  ;;  %v1665_v49 = vadd.f32 %v1626_v13, %v5808_v30  ;;  %v2240_v33 = vsel %vm2232_vm5, %v2205_v14, %v2207_v26 }
 0x297   : > { %v2203_v6 = vpop.permute.xlu1 %2202  ;;  %v6215_v2 = vadd.f32 %v1582_v5, %v5971_v9  ;;  %2318 = vmatpush.bf16.msrb.mxu3 %v2240_v33  ;;  %v2642_v3 = vpop.permute.xlu2 %2641 }
 0x298   : > { %v6217_v21 = vpop.f32.mrf.mxu0  ;;  %v1897_v27 = vpop.f32.mrf.mxu1  ;;  %v2239_v10 = vsel %vm2232_vm5, %v2203_v6, %v2205_v14 }
 0x299   : > { %v6220_v63 = vadd.f32 %v1897_v27, %v1661_v24  ;;  %2269 = vmatpush.bf16.msrb.mxu2 %v2239_v10 }
 0x29d   : > { %v2650_v11 = vpop.permute.xlu0 %2649  ;;  %v6222_v35 = vpop.f32.mrf.mxu3 }
 0x29e   : > { %7075 = vst [vmem:[#allocation61_spill] sm:$0xff] %v6222_v35  ;;  %v6224_v30 = vpop.f32.mrf.mxu2  ;;  %v2675_v60 = vsel %vm2663_vm7, %v2648_v57, %v2650_v11 }
 0x29f   : > { %7076 = vst [vmem:[#allocation62_spill] sm:$0xff] %v6224_v30  ;;  %v2646_v4 = vpop.permute.xlu1 %2645  ;;  %2747 = vmatpush.bf16.msrb.mxu1 %v2675_v60  ;;  %v2193_v15 = vpop.permute.xlu2 %2192 }
 0x2a0   : > { %v1848_v9 = vpop.f32.mrf.mxu0  ;;  %v6227_v44 = vpop.f32.mrf.mxu1  ;;  %v2674_v62 = vsel %vm2663_vm7, %v2646_v4, %v2648_v57 }
 0x2a1   : > { %7077 = vst [vmem:[#allocation63_spill] sm:$0xff] %v6227_v44  ;;  %v6231_v14 = vadd.f32 %v1848_v9, %v6157_v25  ;;  %2698 = vmatpush.bf16.msrb.mxu0 %v2674_v62  ;;  %v4391_v44 = vld [vmem:[%s4545_s25 + $0x2c] sm:$0xf] }
 0x2a5   : > { %v2201_v24 = vpop.permute.xlu0 %2200  ;;  %v1631_v42 = vpop.f32.mrf.mxu3 }
 0x2a6   : > { %v1587_v8 = vpop.f32.mrf.mxu2  ;;  %v1669_v28 = vadd.f32 %v1631_v42, %v5870_v32  ;;  %v2238_v52 = vsel %vm2232_vm5, %v2199_v20, %v2201_v24 }
 0x2a7   : > { %v2197_v17 = vpop.permute.xlu1 %2196  ;;  %v6236_v1 = vadd.f32 %v1587_v8, %v6039_v61  ;;  %2319 = vmatpush.bf16.msrb.mxu3 %v2238_v52 }
 0x2a8   : > { %v6238_v26 = vpop.f32.mrf.mxu0  ;;  %v1902_v57 = vpop.f32.mrf.mxu1  ;;  %v2237_v25 = vsel %vm2232_vm5, %v2197_v17, %v2199_v20 }
 0x2a9   : > { %7078 = vst [vmem:[#allocation64_spill] sm:$0xff] %v6238_v26  ;;  %v6241_v13 = vadd.f32 %v1902_v57, %v1665_v49  ;;  %2270 = vmatpush.bf16.msrb.mxu2 %v2237_v25  ;;  %v2636_v20 = vpop.permute.xlu2 %2635 }
 0x2ad   : > { %v2644_v5 = vpop.permute.xlu0 %2643  ;;  %v6243_v33 = vpop.f32.mrf.mxu3 }
 0x2ae   : > { %7079 = vst [vmem:[#allocation65_spill] sm:$0xff] %v6243_v33  ;;  %v6245_v32 = vpop.f32.mrf.mxu2  ;;  %v2673_v6 = vsel %vm2663_vm7, %v2642_v3, %v2644_v5 }
 0x2af   : > { %v2640_v27 = vpop.permute.xlu1 %2639  ;;  %2748 = vmatpush.bf16.msrb.mxu1 %v2673_v6 }
 0x2b0   : > { %v1853_v61 = vpop.f32.mrf.mxu0  ;;  %v6248_v10 = vpop.f32.mrf.mxu1  ;;  %v2672_v11 = vsel %vm2663_vm7, %v2640_v27, %v2642_v3 }
 0x2b1   : > { %7080 = vst [vmem:[#allocation66_spill] sm:$0xff] %v6248_v10  ;;  %v6252_v60 = vadd.f32 %v1853_v61, %v6192_v16  ;;  %2699 = vmatpush.bf16.msrb.mxu0 %v2672_v11  ;;  %v2187_v57 = vpop.permute.xlu2 %2186 }
 0x2b5   : > { %v2195_v49 = vpop.permute.xlu0 %2194  ;;  %v1636_v4 = vpop.f32.mrf.mxu3 }
 0x2b6   : > { %v1592_v9 = vpop.f32.mrf.mxu2  ;;  %v1673_v62 = vadd.f32 %v1636_v4, %v5934_v43  ;;  %v2236_v24 = vsel %vm2232_vm5, %v2193_v15, %v2195_v49 }
 0x2b7   : > { %v2191_v42 = vpop.permute.xlu1 %2190  ;;  %v6257_v8 = vadd.f32 %v1592_v9, %v6094_v36  ;;  %2320 = vmatpush.bf16.msrb.mxu3 %v2236_v24 }
 0x2b8   : > { %v6259_v52 = vpop.f32.mrf.mxu0  ;;  %v1907_v3 = vpop.f32.mrf.mxu1  ;;  %v2235_v16 = vsel %vm2232_vm5, %v2191_v42, %v2193_v15  ;;  %v4230_v42 = vld [vmem:[%s6923_s1 + $0x140] sm:$0xff] }
 0x2b9   : > { %7081 = vst [vmem:[#allocation67_spill] sm:$0xff] %v6259_v52  ;;  %v6262_v17 = vadd.f32 %v1907_v3, %v1669_v28  ;;  %2271 = vmatpush.bf16.msrb.mxu2 %v2235_v16  ;;  %v2630_v3 = vpop.permute.xlu2 %2629 }
 0x2bd   : > { %v2638_v25 = vpop.permute.xlu0 %2637  ;;  %v6264_v5 = vpop.f32.mrf.mxu3 }
 0x2be   : > { %v6266_v43 = vpop.f32.mrf.mxu2  ;;  %v2671_v6 = vsel %vm2663_vm7, %v2636_v20, %v2638_v25 }
 0x2bf   : > { %v2634_v27 = vpop.permute.xlu1 %2633  ;;  %2749 = vmatpush.bf16.msrb.mxu1 %v2671_v6 }
 0x2c0   : > { %v1858_v36 = vpop.f32.mrf.mxu0  ;;  %v6269_v61 = vpop.f32.mrf.mxu1  ;;  %v2670_v11 = vsel %vm2663_vm7, %v2634_v27, %v2636_v20 }
 0x2c1   : > { %7082 = vst [vmem:[#allocation68_spill] sm:$0xff] %v6269_v61  ;;  %v6273_v15 = vadd.f32 %v1858_v36, %v6215_v2  ;;  %2700 = vmatpush.bf16.msrb.mxu0 %v2670_v11 }
 0x2c5   : > { %v2189_v28 = vpop.permute.xlu0 %2188  ;;  %v1641_v49 = vpop.f32.mrf.mxu3 }
 0x2c6   : > { %v1597_v4 = vpop.f32.mrf.mxu2  ;;  %v1677_v9 = vadd.f32 %v1641_v49, %v6003_v29  ;;  %v2234_v24 = vsel %vm2232_vm5, %v2187_v57, %v2189_v28 }
 0x2c7   : > { %v2185_v16 = vpop.permute.xlu1 %2184  ;;  %v6281_v25 = vadd.f32 %v1597_v4, %v6143_v58  ;;  %2321 = vmatpush.bf16.msrb.mxu3 %v2234_v24 }
 0x2c8   : > { %v6283_v2 = vpop.f32.mrf.mxu0  ;;  %v1912_v20 = vpop.f32.mrf.mxu1  ;;  %v2233_v6 = vsel %vm2232_vm5, %v2185_v16, %v2187_v57 }
 0x2c9   : > { %7083 = vst [vmem:[#allocation69_spill] sm:$0xff] %v6283_v2  ;;  %v6286_v27 = vadd.f32 %v1912_v20, %v1673_v62  ;;  %2272 = vmatpush.bf16.msrb.mxu2 %v2233_v6  ;;  %v2624_v57 = vpop.permute.xlu2 %2623 }
 0x2ca   : > { %2322 = vmatmul.bf16.vlgmr.msrb.gmra.mxu3 %v4230_v42 }
 0x2cc   : > { %2273 = vmatmul.bf16.vlgmr.msrb.gmra.mxu2 %v4230_v42 }
 0x2cd   : > { %v2632_v29 = vpop.permute.xlu0 %2631  ;;  %v6288_v36 = vpop.f32.mrf.mxu3 }
 0x2ce   : > { %v6290_v11 = vpop.f32.mrf.mxu2  ;;  %v2669_v28 = vsel %vm2663_vm7, %v2630_v3, %v2632_v29  ;;  %v4231_v29 = vld [vmem:[%s6923_s1 + $0x148] sm:$0xff] }
 0x2cf   : > { %v2628_v58 = vpop.permute.xlu1 %2627  ;;  %2750 = vmatpush.bf16.msrb.mxu1 %v2669_v28 }
 0x2d0   : > { %v1863_v49 = vpop.f32.mrf.mxu0  ;;  %v6293_v4 = vpop.f32.mrf.mxu1  ;;  %v2668_v24 = vsel %vm2663_vm7, %v2628_v58, %v2630_v3 }
 0x2d1   : > { %v6297_v62 = vadd.f32 %v1863_v49, %v6236_v1  ;;  %2701 = vmatpush.bf16.msrb.mxu0 %v2668_v24 }
 0x2d5   : > { %v2626_v42 = vpop.permute.xlu0 %2625  ;;  %v1646_v16 = vpop.f32.mrf.mxu3 }
 0x2d6   : > { %v1602_v20 = vpop.f32.mrf.mxu2  ;;  %v1681_v6 = vadd.f32 %v1646_v16, %v6071_v0  ;;  %v2667_v19 = vsel %vm2663_vm7, %v2624_v57, %v2626_v42  ;;  %v2618_v0 = vpop.permute.xlu2 %2617 }
 0x2d7   : > { %v2622_v28 = vpop.permute.xlu1 %2621  ;;  %v6305_v47 = vadd.f32 %v1602_v20, %v6181_v7  ;;  %2751 = vmatpush.bf16.msrb.mxu1 %v2667_v19  ;;  %v4238_v7 = vld [vmem:[%s6923_s1 + $0x180] sm:$0xff] }
 0x2d8   : > { %v6307_v1 = vpop.f32.mrf.mxu0  ;;  %v1917_v3 = vpop.f32.mrf.mxu1  ;;  %v2666_v58 = vsel %vm2663_vm7, %v2622_v28, %v2624_v57 }
 0x2d9   : > { %v6310_v49 = vadd.f32 %v1917_v3, %v1677_v9  ;;  %2702 = vmatpush.bf16.msrb.mxu0 %v2666_v58  ;;  %v4232_v3 = vld [vmem:[%s6923_s1 + $0x150] sm:$0xff] }
 0x2da   : > { %2327 = vmatmul.bf16.gmra.mxu3 %v4231_v29 }
 0x2dc   : > { %2278 = vmatmul.bf16.gmra.mxu2 %v4231_v29 }
 0x2dd   : > { %v2620_v24 = vpop.permute.xlu0 %2619  ;;  %v6312_v42 = vpop.f32.mrf.mxu3 }
 0x2de   : > { %v2665_v16 = vsel %vm2663_vm7, %v2618_v0, %v2620_v24 }
 0x2df   : > { %v2616_v19 = vpop.permute.xlu1 %2615  ;;  %2752 = vmatpush.bf16.msrb.mxu1 %v2665_v16 }
 0x2e0   : > { %v1868_v20 = vpop.f32.mrf.mxu0  ;;  %v6318_v34 = vpop.f32.mrf.mxu1  ;;  %v2664_v9 = vsel %vm2663_vm7, %v2616_v19, %v2618_v0 }
 0x2e1   : > { %v6322_v57 = vadd.f32 %v1868_v20, %v6257_v8  ;;  %2703 = vmatpush.bf16.msrb.mxu0 %v2664_v9  ;;  %v7084_v9 = vld [vmem:[#allocation24_spill] sm:$0xff] }
 0x2e2   : > { %2753 = vmatmul.bf16.vlgmr.msrb.gmra.mxu1 %v4238_v7 }
 0x2e4   : > { %2704 = vmatmul.bf16.vlgmr.msrb.gmra.mxu0 %v4238_v7 }
 0x2e5   : > { %v1651_v29 = vpop.f32.mrf.mxu3 }
 0x2e6   : > { %v1685_v28 = vadd.f32 %v1651_v29, %v6128_v45  ;;  %v7085_v29 = vld [vmem:[#allocation25_spill] sm:$0xff] }
 0x2e7   : > { %v3103_v58 = vpop.permute.xlu1 %3102 }
 0x2e8   : > { %v3104_v24 = vrot.slane %v3103_v58, 4  ;;  %v6328_v16 = vpop.f32.mrf.mxu0  ;;  %v1922_v51 = vpop.f32.mrf.mxu1 }
 0x2e9   : > { %v6330_v0 = vadd.f32 %v1922_v51, %v1681_v6 }
 0x2ea   : > { %v3106_v8 = vsel %vm3105_vm8, %v3104_v24, %v3103_v58  ;;  %v3114_v19 = vunpack.c.l.b16 %v3104_v24  ;;  %v3115_v7 = vunpack.c.h.b16 %v3104_v24  ;;  %2332 = vmatmul.bf16.gmra.mxu3 %v4232_v3  ;;  %v4239_v58 = vld [vmem:[%s6923_s1 + $0x188] sm:$0xff]  ;;  %v4366_v24 = vld [vmem:[%s4545_s25 + $0xb0] sm:$0xf] }
 0x2eb   : > { %v3107_v20 = vunpack.c.l.b16 %v3106_v8  ;;  %v3108_v45 = vunpack.c.h.b16 %v3106_v8  ;;  %v4367_v8 = vld [vmem:[%s4545_s25 + $0xbc] sm:$0xf] }
 0x2ec   : > { %vm3118_vm9 = vcmp.ne.s32.totalorder %v3114_v19, %v7084_v9  ;;  %vm3119_vm10 = vcmp.ne.s32.totalorder %v3115_v7, %v7085_v29  ;;  %2283 = vmatmul.bf16.gmra.mxu2 %v4232_v3 }
 0x2ed   : > { %vm3111_vm11 = vcmp.ne.s32.totalorder %v3107_v20, %v7084_v9  ;;  %vm3112_vm12 = vcmp.ne.s32.totalorder %v3108_v45, %v7085_v29  ;;  %vm6336_vm13 = vmpackc.low %vm3119_vm10, %vm3118_vm9  ;;  %v4368_v45 = vld [vmem:[%s4545_s25 + $0xa8] sm:$0xff]  ;;  %v4369_v29 = vld [vmem:[%s4545_s25 + $0xb4] sm:$0xff] }
 0x2ee   : > { %vm6340_vm14 = vmpackc.low %vm3112_vm12, %vm3111_vm11  ;;  %v3150_v3 = vsel %vm6336_vm13, %v4366_v24, 0  ;;  %v3152_v19 = vsel %vm6336_vm13, %v4367_v8, 0  ;;  %v3128_v59 = vsel %vm6336_vm13, %v4391_v44, 0 }
 0x2ef   : > { %v3294_v7 = vunpack.c.l.b16 %v3150_v3  ;;  %v3297_v20 = vunpack.c.l.b16 %v3152_v19  ;;  %v3149_v9 = vsel %vm6340_vm14, %v4368_v45, 0  ;;  %v3151_v2 = vsel %vm6340_vm14, %v4369_v29, 0 }
 0x2f0   : > { %v1873_v61 = vpop.f32.mrf.mxu0  ;;  %v6359_v33 = vpop.f32.mrf.mxu1  ;;  %v3293_v30 = vunpack.c.h.b16 %v3149_v9  ;;  %v3296_v48 = vunpack.c.h.b16 %v3151_v2  ;;  %v3292_v24 = vunpack.c.l.b16 %v3149_v9  ;;  %v3295_v52 = vunpack.c.l.b16 %v3151_v2  ;;  %v4372_v9 = vld [vmem:[%s4545_s25 + $0x90] sm:$0xff] }
 0x2f1   : > { %v6362_v8 = vadd.f32 %v1873_v61, %v6281_v25  ;;  %v3321_v3 = vpack.c.b16 %v3297_v20, %v3294_v7  ;;  %v4233_v61 = vld [vmem:[%s6923_s1 + $0x158] sm:$0xff]  ;;  %v7090_v20 = vld [vmem:[#allocation15_spill] sm:$0xff]  ;;  %v3145_v29 = vsel %vm6340_vm14, %v4372_v9, 0 }
 0x2f2   : > { %2758 = vmatmul.bf16.gmra.mxu1 %v4239_v58  ;;  %v3320_v19 = vpack.c.b16 %v3296_v48, %v3293_v30  ;;  %v3319_v45 = vpack.c.b16 %v3295_v52, %v3292_v24  ;;  %v4370_v48 = vld [vmem:[%s4545_s25 + $0x98] sm:$0xf]  ;;  %v4371_v52 = vld [vmem:[%s4545_s25 + $0xa4] sm:$0xf]  ;;  %v4373_v24 = vld [vmem:[%s4545_s25 + $0x9c] sm:$0xff]  ;;  %v3286_v9 = vunpack.c.l.b16 %v3145_v29 }
 0x2f3   : > { %3368 = vrot.lane.b32.xlu1 %v3321_v3, %s4475_s29  ;;  %v3146_v30 = vsel %vm6336_vm13, %v4370_v48, 0  ;;  %v7091_v3 = vld [vmem:[#allocation6_spill] sm:$0xff]  ;;  %v4240_v48 = vld [vmem:[%s6923_s1 + $0x190] sm:$0xff] }
 0x2f4   : > { %2709 = vmatmul.bf16.gmra.mxu0 %v4239_v58  ;;  %3366 = vrot.lane.b32.xlu0 %v3320_v19, %s4475_s29  ;;  %v3148_v58 = vsel %vm6336_vm13, %v4371_v52, 0  ;;  %v7092_v19 = vld [vmem:[#allocation7_spill] sm:$0xff]  ;;  %v3287_v52 = vunpack.c.h.b16 %v3145_v29  ;;  %v4234_v29 = vld [vmem:[%s6923_s1 + $0x160] sm:$0xff] }
 0x2f5   : > { %3364 = vrot.lane.b32.xlu2 %v3319_v45, %s4475_s29  ;;  %v3288_v45 = vunpack.c.l.b16 %v3146_v30 }
 0x2f8   : > { %v6370_v25 = vpop.f32.mrf.mxu0  ;;  %v1927_v2 = vpop.f32.mrf.mxu1 }
 0x2f9   : > { %v6372_v7 = vadd.f32 %v1927_v2, %v1685_v28  ;;  %v3147_v28 = vsel %vm6340_vm14, %v4373_v24, 0  ;;  %v3291_v2 = vunpack.c.l.b16 %v3148_v58 }
 0x2fa   : > { %2337 = vmatmul.bf16.gmra.mxu3 %v4233_v61  ;;  %v3289_v10 = vunpack.c.l.b16 %v3147_v28 }
 0x2fb   : > { %2919 = vrot.lane.b32.xlu1 %v7090_v20, %s4473_s4  ;;  %v3290_v20 = vunpack.c.h.b16 %v3147_v28 }
 0x2fc   : > { %2917 = vrot.lane.b32.xlu0 %v7091_v3, %s4473_s4  ;;  %2288 = vmatmul.bf16.gmra.mxu2 %v4233_v61  ;;  %v3318_v61 = vpack.c.b16 %v3291_v2, %v3288_v45  ;;  %v3316_v58 = vpack.c.b16 %v3289_v10, %v3286_v9  ;;  %v4375_v3 = vld [vmem:[%s4545_s25 + $0x8c] sm:$0xf]  ;;  %v7093_v10 = vld [vmem:[#allocation17_spill] sm:$0xff]  ;;  %v4376_v45 = vld [vmem:[%s4545_s25 + $0x78] sm:$0xff] }
 0x2fd   : > { %2915 = vrot.lane.b32.xlu2 %v7092_v19, %s4473_s4  ;;  %v3317_v30 = vpack.c.b16 %v3290_v20, %v3287_v52  ;;  %v3144_v19 = vsel %vm6336_vm13, %v4375_v3, 0  ;;  %v3141_v2 = vsel %vm6340_vm14, %v4376_v45, 0  ;;  %v7094_v20 = vld [vmem:[#allocation8_spill] sm:$0xff]  ;;  %v7095_v9 = vld [vmem:[#allocation9_spill] sm:$0xff] }
 0x2fe   : > { %v3280_v3 = vunpack.c.l.b16 %v3141_v2 }
 0x300   : > { %v1878_v24 = vpop.f32.mrf.mxu0 }
 0x301   : > { %v6396_v35 = vadd.f32 %v1878_v24, %v6305_v47  ;;  %v4374_v47 = vld [vmem:[%s4545_s25 + $0x80] sm:$0xf] }
 0x302   : > { %2763 = vmatmul.bf16.gmra.mxu1 %v4240_v48  ;;  %v3142_v28 = vsel %vm6336_vm13, %v4374_v47, 0 }
 0x303   : > { %3362 = vrot.lane.b32.xlu1 %v3318_v61, %s4475_s29  ;;  %v3282_v24 = vunpack.c.l.b16 %v3142_v28  ;;  %v3285_v61 = vunpack.c.l.b16 %v3144_v19  ;;  %v4235_v28 = vld [vmem:[%s6923_s1 + $0x168] sm:$0xff] }
 0x304   : > { %2714 = vmatmul.bf16.gmra.mxu0 %v4240_v48  ;;  %3360 = vrot.lane.b32.xlu0 %v3317_v30, %s4475_s29  ;;  %v4377_v48 = vld [vmem:[%s4545_s25 + $0x84] sm:$0xff]  ;;  %v4241_v30 = vld [vmem:[%s6923_s1 + $0x198] sm:$0xff] }
 0x305   : > { %3358 = vrot.lane.b32.xlu2 %v3316_v58, %s4475_s29  ;;  %v3143_v52 = vsel %vm6340_vm14, %v4377_v48, 0  ;;  %v3281_v58 = vunpack.c.h.b16 %v3141_v2  ;;  %v3315_v45 = vpack.c.b16 %v3285_v61, %v3282_v24  ;;  %v4378_v19 = vld [vmem:[%s4545_s25 + $0x68] sm:$0xf]  ;;  %v4380_v24 = vld [vmem:[%s4545_s25 + $0x60] sm:$0xff] }
 0x306   : > { %v3284_v47 = vunpack.c.h.b16 %v3143_v52  ;;  %v3138_v2 = vsel %vm6336_vm13, %v4378_v19, 0  ;;  %v3137_v61 = vsel %vm6340_vm14, %v4380_v24, 0 }
 0x30a   : > { %2342 = vmatmul.bf16.gmra.mxu3 %v4234_v29 }
 0x30b   : > { %2913 = vrot.lane.b32.xlu1 %v7093_v10, %s4473_s4  ;;  %v3283_v10 = vunpack.c.l.b16 %v3143_v52  ;;  %v4379_v52 = vld [vmem:[%s4545_s25 + $0x74] sm:$0xf] }
 0x30c   : > { %2911 = vrot.lane.b32.xlu0 %v7094_v20, %s4473_s4  ;;  %2293 = vmatmul.bf16.gmra.mxu2 %v4234_v29  ;;  %v3314_v29 = vpack.c.b16 %v3284_v47, %v3281_v58  ;;  %v3140_v20 = vsel %vm6336_vm13, %v4379_v52, 0  ;;  %v7097_v47 = vld [vmem:[#allocation10_spill] sm:$0xff]  ;;  %v3274_v52 = vunpack.c.l.b16 %v3137_v61 }
 0x30d   : > { %2909 = vrot.lane.b32.xlu2 %v7095_v9, %s4473_s4  ;;  %v3313_v48 = vpack.c.b16 %v3283_v10, %v3280_v3  ;;  %v7096_v9 = vld [vmem:[#allocation19_spill] sm:$0xff]  ;;  %v3276_v10 = vunpack.c.l.b16 %v3138_v2 }
 0x30e   : > { %v7098_v3 = vld [vmem:[#allocation11_spill] sm:$0xff] }
 0x30f   : > { %v4236_v2 = vld [vmem:[%s6923_s1 + $0x170] sm:$0xff] }
 0x312   : > { %2768 = vmatmul.bf16.gmra.mxu1 %v4241_v30 }
 0x313   : > { %3356 = vrot.lane.b32.xlu1 %v3315_v45, %s4475_s29  ;;  %v3279_v45 = vunpack.c.l.b16 %v3140_v20  ;;  %v4382_v20 = vld [vmem:[%s4545_s25 + $0x50] sm:$0xf] }
 0x314   : > { %2719 = vmatmul.bf16.gmra.mxu0 %v4241_v30  ;;  %3354 = vrot.lane.b32.xlu0 %v3314_v29, %s4475_s29  ;;  %v4381_v30 = vld [vmem:[%s4545_s25 + $0x6c] sm:$0xff]  ;;  %v4242_v29 = vld [vmem:[%s6923_s1 + $0x1a0] sm:$0xff] }
 0x315   : > { %3352 = vrot.lane.b32.xlu2 %v3313_v48, %s4475_s29  ;;  %v3139_v58 = vsel %vm6340_vm14, %v4381_v30, 0  ;;  %v3275_v48 = vunpack.c.h.b16 %v3137_v61  ;;  %v3312_v24 = vpack.c.b16 %v3279_v45, %v3276_v10  ;;  %v3134_v61 = vsel %vm6336_vm13, %v4382_v20, 0  ;;  %v4384_v10 = vld [vmem:[%s4545_s25 + $0x48] sm:$0xff]  ;;  %v2936_v20 = vpop.permute.xlu0 %2935 }
 0x316   : > { %v3278_v19 = vunpack.c.h.b16 %v3139_v58  ;;  %v3133_v45 = vsel %vm6340_vm14, %v4384_v10, 0 }
 0x31a   : > { %2347 = vmatmul.bf16.gmra.mxu3 %v4235_v28 }
 0x31b   : > { %2907 = vrot.lane.b32.xlu1 %v7096_v9, %s4473_s4  ;;  %v3277_v9 = vunpack.c.l.b16 %v3139_v58  ;;  %v4383_v58 = vld [vmem:[%s4545_s25 + $0x5c] sm:$0xf] }
 0x31c   : > { %2905 = vrot.lane.b32.xlu0 %v7097_v47, %s4473_s4  ;;  %2298 = vmatmul.bf16.gmra.mxu2 %v4235_v28  ;;  %v3311_v28 = vpack.c.b16 %v3278_v19, %v3275_v48  ;;  %v3136_v47 = vsel %vm6336_vm13, %v4383_v58, 0  ;;  %v7100_v19 = vld [vmem:[#allocation20_spill] sm:$0xff]  ;;  %v4243_v58 = vld [vmem:[%s6923_s1 + $0x1a8] sm:$0xff] }
 0x31d   : > { %2903 = vrot.lane.b32.xlu2 %v7098_v3, %s4473_s4  ;;  %v3310_v30 = vpack.c.b16 %v3277_v9, %v3274_v52  ;;  %v7099_v3 = vld [vmem:[#allocation22_spill] sm:$0xff]  ;;  %v2934_v52 = vpop.permute.xlu2 %2933  ;;  %v7101_v9 = vld [vmem:[#allocation13_spill] sm:$0xff] }
 0x322   : > { %2773 = vmatmul.bf16.gmra.mxu1 %v4242_v29 }
 0x323   : > { %3350 = vrot.lane.b32.xlu1 %v3312_v24, %s4475_s29  ;;  %v3270_v24 = vunpack.c.l.b16 %v3134_v61 }
 0x324   : > { %2724 = vmatmul.bf16.gmra.mxu0 %v4242_v29  ;;  %3348 = vrot.lane.b32.xlu0 %v3311_v28, %s4475_s29  ;;  %v4385_v29 = vld [vmem:[%s4545_s25 + $0x54] sm:$0xff]  ;;  %v3273_v28 = vunpack.c.l.b16 %v3136_v47 }
 0x325   : > { %3346 = vrot.lane.b32.xlu2 %v3310_v30, %s4475_s29  ;;  %v3135_v48 = vsel %vm6340_vm14, %v4385_v29, 0  ;;  %v2938_v30 = vpop.permute.xlu1 %2937  ;;  %v2954_v29 = vsel %vm2939_vm15, %v2934_v52, %v2936_v20 }
 0x326   : > { %v3272_v10 = vunpack.c.h.b16 %v3135_v48  ;;  %v3271_v37 = vunpack.c.l.b16 %v3135_v48  ;;  %2972 = vmatpush.bf16.msra.mxu2 %v2954_v29  ;;  %v4237_v48 = vld [vmem:[%s6923_s1 + $0x178] sm:$0xff]  ;;  %v4388_v29 = vld [vmem:[%s4545_s25 + $0x30] sm:$0xff] }
 0x32a   : > { %2352 = vmatmul.bf16.gmra.mxu3 %v4236_v2 }
 0x32b   : > { %2901 = vrot.lane.b32.xlu1 %v7099_v3, %s4473_s4  ;;  %v3269_v3 = vunpack.c.h.b16 %v3133_v45 }
 0x32c   : > { %2899 = vrot.lane.b32.xlu0 %v7100_v19, %s4473_s4  ;;  %2303 = vmatmul.bf16.gmra.mxu2 %v4236_v2  ;;  %v2955_v19 = vsel %vm2939_vm15, %v2936_v20, %v2938_v30  ;;  %v3268_v2 = vunpack.c.l.b16 %v3133_v45  ;;  %v2930_v45 = vpop.permute.xlu0 %2929 }
 0x32d   : > { %2897 = vrot.lane.b32.xlu2 %v7101_v9, %s4473_s4  ;;  %3021 = vmatpush.bf16.msra.mxu3 %v2955_v19  ;;  %v3309_v9 = vpack.c.b16 %v3273_v28, %v3270_v24  ;;  %v3308_v61 = vpack.c.b16 %v3272_v10, %v3269_v3  ;;  %v2932_v52 = vpop.permute.xlu1 %2931  ;;  %v2928_v24 = vpop.permute.xlu2 %2927  ;;  %v7102_v10 = vld [vmem:[#allocation23_spill] sm:$0xff]  ;;  %v3129_v19 = vsel %vm6340_vm14, %v4388_v29, 0 }
 0x32e   : > { %v3307_v47 = vpack.c.b16 %v3271_v37, %v3268_v2  ;;  %v2952_v28 = vsel %vm2939_vm15, %v2928_v24, %v2930_v45  ;;  %v2953_v30 = vsel %vm2939_vm15, %v2930_v45, %v2932_v52  ;;  %v4386_v37 = vld [vmem:[%s4545_s25 + $0x38] sm:$0xf]  ;;  %v4389_v2 = vld [vmem:[%s4545_s25 + $0x3c] sm:$0xff]  ;;  %v4244_v24 = vld [vmem:[%s6923_s1 + $0x1b0] sm:$0xff] }
 0x32f   : > { %2973 = vmatpush.bf16.msra.mxu2 %v2952_v28  ;;  %v3130_v20 = vsel %vm6336_vm13, %v4386_v37, 0  ;;  %v3263_v28 = vunpack.c.h.b16 %v3129_v19 }
 0x330   : > { %v3264_v52 = vunpack.c.l.b16 %v3130_v20 }
 0x331   : > { %3022 = vmatpush.bf16.msra.mxu3 %v2953_v30 }
 0x332   : > { %2778 = vmatmul.bf16.gmra.mxu1 %v4243_v58 }
 0x333   : > { %3344 = vrot.lane.b32.xlu1 %v3309_v9, %s4475_s29  ;;  %v3131_v9 = vsel %vm6340_vm14, %v4389_v2, 0 }
 0x334   : > { %2729 = vmatmul.bf16.gmra.mxu0 %v4243_v58  ;;  %3342 = vrot.lane.b32.xlu0 %v3308_v61, %s4475_s29  ;;  %v4387_v58 = vld [vmem:[%s4545_s25 + $0x44] sm:$0xf]  ;;  %v3266_v30 = vunpack.c.h.b16 %v3131_v9  ;;  %v3265_v29 = vunpack.c.l.b16 %v3131_v9  ;;  %v4392_v9 = vld [vmem:[%s4545_s25 + $0x18] sm:$0xff] }
 0x335   : > { %3340 = vrot.lane.b32.xlu2 %v3307_v47, %s4475_s29  ;;  %v3132_v3 = vsel %vm6336_vm13, %v4387_v58, 0  ;;  %v7103_v61 = vld [vmem:[#allocation21_spill] sm:$0xff]  ;;  %v7104_v47 = vld [vmem:[#allocation16_spill] sm:$0xff]  ;;  %v2926_v37 = vpop.permute.xlu1 %2925  ;;  %v2924_v58 = vpop.permute.xlu0 %2923 }
 0x336   : > { %v3267_v45 = vunpack.c.l.b16 %v3132_v3  ;;  %v2951_v20 = vsel %vm2939_vm15, %v2924_v58, %v2926_v37  ;;  %v3305_v3 = vpack.c.b16 %v3266_v30, %v3263_v28  ;;  %v6526_v30 = vpop.f32.mrf.mxu3  ;;  %v3261_v37 = vunpack.c.l.b16 %v3128_v59 }
 0x337   : > { %3023 = vmatpush.bf16.msra.mxu3 %v2951_v20  ;;  %7105 = vst [vmem:[#allocation24_spill] sm:$0xff] %v6526_v30 }
 0x338   : > { %v3306_v2 = vpack.c.b16 %v3267_v45, %v3264_v52  ;;  %v3125_v52 = vsel %vm6340_vm14, %v4392_v9, 0  ;;  %v4393_v45 = vld [vmem:[%s4545_s25 + $0x24] sm:$0xff] }
 0x339   : > { %v3127_v28 = vsel %vm6340_vm14, %v4393_v45, 0  ;;  %v4397_v45 = vld [vmem:[%s4545_s25 + $0xc] sm:$0xff] }
 0x33a   : > { %2357 = vmatmul.bf16.gmra.mxu3 %v4237_v48 }
 0x33b   : > { %2895 = vrot.lane.b32.xlu1 %v7102_v10, %s4473_s4  ;;  %v3262_v10 = vunpack.c.l.b16 %v3129_v19 }
 0x33c   : > { %2893 = vrot.lane.b32.xlu0 %v7103_v61, %s4473_s4  ;;  %2308 = vmatmul.bf16.gmra.mxu2 %v4237_v48  ;;  %v2922_v48 = vpop.permute.xlu2 %2921 }
 0x33d   : > { %2891 = vrot.lane.b32.xlu2 %v7104_v47, %s4473_s4  ;;  %v2950_v61 = vsel %vm2939_vm15, %v2922_v48, %v2924_v58  ;;  %v4390_v47 = vld [vmem:[%s4545_s25 + $0x20] sm:$0xf]  ;;  %v3304_v19 = vpack.c.b16 %v3265_v29, %v3262_v10  ;;  %v3257_v58 = vunpack.c.h.b16 %v3125_v52  ;;  %v3260_v10 = vunpack.c.h.b16 %v3127_v28  ;;  %v6529_v29 = vpop.f32.mrf.mxu2  ;;  %s6777_s4 = scalar_lea.vmem [#allocation2], %s3647_s6 }
 0x33e   : > { %v3126_v26 = vsel %vm6336_vm13, %v4390_v47, 0  ;;  %2974 = vmatpush.bf16.msra.mxu2 %v2950_v61  ;;  %7106 = vst [vmem:[#allocation25_spill] sm:$0xff] %v6529_v29  ;;  %v3256_v48 = vunpack.c.l.b16 %v3125_v52  ;;  %v4394_v47 = vld [vmem:[%s4545_s25 + $0x8] sm:$0xf]  ;;  %v3123_v52 = vsel %vm6340_vm14, %v4397_v45, 0  ;;  %v6560_v45 = vpop.f32.mrf.mxu0  ;;  %s3578_s13 = sshll.u32 %s6777_s4, 4  ;;  %s3579_s13 = int_to_ptr.vmem [resolvable:$true] %s3578_s13 }
 0x33f   : > { %v3258_v44 = vunpack.c.l.b16 %v3126_v26  ;;  %v3302_v20 = vpack.c.b16 %v3260_v10, %v3257_v58  ;;  %v4396_v26 = vld [vmem:[%s4545_s25] sm:$0xff]  ;;  %v4245_v58 = vld [vmem:[%s6923_s1 + $0x1b8] sm:$0xff]  ;;  %v3253_v6 = vunpack.c.l.b16 %v3123_v52  ;;  %7108 = vst [vmem:[#allocation6_spill] sm:$0xff] %v6560_v45 }
 0x340   : > { %v3121_v9 = vsel %vm6340_vm14, %v4396_v26, 0  ;;  %v6558_v26 = vpop.f32.mrf.mxu1 }
 0x341   : > { %v3303_v61 = vpack.c.b16 %v3261_v37, %v3258_v44  ;;  %v3251_v10 = vunpack.c.h.b16 %v3121_v9  ;;  %7107 = vst [vmem:[#allocation15_spill] sm:$0xff] %v6558_v26 }
 0x342   : > { %2783 = vmatmul.bf16.gmra.mxu1 %v4244_v24 }
 0x343   : > { %3338 = vrot.lane.b32.xlu1 %v3306_v2, %s4475_s29  ;;  %v3259_v2 = vunpack.c.l.b16 %v3127_v28 }
 0x344   : > { %2734 = vmatmul.bf16.gmra.mxu0 %v4244_v24  ;;  %3336 = vrot.lane.b32.xlu0 %v3305_v3, %s4475_s29  ;;  %v3122_v24 = vsel %vm6336_vm13, %v4394_v47, 0  ;;  %v4395_v3 = vld [vmem:[%s4545_s25 + $0x14] sm:$0xf]  ;;  %v3250_v47 = vunpack.c.l.b16 %v3121_v9 }
 0x345   : > { %3334 = vrot.lane.b32.xlu2 %v3304_v19, %s4475_s29  ;;  %v3124_v19 = vsel %vm6336_vm13, %v4395_v3, 0  ;;  %v3301_v59 = vpack.c.b16 %v3259_v2, %v3256_v48  ;;  %v3252_v44 = vunpack.c.l.b16 %v3122_v24  ;;  %v3254_v48 = vunpack.c.h.b16 %v3123_v52 }
 0x346   : > { %v3255_v37 = vunpack.c.l.b16 %v3124_v19  ;;  %v3298_v24 = vpack.c.b16 %v3253_v6, %v3250_v47 }
 0x34b   : > { %3332 = vrot.lane.b32.xlu1 %v3303_v61, %s4475_s29 }
 0x34c   : > { %3330 = vrot.lane.b32.xlu0 %v3302_v20, %s4475_s29  ;;  %v3300_v20 = vpack.c.b16 %v3255_v37, %v3252_v44 }
 0x34d   : > { %3328 = vrot.lane.b32.xlu2 %v3301_v59, %s4475_s29  ;;  %v2323_v28 = vpop.f32.mrf.mxu3  ;;  %v3299_v59 = vpack.c.b16 %v3254_v48, %v3251_v10 }
 0x34e   : > { %v2364_v51 = vadd.f32 %v2323_v28, %v6197_v40 }
 0x34f   : > { %v3365_v2 = vpop.permute.xlu2 %3364  ;;  %v2274_v61 = vpop.f32.mrf.mxu2 }
 0x350   : > { %v2363_v3 = vadd.f32 %v2274_v61, %v6210_v56 }
 0x352   : > { %2788 = vmatmul.bf16.gmra.mxu1 %v4245_v58 }
 0x353   : > { %3326 = vrot.lane.b32.xlu1 %v3300_v20, %s4475_s29 }
 0x354   : > { %2739 = vmatmul.bf16.gmra.mxu0 %v4245_v58  ;;  %3324 = vrot.lane.b32.xlu0 %v3299_v59, %s4475_s29 }
 0x355   : > { %3322 = vrot.lane.b32.xlu2 %v3298_v24, %s4475_s29  ;;  %v6554_v40 = vpop.f32.mrf.mxu3 }
 0x357   : > { %v6556_v19 = vpop.f32.mrf.mxu2  ;;  %v2916_v9 = vpop.permute.xlu2 %2915 }
 0x35d   : > { %v2328_v56 = vpop.f32.mrf.mxu3 }
 0x35e   : > { %v2368_v52 = vadd.f32 %v2328_v56, %v6220_v63 }
 0x35f   : > { %v2279_v28 = vpop.f32.mrf.mxu2  ;;  %v2754_v37 = vpop.f32.mrf.mxu1 }
 0x360   : > { %v2367_v44 = vadd.f32 %v2279_v28, %v6231_v14  ;;  %v6564_v58 = vadd.f32 %v2754_v37, %v2364_v51  ;;  %v3359_v48 = vpop.permute.xlu2 %3358 }
 0x361   : > { %v2705_v10 = vpop.f32.mrf.mxu0 }
 0x362   : > { %v6566_v61 = vadd.f32 %v2705_v10, %v2363_v3 }
 0x365   : > { %v3369_v47 = vpop.permute.xlu1 %3368  ;;  %v6568_v6 = vpop.f32.mrf.mxu3 }
 0x366   : > { %7109 = vst [vmem:[#allocation7_spill] sm:$0xff] %v6568_v6  ;;  %v3367_v20 = vpop.permute.xlu0 %3366 }
 0x367   : > { %v3385_v59 = vsel %vm3370_vm0, %v3365_v2, %v3367_v20  ;;  %v3386_v24 = vsel %vm3370_vm0, %v3367_v20, %v3369_v47  ;;  %v6572_v63 = vpop.f32.mrf.mxu2  ;;  %v6574_v56 = vpop.f32.mrf.mxu1 }
 0x368   : > { %7110 = vst [vmem:[#allocation17_spill] sm:$0xff] %v6572_v63  ;;  %3403 = vmatpush.bf16.msra.mxu0 %v3385_v59  ;;  %3452 = vmatpush.bf16.msra.mxu1 %v3386_v24  ;;  %v2910_v51 = vpop.permute.xlu2 %2909 }
 0x369   : > { %v6576_v14 = vpop.f32.mrf.mxu0 }
 0x36d   : > { %v2920_v3 = vpop.permute.xlu1 %2919  ;;  %v2333_v28 = vpop.f32.mrf.mxu3 }
 0x36e   : > { %v2918_v37 = vpop.permute.xlu0 %2917  ;;  %v2372_v10 = vadd.f32 %v2333_v28, %v6241_v13 }
 0x36f   : > { %v2284_v45 = vpop.f32.mrf.mxu2  ;;  %v2948_v26 = vsel %vm2939_vm15, %v2916_v9, %v2918_v37  ;;  %v2949_v2 = vsel %vm2939_vm15, %v2918_v37, %v2920_v3  ;;  %v2759_v20 = vpop.f32.mrf.mxu1 }
 0x370   : > { %v2371_v47 = vadd.f32 %v2284_v45, %v6252_v60  ;;  %2975 = vmatpush.bf16.msra.mxu2 %v2948_v26  ;;  %3024 = vmatpush.bf16.msra.mxu3 %v2949_v2  ;;  %v6582_v59 = vadd.f32 %v2759_v20, %v2368_v52  ;;  %v3353_v6 = vpop.permute.xlu2 %3352 }
 0x371   : > { %v2710_v24 = vpop.f32.mrf.mxu0 }
 0x372   : > { %v6584_v30 = vadd.f32 %v2710_v24, %v2367_v44 }
 0x375   : > { %v3363_v29 = vpop.permute.xlu1 %3362  ;;  %v6586_v63 = vpop.f32.mrf.mxu3 }
 0x376   : > { %7111 = vst [vmem:[#allocation8_spill] sm:$0xff] %v6586_v63  ;;  %v3361_v13 = vpop.permute.xlu0 %3360 }
 0x377   : > { %v6588_v28 = vpop.f32.mrf.mxu2  ;;  %v3383_v9 = vsel %vm3370_vm0, %v3359_v48, %v3361_v13  ;;  %v3384_v3 = vsel %vm3370_vm0, %v3361_v13, %v3363_v29  ;;  %v6592_v60 = vpop.f32.mrf.mxu1 }
 0x378   : > { %7112 = vst [vmem:[#allocation9_spill] sm:$0xff] %v6588_v28  ;;  %3404 = vmatpush.bf16.msra.mxu0 %v3383_v9  ;;  %3453 = vmatpush.bf16.msra.mxu1 %v3384_v3  ;;  %v2904_v28 = vpop.permute.xlu2 %2903 }
 0x379   : > { %v6594_v26 = vpop.f32.mrf.mxu0 }
 0x37a   : > { %7113 = vst [vmem:[#allocation19_spill] sm:$0xff] %v6594_v26 }
 0x37d   : > { %v2914_v45 = vpop.permute.xlu1 %2913  ;;  %v2338_v52 = vpop.f32.mrf.mxu3 }
 0x37e   : > { %v2912_v44 = vpop.permute.xlu0 %2911  ;;  %v2376_v37 = vadd.f32 %v2338_v52, %v6262_v17 }
 0x37f   : > { %v2289_v2 = vpop.f32.mrf.mxu2  ;;  %v2946_v20 = vsel %vm2939_vm15, %v2910_v51, %v2912_v44  ;;  %v2947_v24 = vsel %vm2939_vm15, %v2912_v44, %v2914_v45  ;;  %v2764_v29 = vpop.f32.mrf.mxu1 }
 0x380   : > { %v2375_v48 = vadd.f32 %v2289_v2, %v6273_v15  ;;  %2976 = vmatpush.bf16.msra.mxu2 %v2946_v20  ;;  %3025 = vmatpush.bf16.msra.mxu3 %v2947_v24  ;;  %v6600_v13 = vadd.f32 %v2764_v29, %v2372_v10  ;;  %v3347_v10 = vpop.permute.xlu2 %3346 }
 0x381   : > { %v2715_v9 = vpop.f32.mrf.mxu0 }
 0x382   : > { %7114 = vst [vmem:[#allocation10_spill] sm:$0xff] %v6600_v13  ;;  %v6602_v3 = vadd.f32 %v2715_v9, %v2371_v47 }
 0x384   : > { %7115 = vst [vmem:[#allocation11_spill] sm:$0xff] %v6602_v3 }
 0x385   : > { %v3357_v63 = vpop.permute.xlu1 %3356  ;;  %v6604_v26 = vpop.f32.mrf.mxu3 }
 0x386   : > { %7116 = vst [vmem:[#allocation22_spill] sm:$0xff] %v6604_v26  ;;  %v3355_v17 = vpop.permute.xlu0 %3354 }
 0x387   : > { %v6606_v52 = vpop.f32.mrf.mxu2  ;;  %v3381_v51 = vsel %vm3370_vm0, %v3353_v6, %v3355_v17  ;;  %v3382_v45 = vsel %vm3370_vm0, %v3355_v17, %v3357_v63  ;;  %v6610_v44 = vpop.f32.mrf.mxu1 }
 0x388   : > { %7117 = vst [vmem:[#allocation20_spill] sm:$0xff] %v6606_v52  ;;  %3405 = vmatpush.bf16.msra.mxu0 %v3381_v51  ;;  %3454 = vmatpush.bf16.msra.mxu1 %v3382_v45  ;;  %v2898_v26 = vpop.permute.xlu2 %2897 }
 0x389   : > { %7118 = vst [vmem:[#allocation13_spill] sm:$0xff] %v6610_v44  ;;  %v6612_v15 = vpop.f32.mrf.mxu0 }
 0x38a   : > { %7119 = vst [vmem:[#allocation23_spill] sm:$0xff] %v6612_v15 }
 0x38d   : > { %v2908_v2 = vpop.permute.xlu1 %2907  ;;  %v2343_v47 = vpop.f32.mrf.mxu3 }
 0x38e   : > { %v2906_v20 = vpop.permute.xlu0 %2905  ;;  %v2380_v24 = vadd.f32 %v2343_v47, %v6286_v27 }
 0x38f   : > { %v2294_v29 = vpop.f32.mrf.mxu2  ;;  %v2944_v9 = vsel %vm2939_vm15, %v2904_v28, %v2906_v20  ;;  %v2945_v52 = vsel %vm2939_vm15, %v2906_v20, %v2908_v2  ;;  %v2769_v63 = vpop.f32.mrf.mxu1 }
 0x390   : > { %v2379_v6 = vadd.f32 %v2294_v29, %v6297_v62  ;;  %2977 = vmatpush.bf16.msra.mxu2 %v2944_v9  ;;  %3026 = vmatpush.bf16.msra.mxu3 %v2945_v52  ;;  %v6618_v17 = vadd.f32 %v2769_v63, %v2376_v37  ;;  %v7123_v37 = vld [vmem:[#allocation18_spill] sm:$0xff]  ;;  %v7124_v52 = vld [vmem:[#allocation52_spill] sm:$0xff]  ;;  %v7126_v63 = vld [vmem:[#allocation49_spill] sm:$0xff] }
 0x391   : > { %v2720_v51 = vpop.f32.mrf.mxu0  ;;  %v800_v20 = vadd.f32 %v7124_v52, %v7123_v37  ;;  %v7125_v9 = vld [vmem:[#allocation26_spill] sm:$0xff] }
 0x392   : > { %7120 = vst [vmem:[#allocation21_spill] sm:$0xff] %v6618_v17  ;;  %v6620_v45 = vadd.f32 %v2720_v51, %v2375_v48  ;;  %v751_v51 = vadd.f32 %v7126_v63, %v7125_v9  ;;  %v3341_v17 = vpop.permute.xlu2 %3340 }
 0x393   : > { %v1243_v37 = vadd.f32 %v5973_v38, %v800_v20 }
 0x394   : > { %7121 = vst [vmem:[#allocation16_spill] sm:$0xff] %v6620_v45  ;;  %v1242_v9 = vadd.f32 %v6069_v31, %v751_v51  ;;  %v7127_v51 = vld [vmem:[#allocation28_spill] sm:$0xff] }
 0x395   : > { %v3351_v15 = vpop.permute.xlu1 %3350  ;;  %v2345_v44 = vpop.f32.mrf.mxu3 }
 0x396   : > { %v3349_v13 = vpop.permute.xlu0 %3348 }
 0x397   : > { %v2296_v27 = vpop.f32.mrf.mxu2  ;;  %v3379_v47 = vsel %vm3370_vm0, %v3347_v10, %v3349_v13  ;;  %v3380_v28 = vsel %vm3370_vm0, %v3349_v13, %v3351_v15  ;;  %v6624_v2 = vpop.f32.mrf.mxu1 }
 0x398   : > { %3406 = vmatpush.bf16.msra.mxu0 %v3379_v47  ;;  %3455 = vmatpush.bf16.msra.mxu1 %v3380_v28 }
 0x399   : > { %v6626_v62 = vpop.f32.mrf.mxu0 }
 0x39a   : > { %7122 = vst [vmem:[#allocation70_spill] sm:$0xff] %v6626_v62  ;;  %v2892_v31 = vpop.permute.xlu2 %2891 }
 0x39d   : > { %v2902_v48 = vpop.permute.xlu1 %2901  ;;  %v2348_v29 = vpop.f32.mrf.mxu3 }
 0x39e   : > { %v2900_v45 = vpop.permute.xlu0 %2899  ;;  %v2384_v10 = vadd.f32 %v2348_v29, %v6310_v49  ;;  %v1675_v49 = vadd.f32 %v6264_v5, %v1243_v37  ;;  %v7129_v37 = vld [vmem:[#allocation54_spill] sm:$0xff] }
 0x39f   : > { %v2299_v3 = vpop.f32.mrf.mxu2  ;;  %v2942_v13 = vsel %vm2939_vm15, %v2898_v26, %v2900_v45  ;;  %v2943_v15 = vsel %vm2939_vm15, %v2900_v45, %v2902_v48  ;;  %v2774_v28 = vpop.f32.mrf.mxu1  ;;  %v1674_v26 = vadd.f32 %v6245_v32, %v1242_v9 }
 0x3a0   : > { %v2383_v47 = vadd.f32 %v2299_v3, %v6322_v57  ;;  %2978 = vmatpush.bf16.msra.mxu2 %v2942_v13  ;;  %3027 = vmatpush.bf16.msra.mxu3 %v2943_v15  ;;  %v6637_v52 = vadd.f32 %v2774_v28, %v2380_v24  ;;  %v1951_v45 = vadd.f32 %v6293_v4, %v1675_v49  ;;  %v7128_v28 = vld [vmem:[#allocation27_spill] sm:$0xff] }
 0x3a1   : > { %v2725_v62 = vpop.f32.mrf.mxu0  ;;  %v1950_v3 = vadd.f32 %v6307_v1, %v1674_v26  ;;  %v805_v1 = vadd.f32 %v5981_v18, %v7127_v51 }
 0x3a2   : > { %v6640_v63 = vadd.f32 %v2725_v62, %v2379_v6  ;;  %v2382_v13 = vadd.f32 %v2345_v44, %v1951_v45 }
 0x3a3   : > { %v2381_v6 = vadd.f32 %v2296_v27, %v1950_v3 }
 0x3a5   : > { %v3345_v48 = vpop.permute.xlu1 %3344  ;;  %v2350_v57 = vpop.f32.mrf.mxu3 }
 0x3a6   : > { %v3343_v29 = vpop.permute.xlu0 %3342 }
 0x3a7   : > { %v2301_v38 = vpop.f32.mrf.mxu2  ;;  %v3377_v24 = vsel %vm3370_vm0, %v3341_v17, %v3343_v29  ;;  %v3378_v20 = vsel %vm3370_vm0, %v3343_v29, %v3345_v48  ;;  %v2776_v62 = vpop.f32.mrf.mxu1  ;;  %v756_v17 = vadd.f32 %v7129_v37, %v7128_v28  ;;  %v4246_v48 = vld [vmem:[%s6923_s1 + $0x1c0] sm:$0xff]  ;;  %v1247_v29 = vadd.f32 %v6041_v46, %v805_v1 }
 0x3a8   : > { %3407 = vmatpush.bf16.msra.mxu0 %v3377_v24  ;;  %3456 = vmatpush.bf16.msra.mxu1 %v3378_v20  ;;  %v6648_v5 = vadd.f32 %v2776_v62, %v2382_v13  ;;  %v3335_v20 = vpop.permute.xlu2 %3334 }
 0x3a9   : > { %v2727_v32 = vpop.f32.mrf.mxu0 }
 0x3aa   : > { %v6650_v4 = vadd.f32 %v2727_v32, %v2381_v6  ;;  %v1679_v6 = vadd.f32 %v6288_v36, %v1247_v29 }
 0x3ad   : > { %v2896_v15 = vpop.permute.xlu1 %2895  ;;  %v2353_v44 = vpop.f32.mrf.mxu3 }
 0x3ae   : > { %v2894_v9 = vpop.permute.xlu0 %2893  ;;  %v2388_v49 = vadd.f32 %v2353_v44, %v6330_v0  ;;  %v1246_v0 = vadd.f32 %v6126_v54, %v756_v17  ;;  %v7130_v17 = vld [vmem:[#allocation30_spill] sm:$0xff] }
 0x3af   : > { %v2304_v27 = vpop.f32.mrf.mxu2  ;;  %v2940_v26 = vsel %vm2939_vm15, %v2892_v31, %v2894_v9  ;;  %v2941_v45 = vsel %vm2939_vm15, %v2894_v9, %v2896_v15  ;;  %v2779_v18 = vpop.f32.mrf.mxu1 }
 0x3b0   : > { %v2387_v3 = vadd.f32 %v2304_v27, %v6362_v8  ;;  %2979 = vmatpush.bf16.msra.mxu2 %v2940_v26  ;;  %3028 = vmatpush.bf16.msra.mxu3 %v2941_v45  ;;  %v6664_v13 = vadd.f32 %v2779_v18, %v2384_v10  ;;  %v1678_v62 = vadd.f32 %v6266_v43, %v1246_v0  ;;  %v7131_v27 = vld [vmem:[#allocation14_spill] sm:$0xff] }
 0x3b1   : > { %v2730_v24 = vpop.f32.mrf.mxu0  ;;  %v1955_v8 = vadd.f32 %v6318_v34, %v1679_v6  ;;  %v3329_v34 = vpop.permute.xlu2 %3328  ;;  %v761_v26 = vadd.f32 %v6001_v12, %v7131_v27  ;;  %v4251_v27 = vld [vmem:[%s6923_s1 + $0x1e8] sm:$0xff] }
 0x3b2   : > { %v6667_v31 = vadd.f32 %v2730_v24, %v2383_v47  ;;  %v1954_v46 = vadd.f32 %v6328_v16, %v1678_v62  ;;  %v810_v16 = vadd.f32 %v6065_v55, %v7130_v17  ;;  %v4247_v24 = vld [vmem:[%s6923_s1 + $0x1c8] sm:$0xff]  ;;  %v4249_v17 = vld [vmem:[%s6923_s1 + $0x1d8] sm:$0xff] }
 0x3b3   : > { %2980 = vmatmul.bf16.vlgmr.msra.gmra.mxu2 %v4246_v48  ;;  %3029 = vmatmul.bf16.vlgmr.msra.gmra.mxu3 %v4246_v48  ;;  %v2386_v1 = vadd.f32 %v2350_v57, %v1955_v8 }
 0x3b4   : > { %v2385_v44 = vadd.f32 %v2301_v38, %v1954_v46 }
 0x3b5   : > { %v3339_v32 = vpop.permute.xlu1 %3338  ;;  %v2355_v51 = vpop.f32.mrf.mxu3 }
 0x3b6   : > { %v3337_v10 = vpop.permute.xlu0 %3336 }
 0x3b7   : > { %v2306_v15 = vpop.f32.mrf.mxu2  ;;  %v3375_v54 = vsel %vm3370_vm0, %v3335_v20, %v3337_v10  ;;  %v3376_v47 = vsel %vm3370_vm0, %v3337_v10, %v3339_v32  ;;  %v2781_v28 = vpop.f32.mrf.mxu1  ;;  %v1251_v20 = vadd.f32 %v6096_v53, %v810_v16  ;;  %v4256_v16 = vld [vmem:[%s6923_s1 + $0x210] sm:$0xff] }
 0x3b8   : > { %3408 = vmatpush.bf16.msra.mxu0 %v3375_v54  ;;  %3457 = vmatpush.bf16.msra.mxu1 %v3376_v47  ;;  %v6675_v36 = vadd.f32 %v2781_v28, %v2386_v1 }
 0x3b9   : > { %v2732_v43 = vpop.f32.mrf.mxu0  ;;  %v1683_v8 = vadd.f32 %v6312_v42, %v1251_v20  ;;  %v3323_v1 = vpop.permute.xlu2 %3322  ;;  %v4254_v42 = vld [vmem:[%s6923_s1 + $0x200] sm:$0xff]  ;;  %v4261_v20 = vld [vmem:[%s6923_s1 + $0x238] sm:$0xff] }
 0x3ba   : > { %v6677_v37 = vadd.f32 %v2732_v43, %v2385_v44 }
 0x3bd   : > { %v3333_v9 = vpop.permute.xlu1 %3332  ;;  %v2358_v57 = vpop.f32.mrf.mxu3 }
 0x3be   : > { %v3331_v45 = vpop.permute.xlu0 %3330  ;;  %v2392_v38 = vadd.f32 %v2358_v57, %v6372_v7  ;;  %v1250_v7 = vadd.f32 %v6159_v41, %v761_v26  ;;  %v4257_v57 = vld [vmem:[%s6923_s1 + $0x218] sm:$0xff]  ;;  %v4258_v26 = vld [vmem:[%s6923_s1 + $0x220] sm:$0xff] }
 0x3bf   : > { %v2309_v48 = vpop.f32.mrf.mxu2  ;;  %v3373_v18 = vsel %vm3370_vm0, %v3329_v34, %v3331_v45  ;;  %v3374_v29 = vsel %vm3370_vm0, %v3331_v45, %v3333_v9  ;;  %v2784_v55 = vpop.f32.mrf.mxu1  ;;  %v4250_v9 = vld [vmem:[%s6923_s1 + $0x1e0] sm:$0xff]  ;;  %v4252_v45 = vld [vmem:[%s6923_s1 + $0x1f0] sm:$0xff] }
 0x3c0   : > { %v2391_v0 = vadd.f32 %v2309_v48, %v6396_v35  ;;  %3409 = vmatpush.bf16.msra.mxu0 %v3373_v18  ;;  %3458 = vmatpush.bf16.msra.mxu1 %v3374_v29  ;;  %v6691_v12 = vadd.f32 %v2784_v55, %v2388_v49  ;;  %v1682_v32 = vadd.f32 %v6290_v11, %v1250_v7  ;;  %v4253_v48 = vld [vmem:[%s6923_s1 + $0x1f8] sm:$0xff]  ;;  %v4260_v18 = vld [vmem:[%s6923_s1 + $0x230] sm:$0xff] }
 0x3c1   : > { %v2735_v6 = vpop.f32.mrf.mxu0  ;;  %v1959_v35 = vadd.f32 %v6359_v33, %v1683_v8  ;;  %v7132_v8 = vld [vmem:[#allocation33_spill] sm:$0xff] }
 0x3c2   : > { %v6694_v62 = vadd.f32 %v2735_v6, %v2387_v3  ;;  %v1958_v10 = vadd.f32 %v6370_v25, %v1682_v32  ;;  %v4248_v25 = vld [vmem:[%s6923_s1 + $0x1d0] sm:$0xff] }
 0x3c3   : > { %2985 = vmatmul.bf16.gmra.mxu2 %v4247_v24  ;;  %3034 = vmatmul.bf16.gmra.mxu3 %v4247_v24  ;;  %v2390_v49 = vadd.f32 %v2355_v51, %v1959_v35  ;;  %v7133_v32 = vld [vmem:[#allocation35_spill] sm:$0xff] }
 0x3c4   : > { %v2389_v3 = vadd.f32 %v2306_v15, %v1958_v10  ;;  %v4255_v15 = vld [vmem:[%s6923_s1 + $0x208] sm:$0xff]  ;;  %v731_v35 = vadd.f32 %v7133_v32, %v7132_v8  ;;  %v7135_v10 = vld [vmem:[#allocation39_spill] sm:$0xff] }
 0x3c5   : > { %v3327_v46 = vpop.permute.xlu1 %3326  ;;  %v6749_v29 = vpop.f32.mrf.mxu3 }
 0x3c6   : > { %v3325_v53 = vpop.permute.xlu0 %3324 }
 0x3c7   : > { %v3371_v54 = vsel %vm3370_vm0, %v3323_v1, %v3325_v53  ;;  %v3372_v41 = vsel %vm3370_vm0, %v3325_v53, %v3327_v46  ;;  %v2786_v47 = vpop.f32.mrf.mxu1  ;;  %v6751_v24 = vpop.f32.mrf.mxu2  ;;  %v7134_v46 = vld [vmem:[#allocation29_spill] sm:$0xff] }
 0x3c8   : > { %3410 = vmatpush.bf16.msra.mxu0 %v3371_v54  ;;  %3459 = vmatpush.bf16.msra.mxu1 %v3372_v41  ;;  %v6705_v11 = vadd.f32 %v2786_v47, %v2390_v49  ;;  %v780_v1 = vadd.f32 %v7135_v10, %v7134_v46  ;;  %v7136_v54 = vld [vmem:[#allocation44_spill] sm:$0xff]  ;;  %v7142_v46 = vld [vmem:[#allocation46_spill] sm:$0xff] }
 0x3c9   : > { %v2737_v33 = vpop.f32.mrf.mxu0 }
 0x3ca   : > { %v6707_v44 = vadd.f32 %v2737_v33, %v2389_v3  ;;  %v1227_v41 = vadd.f32 %v7136_v54, %v780_v1  ;;  %v7143_v1 = vld [vmem:[#allocation51_spill] sm:$0xff] }
 0x3cb   : > { %3411 = vmatmul.bf16.vlgmr.msra.gmra.mxu0 %v4254_v42  ;;  %3460 = vmatmul.bf16.vlgmr.msra.gmra.mxu1 %v4254_v42  ;;  %v7137_v42 = vld [vmem:[#allocation47_spill] sm:$0xff] }
 0x3cc   : > { %v1226_v3 = vadd.f32 %v7137_v42, %v731_v35  ;;  %v7144_v42 = vld [vmem:[#allocation60_spill] sm:$0xff] }
 0x3cf   : > { %v2789_v51 = vpop.f32.mrf.mxu1 }
 0x3d0   : > { %v6712_v28 = vadd.f32 %v2789_v51, %v2392_v38  ;;  %v4259_v38 = vld [vmem:[%s6923_s1 + $0x228] sm:$0xff]  ;;  %v1659_v51 = vadd.f32 %v6167_v22, %v1227_v41 }
 0x3d1   : > { %v2740_v43 = vpop.f32.mrf.mxu0 }
 0x3d2   : > { %v6714_v34 = vadd.f32 %v2740_v43, %v2391_v0 }
 0x3d3   : > { %2990 = vmatmul.bf16.gmra.mxu2 %v4248_v25  ;;  %3039 = vmatmul.bf16.gmra.mxu3 %v4248_v25  ;;  %v1658_v25 = vadd.f32 %v6137_v39, %v1226_v3 }
 0x3d7   : > { %v6760_v53 = vpop.f32.mrf.mxu1 }
 0x3d9   : > { %v6762_v49 = vpop.f32.mrf.mxu0 }
 0x3db   : > { %3416 = vmatmul.bf16.gmra.mxu0 %v4255_v15  ;;  %3465 = vmatmul.bf16.gmra.mxu1 %v4255_v15 }
 0x3e3   : > { %2995 = vmatmul.bf16.gmra.mxu2 %v4249_v17  ;;  %3044 = vmatmul.bf16.gmra.mxu3 %v4249_v17 }
 0x3eb   : > { %3421 = vmatmul.bf16.gmra.mxu0 %v4256_v16  ;;  %3470 = vmatmul.bf16.gmra.mxu1 %v4256_v16 }
 0x3f3   : > { %3000 = vmatmul.bf16.gmra.mxu2 %v4250_v9  ;;  %3049 = vmatmul.bf16.gmra.mxu3 %v4250_v9  ;;  %v1935_v9 = vadd.f32 %v6206_v23, %v1659_v51 }
 0x3fb   : > { %3426 = vmatmul.bf16.gmra.mxu0 %v4257_v57  ;;  %3475 = vmatmul.bf16.gmra.mxu1 %v4257_v57  ;;  %v1934_v57 = vadd.f32 %v6217_v21, %v1658_v25 }
 0x403   : > { %3005 = vmatmul.bf16.gmra.mxu2 %v4251_v27  ;;  %3054 = vmatmul.bf16.gmra.mxu3 %v4251_v27 }
 0x40b   : > { %3431 = vmatmul.bf16.gmra.mxu0 %v4258_v26  ;;  %3480 = vmatmul.bf16.gmra.mxu1 %v4258_v26 }
 0x413   : > { %3010 = vmatmul.bf16.gmra.mxu2 %v4252_v45  ;;  %3059 = vmatmul.bf16.gmra.mxu3 %v4252_v45  ;;  %v2366_v45 = vadd.f32 %v6554_v40, %v1935_v9  ;;  %v7140_v40 = vld [vmem:[#allocation32_spill] sm:$0xff] }
 0x415   : > { %v2797_v39 = vadd.f32 %v6574_v56, %v2366_v45  ;;  %v7148_v45 = vld [vmem:[#allocation17_spill] sm:$0xff] }
 0x41b   : > { %3436 = vmatmul.bf16.gmra.mxu0 %v4259_v38  ;;  %3485 = vmatmul.bf16.gmra.mxu1 %v4259_v38  ;;  %v2365_v38 = vadd.f32 %v6556_v19, %v1934_v57 }
 0x41d   : > { %v2796_v22 = vadd.f32 %v6576_v14, %v2365_v38 }
 0x423   : > { %3015 = vmatmul.bf16.gmra.mxu2 %v4253_v48  ;;  %3064 = vmatmul.bf16.gmra.mxu3 %v4253_v48 }
 0x42b   : > { %3441 = vmatmul.bf16.gmra.mxu0 %v4260_v18  ;;  %3490 = vmatmul.bf16.gmra.mxu1 %v4260_v18  ;;  %v7141_v18 = vld [vmem:[#allocation43_spill] sm:$0xff] }
 0x42c   : > { %v785_v19 = vadd.f32 %v7141_v18, %v7140_v40 }
 0x42e   : > { %v1231_v10 = vadd.f32 %v7142_v46, %v785_v19  ;;  %v7155_v46 = vld [vmem:[#allocation55_spill] sm:$0xff] }
 0x430   : > { %v1663_v3 = vadd.f32 %v7144_v42, %v1231_v10  ;;  %v7157_v42 = vld [vmem:[#allocation61_spill] sm:$0xff] }
 0x436   : > { %v2981_v0 = vpop.f32.mrf.mxu2  ;;  %v3030_v55 = vpop.f32.mrf.mxu3 }
 0x437   : > { %v3070_v43 = vadd.f32 %v2981_v0, %v6566_v61  ;;  %v3071_v15 = vadd.f32 %v3030_v55, %v6564_v58  ;;  %v7138_v58 = vld [vmem:[#allocation37_spill] sm:$0xff]  ;;  %v7139_v61 = vld [vmem:[#allocation38_spill] sm:$0xff] }
 0x438   : > { %v736_v48 = vadd.f32 %v7139_v61, %v7138_v58  ;;  %v7152_v61 = vld [vmem:[#allocation36_spill] sm:$0xff] }
 0x43a   : > { %v1230_v56 = vadd.f32 %v7143_v1, %v736_v48  ;;  %v7153_v48 = vld [vmem:[#allocation45_spill] sm:$0xff] }
 0x43b   : > { %3446 = vmatmul.bf16.gmra.mxu0 %v4261_v20  ;;  %3495 = vmatmul.bf16.gmra.mxu1 %v4261_v20  ;;  %v790_v40 = vadd.f32 %v7153_v48, %v7152_v61 }
 0x43c   : > { %v1662_v41 = vadd.f32 %v6175_v50, %v1230_v56  ;;  %v7156_v56 = vld [vmem:[#allocation12_spill] sm:$0xff] }
 0x43e   : > { %v2983_v6 = vpop.f32.mrf.mxu2  ;;  %v3032_v7 = vpop.f32.mrf.mxu3 }
 0x43f   : > { %v3072_v0 = vadd.f32 %v2983_v6, %v2796_v22  ;;  %v3073_v55 = vadd.f32 %v3032_v7, %v2797_v39  ;;  %v7150_v39 = vld [vmem:[#allocation41_spill] sm:$0xff]  ;;  %v7151_v22 = vld [vmem:[#allocation42_spill] sm:$0xff] }
 0x440   : > { %v741_v58 = vadd.f32 %v7151_v22, %v7150_v39  ;;  %v7166_v22 = vld [vmem:[#allocation40_spill] sm:$0xff] }
 0x446   : > { %v2986_v47 = vpop.f32.mrf.mxu2  ;;  %v3035_v33 = vpop.f32.mrf.mxu3 }
 0x447   : > { %v3074_v6 = vadd.f32 %v2986_v47, %v6584_v30  ;;  %v3075_v7 = vadd.f32 %v3035_v33, %v6582_v59  ;;  %v7149_v30 = vld [vmem:[#allocation19_spill] sm:$0xff] }
 0x448   : > { %v3412_v17 = vpop.f32.mrf.mxu0  ;;  %v3461_v16 = vpop.f32.mrf.mxu1 }
 0x449   : > { %v3501_v27 = vadd.f32 %v3412_v17, %v3070_v43  ;;  %v3502_v26 = vadd.f32 %v3461_v16, %v3071_v15  ;;  %v7145_v43 = vld [vmem:[#allocation63_spill] sm:$0xff]  ;;  %v7146_v17 = vld [vmem:[#allocation64_spill] sm:$0xff] }
 0x44a   : > { %v1939_v15 = vadd.f32 %v7145_v43, %v1663_v3  ;;  %v1938_v16 = vadd.f32 %v7146_v17, %v1662_v41  ;;  %v7160_v43 = vld [vmem:[#allocation66_spill] sm:$0xff]  ;;  %v7161_v17 = vld [vmem:[#allocation67_spill] sm:$0xff] }
 0x44b   : > { %3533 = vst [vmem:[%s6777_s4] sm:$0xff] %v3501_v27  ;;  %v7147_v27 = vld [vmem:[#allocation7_spill] sm:$0xff] }
 0x44c   : > { %3534 = vst [vmem:[%s6777_s4 + $0x8] sm:$0xff] %v3502_v26  ;;  %v2370_v26 = vadd.f32 %v7147_v27, %v1939_v15  ;;  %v2369_v38 = vadd.f32 %v7148_v45, %v1938_v16  ;;  %v7162_v27 = vld [vmem:[#allocation8_spill] sm:$0xff]  ;;  %v7163_v45 = vld [vmem:[#allocation9_spill] sm:$0xff] }
 0x44e   : > { %v2988_v23 = vpop.f32.mrf.mxu2  ;;  %v3037_v21 = vpop.f32.mrf.mxu3  ;;  %v2801_v50 = vadd.f32 %v6592_v60, %v2370_v26  ;;  %v2800_v59 = vadd.f32 %v7149_v30, %v2369_v38  ;;  %v1234_v60 = vadd.f32 %v7155_v46, %v741_v58  ;;  %v7165_v30 = vld [vmem:[#allocation23_spill] sm:$0xff]  ;;  %v7167_v58 = vld [vmem:[#allocation48_spill] sm:$0xff] }
 0x44f   : > { %v795_v61 = vadd.f32 %v7167_v58, %v7166_v22  ;;  %v7169_v46 = vld [vmem:[#allocation56_spill] sm:$0xff] }
 0x450   : > { %v3414_v20 = vpop.f32.mrf.mxu0  ;;  %v3463_v8 = vpop.f32.mrf.mxu1  ;;  %v3076_v18 = vadd.f32 %v2988_v23, %v2800_v59  ;;  %v3077_v19 = vadd.f32 %v3037_v21, %v2801_v50  ;;  %v1666_v41 = vadd.f32 %v7156_v56, %v1234_v60  ;;  %v7158_v23 = vld [vmem:[#allocation11_spill] sm:$0xff]  ;;  %v7164_v50 = vld [vmem:[#allocation13_spill] sm:$0xff]  ;;  %v7170_v60 = vld [vmem:[#allocation62_spill] sm:$0xff] }
 0x451   : > { %v3503_v32 = vadd.f32 %v3414_v20, %v3072_v0  ;;  %v3504_v35 = vadd.f32 %v3463_v8, %v3073_v55  ;;  %v1670_v56 = vadd.f32 %v7170_v60, %v7169_v46 }
 0x452   : > { %v1942_v16 = vadd.f32 %v7161_v17, %v1666_v41  ;;  %v7171_v41 = vld [vmem:[#allocation65_spill] sm:$0xff] }
 0x453   : > { %3535 = vst [vmem:[%s6777_s4 + $0x10] sm:$0xff] %v3503_v32  ;;  %v7154_v32 = vld [vmem:[#allocation50_spill] sm:$0xff] }
 0x454   : > { %3536 = vst [vmem:[%s6777_s4 + $0x18] sm:$0xff] %v3504_v35  ;;  %v1235_v35 = vadd.f32 %v7154_v32, %v790_v40  ;;  %v2373_v38 = vadd.f32 %v7163_v45, %v1942_v16  ;;  %v7176_v16 = vld [vmem:[#allocation22_spill] sm:$0xff] }
 0x456   : > { %v2991_v14 = vpop.f32.mrf.mxu2  ;;  %v3040_v54 = vpop.f32.mrf.mxu3  ;;  %v1667_v3 = vadd.f32 %v7157_v42, %v1235_v35 }
 0x457   : > { %v3078_v21 = vadd.f32 %v2991_v14, %v7158_v23 }
 0x458   : > { %v3417_v25 = vpop.f32.mrf.mxu0  ;;  %v3466_v51 = vpop.f32.mrf.mxu1  ;;  %v1943_v15 = vadd.f32 %v7160_v43, %v1667_v3  ;;  %v7172_v3 = vld [vmem:[#allocation16_spill] sm:$0xff] }
 0x459   : > { %v3505_v9 = vadd.f32 %v3417_v25, %v3074_v6  ;;  %v3506_v57 = vadd.f32 %v3466_v51, %v3075_v7  ;;  %v7159_v6 = vld [vmem:[#allocation10_spill] sm:$0xff] }
 0x45a   : > { %v3079_v7 = vadd.f32 %v3040_v54, %v7159_v6  ;;  %v2374_v26 = vadd.f32 %v7162_v27, %v1943_v15  ;;  %v2804_v54 = vadd.f32 %v7165_v30, %v2373_v38 }
 0x45b   : > { %3537 = vst [vmem:[%s6777_s4 + $0x20] sm:$0xff] %v3505_v9 }
 0x45c   : > { %3538 = vst [vmem:[%s6777_s4 + $0x28] sm:$0xff] %v3506_v57  ;;  %v2805_v14 = vadd.f32 %v7164_v50, %v2374_v26  ;;  %v7178_v26 = vld [vmem:[#allocation70_spill] sm:$0xff] }
 0x45e   : > { %v2993_v47 = vpop.f32.mrf.mxu2  ;;  %v3042_v33 = vpop.f32.mrf.mxu3 }
 0x45f   : > { %v3080_v48 = vadd.f32 %v2993_v47, %v2804_v54  ;;  %v3081_v40 = vadd.f32 %v3042_v33, %v2805_v14  ;;  %v7173_v33 = vld [vmem:[#allocation21_spill] sm:$0xff] }
 0x460   : > { %v3419_v0 = vpop.f32.mrf.mxu0  ;;  %v3468_v55 = vpop.f32.mrf.mxu1 }
 0x461   : > { %v3507_v20 = vadd.f32 %v3419_v0, %v3076_v18  ;;  %v3508_v8 = vadd.f32 %v3468_v55, %v3077_v19 }
 0x463   : > { %3539 = vst [vmem:[%s6777_s4 + $0x30] sm:$0xff] %v3507_v20  ;;  %v7168_v20 = vld [vmem:[#allocation53_spill] sm:$0xff] }
 0x464   : > { %3540 = vst [vmem:[%s6777_s4 + $0x38] sm:$0xff] %v3508_v8  ;;  %v1239_v8 = vadd.f32 %v7168_v20, %v795_v61 }
 0x466   : > { %v2996_v10 = vpop.f32.mrf.mxu2  ;;  %v3045_v1 = vpop.f32.mrf.mxu3  ;;  %v1671_v42 = vadd.f32 %v7171_v41, %v1239_v8 }
 0x467   : > { %v3082_v47 = vadd.f32 %v2996_v10, %v7172_v3  ;;  %v3083_v23 = vadd.f32 %v3045_v1, %v7173_v33 }
 0x468   : > { %v3422_v25 = vpop.f32.mrf.mxu0  ;;  %v3471_v51 = vpop.f32.mrf.mxu1 }
 0x469   : > { %v3509_v9 = vadd.f32 %v3422_v25, %v3078_v21  ;;  %v3510_v57 = vadd.f32 %v3471_v51, %v3079_v7  ;;  %v7174_v7 = vld [vmem:[#allocation68_spill] sm:$0xff]  ;;  %v7175_v51 = vld [vmem:[#allocation69_spill] sm:$0xff] }
 0x46a   : > { %v1947_v25 = vadd.f32 %v7174_v7, %v1671_v42  ;;  %v1946_v43 = vadd.f32 %v7175_v51, %v1670_v56 }
 0x46b   : > { %3541 = vst [vmem:[%s6777_s4 + $0x40] sm:$0xff] %v3509_v9 }
 0x46c   : > { %3542 = vst [vmem:[%s6777_s4 + $0x48] sm:$0xff] %v3510_v57  ;;  %v2378_v9 = vadd.f32 %v7176_v16, %v1947_v25  ;;  %v7177_v57 = vld [vmem:[#allocation20_spill] sm:$0xff] }
 0x46d   : > { %v2377_v27 = vadd.f32 %v7177_v57, %v1946_v43 }
 0x46e   : > { %v2998_v59 = vpop.f32.mrf.mxu2  ;;  %v3047_v39 = vpop.f32.mrf.mxu3  ;;  %v2809_v10 = vadd.f32 %v6624_v2, %v2378_v9 }
 0x46f   : > { %v2808_v1 = vadd.f32 %v7178_v26, %v2377_v27  ;;  %v7179_v27 = vld [vmem:[#allocation31_spill] sm:$0xff]  ;;  %v7182_v26 = vld [vmem:[#allocation58_spill] sm:$0xff] }
 0x470   : > { %v3424_v18 = vpop.f32.mrf.mxu0  ;;  %v3473_v19 = vpop.f32.mrf.mxu1  ;;  %v3085_v38 = vadd.f32 %v3047_v39, %v2809_v10 }
 0x471   : > { %v3511_v0 = vadd.f32 %v3424_v18, %v3080_v48  ;;  %v3512_v55 = vadd.f32 %v3473_v19, %v3081_v40  ;;  %v3084_v45 = vadd.f32 %v2998_v59, %v2808_v1 }
 0x473   : > { %3543 = vst [vmem:[%s6777_s4 + $0x50] sm:$0xff] %v3511_v0 }
 0x474   : > { %3544 = vst [vmem:[%s6777_s4 + $0x58] sm:$0xff] %v3512_v55 }
 0x476   : > { %v3001_v32 = vpop.f32.mrf.mxu2  ;;  %v3050_v35 = vpop.f32.mrf.mxu3 }
 0x477   : > { %v3086_v61 = vadd.f32 %v3001_v32, %v6640_v63  ;;  %v3087_v48 = vadd.f32 %v3050_v35, %v6637_v52 }
 0x478   : > { %v3427_v21 = vpop.f32.mrf.mxu0  ;;  %v3476_v6 = vpop.f32.mrf.mxu1 }
 0x479   : > { %v3513_v15 = vadd.f32 %v3427_v21, %v3082_v47  ;;  %v3514_v17 = vadd.f32 %v3476_v6, %v3083_v23 }
 0x47b   : > { %3545 = vst [vmem:[%s6777_s4 + $0x60] sm:$0xff] %v3513_v15 }
 0x47c   : > { %3546 = vst [vmem:[%s6777_s4 + $0x68] sm:$0xff] %v3514_v17 }
 0x47e   : > { %v3003_v50 = vpop.f32.mrf.mxu2  ;;  %v3052_v14 = vpop.f32.mrf.mxu3 }
 0x47f   : > { %v3088_v0 = vadd.f32 %v3003_v50, %v6650_v4  ;;  %v3089_v55 = vadd.f32 %v3052_v14, %v6648_v5 }
 0x480   : > { %v3429_v30 = vpop.f32.mrf.mxu0  ;;  %v3478_v54 = vpop.f32.mrf.mxu1 }
 0x481   : > { %v3515_v22 = vadd.f32 %v3429_v30, %v3084_v45  ;;  %v3516_v58 = vadd.f32 %v3478_v54, %v3085_v38  ;;  %v7183_v30 = vld [vmem:[#allocation59_spill] sm:$0xff]  ;;  %v7184_v54 = vld [vmem:[#allocation5_spill] sm:$0xff] }
 0x483   : > { %3547 = vst [vmem:[%s6777_s4 + $0x70] sm:$0xff] %v3515_v22  ;;  %v7185_v22 = vld [vmem:[#allocation25_spill] sm:$0xff] }
 0x484   : > { %3548 = vst [vmem:[%s6777_s4 + $0x78] sm:$0xff] %v3516_v58 }
 0x486   : > { %v3006_v59 = vpop.f32.mrf.mxu2  ;;  %v3055_v39 = vpop.f32.mrf.mxu3 }
 0x487   : > { %v3090_v46 = vadd.f32 %v3006_v59, %v6667_v31  ;;  %v3091_v60 = vadd.f32 %v3055_v39, %v6664_v13 }
 0x488   : > { %v3432_v40 = vpop.f32.mrf.mxu0  ;;  %v3481_v2 = vpop.f32.mrf.mxu1 }
 0x489   : > { %v3517_v18 = vadd.f32 %v3432_v40, %v3086_v61  ;;  %v3518_v19 = vadd.f32 %v3481_v2, %v3087_v48  ;;  %v7186_v61 = vld [vmem:[#allocation24_spill] sm:$0xff] }
 0x48b   : > { %3549 = vst [vmem:[%s6777_s4 + $0x80] sm:$0xff] %v3517_v18  ;;  %v7187_v18 = vld [vmem:[#allocation15_spill] sm:$0xff] }
 0x48c   : > { %3550 = vst [vmem:[%s6777_s4 + $0x88] sm:$0xff] %v3518_v19 }
 0x48e   : > { %v3008_v32 = vpop.f32.mrf.mxu2  ;;  %v3057_v35 = vpop.f32.mrf.mxu3 }
 0x48f   : > { %v3092_v47 = vadd.f32 %v3008_v32, %v6677_v37  ;;  %v3093_v33 = vadd.f32 %v3057_v35, %v6675_v36 }
 0x490   : > { %v3434_v20 = vpop.f32.mrf.mxu0  ;;  %v3483_v63 = vpop.f32.mrf.mxu1 }
 0x491   : > { %v3519_v8 = vadd.f32 %v3434_v20, %v3088_v0  ;;  %v3520_v52 = vadd.f32 %v3483_v63, %v3089_v55  ;;  %v7188_v0 = vld [vmem:[#allocation6_spill] sm:$0xff] }
 0x493   : > { %3551 = vst [vmem:[%s6777_s4 + $0x90] sm:$0xff] %v3519_v8 }
 0x494   : > { %3552 = vst [vmem:[%s6777_s4 + $0x98] sm:$0xff] %v3520_v52 }
 0x496   : > { %v3011_v5 = vpop.f32.mrf.mxu2  ;;  %v3060_v3 = vpop.f32.mrf.mxu3 }
 0x497   : > { %v3094_v13 = vadd.f32 %v3011_v5, %v6694_v62  ;;  %v3095_v7 = vadd.f32 %v3060_v3, %v6691_v12  ;;  %v7180_v62 = vld [vmem:[#allocation57_spill] sm:$0xff]  ;;  %v7181_v12 = vld [vmem:[#allocation34_spill] sm:$0xff] }
 0x498   : > { %v3437_v56 = vpop.f32.mrf.mxu0  ;;  %v3486_v4 = vpop.f32.mrf.mxu1  ;;  %v766_v10 = vadd.f32 %v7180_v62, %v7179_v27  ;;  %v815_v1 = vadd.f32 %v7182_v26, %v7181_v12 }
 0x499   : > { %v3521_v41 = vadd.f32 %v3437_v56, %v3090_v46  ;;  %v3522_v42 = vadd.f32 %v3486_v4, %v3091_v60 }
 0x49b   : > { %3553 = vst [vmem:[%s6777_s4 + $0xa0] sm:$0xff] %v3521_v41 }
 0x49c   : > { %3554 = vst [vmem:[%s6777_s4 + $0xa8] sm:$0xff] %v3522_v42 }
 0x49e   : > { %v3013_v25 = vpop.f32.mrf.mxu2  ;;  %v3062_v51 = vpop.f32.mrf.mxu3 }
 0x49f   : > { %v3096_v36 = vadd.f32 %v3013_v25, %v6707_v44  ;;  %v3097_v16 = vadd.f32 %v3062_v51, %v6705_v11  ;;  %v1255_v44 = vadd.f32 %v7183_v30, %v815_v1  ;;  %v1254_v11 = vadd.f32 %v7184_v54, %v766_v10 }
 0x4a0   : > { %v3439_v23 = vpop.f32.mrf.mxu0  ;;  %v3488_v31 = vpop.f32.mrf.mxu1 }
 0x4a1   : > { %v3523_v21 = vadd.f32 %v3439_v23, %v3092_v47  ;;  %v3524_v6 = vadd.f32 %v3488_v31, %v3093_v33  ;;  %v1686_v58 = vadd.f32 %v7185_v22, %v1254_v11  ;;  %v1687_v48 = vadd.f32 %v7186_v61, %v1255_v44 }
 0x4a3   : > { %3555 = vst [vmem:[%s6777_s4 + $0xb0] sm:$0xff] %v3523_v21  ;;  %v1963_v19 = vadd.f32 %v7187_v18, %v1687_v48  ;;  %v1962_v55 = vadd.f32 %v7188_v0, %v1686_v58 }
 0x4a4   : > { %3556 = vst [vmem:[%s6777_s4 + $0xb8] sm:$0xff] %v3524_v6 }
 0x4a5   : > { %v2394_v8 = vadd.f32 %v6749_v29, %v1963_v19  ;;  %v2393_v52 = vadd.f32 %v6751_v24, %v1962_v55 }
 0x4a6   : > { %v3016_v50 = vpop.f32.mrf.mxu2  ;;  %v3065_v14 = vpop.f32.mrf.mxu3 }
 0x4a7   : > { %v3098_v40 = vadd.f32 %v3016_v50, %v6714_v34  ;;  %v3099_v2 = vadd.f32 %v3065_v14, %v6712_v28  ;;  %v2825_v28 = vadd.f32 %v6760_v53, %v2394_v8  ;;  %v2824_v35 = vadd.f32 %v6762_v49, %v2393_v52 }
 0x4a8   : > { %v3442_v43 = vpop.f32.mrf.mxu0  ;;  %v3491_v15 = vpop.f32.mrf.mxu1 }
 0x4a9   : > { %v3525_v37 = vadd.f32 %v3442_v43, %v3094_v13  ;;  %v3526_v17 = vadd.f32 %v3491_v15, %v3095_v7 }
 0x4ab   : > { %3557 = vst [vmem:[%s6777_s4 + $0xc0] sm:$0xff] %v3525_v37 }
 0x4ac   : > { %3558 = vst [vmem:[%s6777_s4 + $0xc8] sm:$0xff] %v3526_v17 }
 0x4ae   : > { %v3018_v32 = vpop.f32.mrf.mxu2  ;;  %v3067_v34 = vpop.f32.mrf.mxu3 }
 0x4af   : > { %v3100_v46 = vadd.f32 %v3018_v32, %v2824_v35  ;;  %v3101_v29 = vadd.f32 %v3067_v34, %v2825_v28 }
 0x4b0   : > { %v3444_v9 = vpop.f32.mrf.mxu0  ;;  %v3493_v57 = vpop.f32.mrf.mxu1 }
 0x4b1   : > { %v3527_v45 = vadd.f32 %v3444_v9, %v3096_v36  ;;  %v3528_v38 = vadd.f32 %v3493_v57, %v3097_v16 }
 0x4b3   : > { %3559 = vst [vmem:[%s6777_s4 + $0xd0] sm:$0xff] %v3527_v45 }
 0x4b4   : > { %3560 = vst [vmem:[%s6777_s4 + $0xd8] sm:$0xff] %v3528_v38 }
 0x4b8   : > { %v3447_v59 = vpop.f32.mrf.mxu0  ;;  %v3496_v39 = vpop.f32.mrf.mxu1 }
 0x4b9   : > { %v3529_v20 = vadd.f32 %v3447_v59, %v3098_v40  ;;  %v3530_v63 = vadd.f32 %v3496_v39, %v3099_v2 }
 0x4bb   : > { %3561 = vst [vmem:[%s6777_s4 + $0xe0] sm:$0xff] %v3529_v20 }
 0x4bc   : > { %3562 = vst [vmem:[%s6777_s4 + $0xe8] sm:$0xff] %v3530_v63 }
 0x4c0   : > { %v3449_v24 = vpop.f32.mrf.mxu0  ;;  %v3498_v60 = vpop.f32.mrf.mxu1 }
 0x4c1   : > { %v3531_v56 = vadd.f32 %v3449_v24, %v3100_v46  ;;  %v3532_v4 = vadd.f32 %v3498_v60, %v3101_v29 }
 0x4c3   : > { %3563 = vst [vmem:[%s6777_s4 + $0xf0] sm:$0xff] %v3531_v56 }
 0x4c4   : > { %3564 = vst [vmem:[%s6777_s4 + $0xf8] sm:$0xff] %v3532_v4 }
 0x4c5   : > { %4425 = shalt.err (!%p4422_p3)
}
 0x4c6   : > { %s4476_s3 = smov 256  }
 0x4c7   : > { %4280 = dma.vmem_to_hbm [thread:$0]  (%p4530_p5), %s3579_s13, 4096, %s3581_s16, %s3566_s17, %s4476_s3, %s4476_s3, %s4465_s28  }
 0x4c8 PF: > { %p4286_p4 = scmp.ge.s32.totalorder %s4460_s12, 2  ;;  %s3595_s23 = sand.u32 1, %s4448_s9  }
 0x4c9   : > { %s3596_s5 = scalar_lea.sflag [#allocation3], %s3595_s23 }
 0x4ca   : > { %p4283_p7 = pnand %p4286_p4, %p4534_p6 }
 0x4cc   : > { %p4284_p8 = pneg %p4283_p7 }
 0x4ce   : > { %4443 = dma.done.wait (%p4284_p8), %s3596_s5, 4096  }
 0x4cf   : > { %4445 = vsyncadd (%p4284_p8), %s3596_s5, 4294963200  ;;  %p12_p9 = scmp.ge.s32.totalorder %s4517_s15, 4   ;;  %s7189_s9 = smov %s4452_s10 }
 0x4d0   : > { %s7190_s10 = smov %s4456_s11  ;;  %s7191_s11 = smov %s4528_s18 }
 0x4d1   : > { %s7192_s12 = smov %s4517_s15  ;;  %14 = sbr.rel (!%p12_p9) target bundleno = 3 (0x3), region = 71 }
 0x4d6   :  { %3602 = vsyncpa [#allocation3], 1 }
 0x4d7   :  { %3604 = vsyncpa [#allocation3 + $0x1], 1 }

</bundles_post_ra>
